<compile_context>
chip_gen: v5e
topology: v5e:2x2
jax: 0.10.0
libtpu: 0.0.40
codegen_flags: <defaults>
</compile_context>

<pallas_src>
import numpy as np
import jax
import jax.numpy as jnp
from jax.experimental import pallas as pl
from jax.experimental.pallas import tpu as pltpu

DIM = 32          # `dim` argument of Net2
N_BATCH = 2
SEQ_LEN = 128     # fc0 expects 192 = 64*3 flattened features -> input length must be 128
EPS = 1e-5
CONV_SHAPES = ((16, 6, 3), (32, 16, 3), (32, 32, 3), (64, 32, 3), (64, 64, 5))
CONV_KS = tuple(s[2] for s in CONV_SHAPES)


# ----------------------------- host-side constants -------------------------------
def make_selection_matrices():
    """Folded 0/1 matrices (bf16): MaxPool1d(2,2) row gather + zero re-pad of the next
    batch-folded slab (layers 1-4), and the l-major flatten gather (layer 5).
    Invariant: pairwise-max rows that straddle the two batch segments are garbage but
    are never selected by these matrices."""
    sels = []
    L = SEQ_LEN
    for li, k in enumerate(CONV_KS):
        S = L + 2                       # padded per-batch segment length
        Lout = L + 3 - k                # conv output length per batch (pad=1)
        P = Lout // 2                   # pooled length
        M = N_BATCH * S - (k - 1)       # rows of the batch-folded conv output
        if li < len(CONV_KS) - 1:
            S_next = P + 2
            sel = np.zeros((N_BATCH * S_next, M - 1), np.float32)
            for n in range(N_BATCH):
                for j in range(P):
                    # interior row j of batch n's next (zero-padded) segment <- pooled pair 2j
                    sel[n * S_next + 1 + j, n * S + 2 * j] = 1.0
        else:
            # last layer: rows ordered l-major so the FC can lane-concat f[l*N:(l+1)*N]
            sel = np.zeros((P * N_BATCH, M - 1), np.float32)
            for n in range(N_BATCH):
                for l in range(P):
                    sel[l * N_BATCH + n, n * S + 2 * l] = 1.0
        sels.append(jnp.asarray(sel, jnp.bfloat16))
        L = P
    return sels


def init_params(key, dim):
    """Deterministic PyTorch-layout parameters (conv weights, BN stats, fc)."""
    keys = jax.random.split(key, 32)
    ki = iter(keys)
    tp = {}
    for i, (co, ci, k) in enumerate(CONV_SHAPES, start=1):
        bound = 1.0 / np.sqrt(ci * k)
        tp[f"conv{i}_w"] = jax.random.uniform(next(ki), (co, ci, k),
                                              jnp.float32, -bound, bound)
        g = 0.5 + jax.random.uniform(next(ki), (co,), jnp.float32)     # gamma
        b = 0.1 * jax.random.normal(next(ki), (co,), jnp.float32)      # beta
        m = 0.1 * jax.random.normal(next(ki), (co,), jnp.float32)      # running_mean
        v = 0.5 + jax.random.uniform(next(ki), (co,), jnp.float32)     # running_var
        tp[f"bn{i}"] = (g, b, m, v)
    bound = 1.0 / np.sqrt(192.0)
    tp["fc_w"] = jax.random.uniform(next(ki), (dim, 192), jnp.float32, -bound, bound)
    tp["fc_b"] = jax.random.uniform(next(ki), (dim,), jnp.float32, -bound, bound)
    return tp


def to_kernel_params(tp, dim):
    """Fold BN scale into the conv weights (exact), stack conv taps to (K*Cin, Cout),
    pre-permute/flatten the FC weight, and pack all small constants into one (8,128)."""
    assert dim <= 128
    kp = {}
    cst = np.zeros((8, 128), np.float32)
    for i, (co, ci, k) in enumerate(CONV_SHAPES, start=1):
        w = np.asarray(tp[f"conv{i}_w"], np.float32)                  # (Cout, Cin, K)
        g, b, m, v = (np.asarray(a, np.float32) for a in tp[f"bn{i}"])
        scale = g / np.sqrt(v + EPS)
        w_folded = w * scale[:, None, None]                           # fold BN scale (exact)
        w_stacked = np.transpose(w_folded, (2, 1, 0)).reshape(k * ci, co)   # (K*Cin, Cout)
        kp[f"w{i}"] = jnp.asarray(w_stacked, jnp.bfloat16)
        cst[i - 1, :co] = b - m * scale                               # folded BN shift
    # fc0: feature index in PyTorch NCL flatten is c*3 + l; our FC LHS is l-major,
    # so store wfc[l*64 + c, d] = fc_w[d, c*3 + l].
    wfc = np.asarray(tp["fc_w"], np.float32).reshape(dim, 64, 3)      # (d, c, l)
    kp["wfc"] = jnp.asarray(np.transpose(wfc, (2, 1, 0)).reshape(192, dim), jnp.bfloat16)
    cst[5, :dim] = np.asarray(tp["fc_b"], np.float32)
    kp["cst"] = jnp.asarray(cst)
    return kp


# ----------------------------- Pallas kernel -------------------------------------
def make_net2_kernel(merge_taps):
    """merge_taps=True : each Conv1d is ONE bf16 matmul on an im2col LHS built by
                         lane-concatenating the K shifted row-slices (+ single-dot FC).
       merge_taps=False: per-tap matmuls, no in-kernel lane concat (fallback)."""

    def kernel(x_ref,
               w1_ref, w2_ref, w3_ref, w4_ref, w5_ref,
               sel1_ref, sel2_ref, sel3_ref, sel4_ref, sel5_ref,
               wfc_ref, cst_ref, out_ref):
        cst = cst_ref[...]            # (8,128) f32: rows 0-4 = BN shifts, row 5 = FC bias

        def conv_bn_relu(h, w_ref, shift):
            """Conv1d (stride 1) on the batch-folded slab + folded BN + ReLU."""
            c_in = h.shape[1]
            k_sz = w_ref.shape[0] // c_in
            m = h.shape[0] - (k_sz - 1)
            if merge_taps:
                lhs = jnp.concatenate([h[k:k + m, :] for k in range(k_sz)],
                                      axis=1).astype(jnp.bfloat16)      # (m, K*Cin)
                acc = jnp.dot(lhs, w_ref[...], preferred_element_type=jnp.float32)
            else:
                acc = None
                for k in range(k_sz):
                    part = jnp.dot(h[k:k + m, :].astype(jnp.bfloat16),
                                   w_ref[k * c_in:(k + 1) * c_in, :],
                                   preferred_element_type=jnp.float32)
                    acc = part if acc is None else acc + part
            # BN shift + ReLU in f32 (v5e-safe elementwise).
            return jnp.maximum(acc + shift, 0.0)

        def pool_refold(act, sel_ref):
            """MaxPool1d(2,2) + zero re-pad + batch re-fold via one 0/1 bf16 matmul.
            Pairwise-max rows straddling batch segments are never selected."""
            r = act.shape[0]
            pm = jnp.maximum(act[0:r - 1, :], act[1:r, :]).astype(jnp.bfloat16)
            return jnp.dot(sel_ref[...], pm, preferred_element_type=jnp.float32)

        h = x_ref[...]                                     # (N*(L+2), 6) f32 padded slab
        w_refs = (w1_ref, w2_ref, w3_ref, w4_ref, w5_ref)
        sel_refs = (sel1_ref, sel2_ref, sel3_ref, sel4_ref, sel5_ref)
        for i in range(5):
            c_out = w_refs[i].shape[1]
            act = conv_bn_relu(h, w_refs[i], cst[i:i + 1, 0:c_out])
            h = pool_refold(act, sel_refs[i])
        # h is now (3*N, 64): row l*N + n = layer-5 pooled output at position l, batch n.

        n = out_ref.shape[0]
        dim = out_ref.shape[1]
        bias = cst[5:6, 0:dim]
        if merge_taps:
            fc_lhs = jnp.concatenate([h[l * n:(l + 1) * n, :] for l in range(3)],
                                     axis=1).astype(jnp.bfloat16)       # (N, 192)
            out = jnp.dot(fc_lhs, wfc_ref[...], preferred_element_type=jnp.float32)
        else:
            out = None
            for l in range(3):
                part = jnp.dot(h[l * n:(l + 1) * n, :].astype(jnp.bfloat16),
                               wfc_ref[l * 64:(l + 1) * 64, :],
                               preferred_element_type=jnp.float32)
                out = part if out is None else out + part
        out_ref[...] = jnp.maximum(out + bias, 0.0)                     # fc0 + ReLU

    return kernel


def build_net2_pallas(kp, sels, merge_taps):
    kernel = make_net2_kernel(merge_taps)
    dim = kp["wfc"].shape[1]
    vmem = pltpu.MemorySpace.VMEM

    @jax.jit
    def fn(x_ncl):
        n, cin, length = x_ncl.shape
        # Host-side prep (plain XLA, free): NCL -> NLC, zero pad=1, fold batch into
        # one (N*(L+2), Cin) slab with channels on the lane (minor) dim.
        x_nlc = jnp.transpose(x_ncl, (0, 2, 1))
        slab = jnp.pad(x_nlc, ((0, 0), (1, 1), (0, 0))).reshape(n * (length + 2), cin)
        args = (slab,
                kp["w1"], kp["w2"], kp["w3"], kp["w4"], kp["w5"],
                sels[0], sels[1], sels[2], sels[3], sels[4],
                kp["wfc"], kp["cst"])
        return pl.pallas_call(
            kernel,
            out_shape=jax.ShapeDtypeStruct((n, dim), jnp.float32),
            in_specs=[pl.BlockSpec(memory_space=vmem)] * len(args),
            out_specs=pl.BlockSpec(memory_space=vmem),
        )(*args)

    return fn


# ----------------------------- pure-JAX reference (PyTorch semantics) ------------
def net2_reference(x_ncl, tp):
    h = x_ncl
    for i in range(1, 6):
        w = tp[f"conv{i}_w"]
        h = jax.lax.conv_general_dilated(
            h, w, window_strides=(1,), padding=[(1, 1)],
            dimension_numbers=("NCH", "OIH", "NCH"))
        g, b, m, v = tp[f"bn{i}"]
        h = (h - m[None, :, None]) / jnp.sqrt(v[None, :, None] + EPS) \
            * g[None, :, None] + b[None, :, None]
        h = jax.nn.relu(h)
        n_, c_, l_ = h.shape
        h = jnp.max(h.reshape(n_, c_, l_ // 2, 2), axis=3)     # max_pool1d(2, 2)
    h = h.reshape(h.shape[0], -1)                              # NCL flatten -> 192
    return jax.nn.relu(h @ tp["fc_w"].T + tp["fc_b"][None, :])


# ----------------------------- main -----------------------------------------------
if __name__ == "__main__":
    key = jax.random.PRNGKey(0)
    k_param, k_x = jax.random.split(key)
    tp = init_params(k_param, DIM)
    kp = to_kernel_params(tp, DIM)
    sels = make_selection_matrices()

    x_ncl = jax.random.normal(k_x, (N_BATCH, 6, SEQ_LEN), jnp.float32)   # PyTorch NCL

    try:
        out = jax.block_until_ready(build_net2_pallas(kp, sels, merge_taps=True)(x_ncl))
    except Exception:
        # Fallback for Mosaic builds without unaligned minor-dim concatenation:
        # identical math, per-tap conv/FC matmuls instead of im2col lane-concat.
        out = jax.block_until_ready(build_net2_pallas(kp, sels, merge_taps=False)(x_ncl))

    ref = jax.block_until_ready(net2_reference(x_ncl, tp))
    # bf16 MXU operands (f32 accumulation) across 5 conv layers -> loosened tolerance.
    np.testing.assert_allclose(np.asarray(out), np.asarray(ref), rtol=2e-2, atol=2e-2)
    print("KERNEL_OK")
</pallas_src>

<mosaic_0001>
module attributes {stable_mosaic.version = 11 : i64} {
  func.func @kernel(%arg0: memref<260x6xf32, #tpu.memory_space<vmem>>, %arg1: memref<18x16xbf16, #tpu.memory_space<vmem>>, %arg2: memref<48x32xbf16, #tpu.memory_space<vmem>>, %arg3: memref<96x32xbf16, #tpu.memory_space<vmem>>, %arg4: memref<96x64xbf16, #tpu.memory_space<vmem>>, %arg5: memref<320x64xbf16, #tpu.memory_space<vmem>>, %arg6: memref<132x257xbf16, #tpu.memory_space<vmem>>, %arg7: memref<68x129xbf16, #tpu.memory_space<vmem>>, %arg8: memref<36x65xbf16, #tpu.memory_space<vmem>>, %arg9: memref<20x33xbf16, #tpu.memory_space<vmem>>, %arg10: memref<6x15xbf16, #tpu.memory_space<vmem>>, %arg11: memref<192x32xbf16, #tpu.memory_space<vmem>>, %arg12: memref<8x128xf32, #tpu.memory_space<vmem>>, %arg13: memref<2x32xf32, #tpu.memory_space<vmem>>) attributes {dimension_semantics = [], scalar_prefetch = 0 : i64, scratch_operands = 0 : i64, tpu.core_type = #tpu.core_type<tc>} {
    %c0 = arith.constant 0 : index
    %c0_0 = arith.constant 0 : index
    %0 = vector.load %arg12[%c0, %c0_0] : memref<8x128xf32, #tpu.memory_space<vmem>>, vector<8x128xf32>
    %c0_1 = arith.constant 0 : index
    %c0_2 = arith.constant 0 : index
    %1 = vector.load %arg0[%c0_1, %c0_2] : memref<260x6xf32, #tpu.memory_space<vmem>>, vector<260x6xf32>
    %2 = vector.extract_strided_slice %0 {offsets = [0, 0], sizes = [1, 16], strides = [1, 1]} : vector<8x128xf32> to vector<1x16xf32>
    %3 = vector.extract_strided_slice %1 {offsets = [0, 0], sizes = [258, 6], strides = [1, 1]} : vector<260x6xf32> to vector<258x6xf32>
    %4 = vector.extract_strided_slice %1 {offsets = [1, 0], sizes = [258, 6], strides = [1, 1]} : vector<260x6xf32> to vector<258x6xf32>
    %5 = vector.extract_strided_slice %1 {offsets = [2, 0], sizes = [258, 6], strides = [1, 1]} : vector<260x6xf32> to vector<258x6xf32>
    %6 = tpu.concatenate %3, %4, %5 in 1 : vector<258x6xf32>, vector<258x6xf32>, vector<258x6xf32> -> vector<258x18xf32>
    %7 = arith.truncf %6 : vector<258x18xf32> to vector<258x18xbf16>
    %c0_3 = arith.constant 0 : index
    %c0_4 = arith.constant 0 : index
    %8 = vector.load %arg1[%c0_3, %c0_4] : memref<18x16xbf16, #tpu.memory_space<vmem>>, vector<18x16xbf16>
    %cst = arith.constant dense<0.000000e+00> : vector<258x16xf32>
    %9 = tpu.matmul %7, %8, %cst {dimension_numbers = #tpu.dot_dimension_numbers<[1], [0], [0], [1], [0, 0, 1, 1], [], []>} : vector<258x18xbf16>, vector<18x16xbf16>, vector<258x16xf32> -> vector<258x16xf32>
    %10 = vector.broadcast %2 : vector<1x16xf32> to vector<258x16xf32>
    %11 = arith.addf %9, %10 : vector<258x16xf32>
    %cst_5 = arith.constant 0.000000e+00 : f32
    %12 = vector.broadcast %cst_5 : f32 to vector<258x16xf32>
    %13 = arith.maximumf %11, %12 : vector<258x16xf32>
    %14 = vector.extract_strided_slice %13 {offsets = [0, 0], sizes = [257, 16], strides = [1, 1]} : vector<258x16xf32> to vector<257x16xf32>
    %15 = vector.extract_strided_slice %13 {offsets = [1, 0], sizes = [257, 16], strides = [1, 1]} : vector<258x16xf32> to vector<257x16xf32>
    %16 = arith.maximumf %14, %15 : vector<257x16xf32>
    %17 = arith.truncf %16 : vector<257x16xf32> to vector<257x16xbf16>
    %c0_6 = arith.constant 0 : index
    %c0_7 = arith.constant 0 : index
    %18 = vector.load %arg6[%c0_6, %c0_7] : memref<132x257xbf16, #tpu.memory_space<vmem>>, vector<132x257xbf16>
    %cst_8 = arith.constant dense<0.000000e+00> : vector<132x16xf32>
    %19 = tpu.matmul %18, %17, %cst_8 {dimension_numbers = #tpu.dot_dimension_numbers<[1], [0], [0], [1], [0, 0, 1, 1], [], []>} : vector<132x257xbf16>, vector<257x16xbf16>, vector<132x16xf32> -> vector<132x16xf32>
    %20 = vector.extract_strided_slice %0 {offsets = [1, 0], sizes = [1, 32], strides = [1, 1]} : vector<8x128xf32> to vector<1x32xf32>
    %21 = vector.extract_strided_slice %19 {offsets = [0, 0], sizes = [130, 16], strides = [1, 1]} : vector<132x16xf32> to vector<130x16xf32>
    %22 = vector.extract_strided_slice %19 {offsets = [1, 0], sizes = [130, 16], strides = [1, 1]} : vector<132x16xf32> to vector<130x16xf32>
    %23 = vector.extract_strided_slice %19 {offsets = [2, 0], sizes = [130, 16], strides = [1, 1]} : vector<132x16xf32> to vector<130x16xf32>
    %24 = tpu.concatenate %21, %22, %23 in 1 : vector<130x16xf32>, vector<130x16xf32>, vector<130x16xf32> -> vector<130x48xf32>
    %25 = arith.truncf %24 : vector<130x48xf32> to vector<130x48xbf16>
    %c0_9 = arith.constant 0 : index
    %c0_10 = arith.constant 0 : index
    %26 = vector.load %arg2[%c0_9, %c0_10] : memref<48x32xbf16, #tpu.memory_space<vmem>>, vector<48x32xbf16>
    %cst_11 = arith.constant dense<0.000000e+00> : vector<130x32xf32>
    %27 = tpu.matmul %25, %26, %cst_11 {dimension_numbers = #tpu.dot_dimension_numbers<[1], [0], [0], [1], [0, 0, 1, 1], [], []>} : vector<130x48xbf16>, vector<48x32xbf16>, vector<130x32xf32> -> vector<130x32xf32>
    %28 = vector.broadcast %20 : vector<1x32xf32> to vector<130x32xf32>
    %29 = arith.addf %27, %28 : vector<130x32xf32>
    %cst_12 = arith.constant 0.000000e+00 : f32
    %30 = vector.broadcast %cst_12 : f32 to vector<130x32xf32>
    %31 = arith.maximumf %29, %30 : vector<130x32xf32>
    %32 = vector.extract_strided_slice %31 {offsets = [0, 0], sizes = [129, 32], strides = [1, 1]} : vector<130x32xf32> to vector<129x32xf32>
    %33 = vector.extract_strided_slice %31 {offsets = [1, 0], sizes = [129, 32], strides = [1, 1]} : vector<130x32xf32> to vector<129x32xf32>
    %34 = arith.maximumf %32, %33 : vector<129x32xf32>
    %35 = arith.truncf %34 : vector<129x32xf32> to vector<129x32xbf16>
    %c0_13 = arith.constant 0 : index
    %c0_14 = arith.constant 0 : index
    %36 = vector.load %arg7[%c0_13, %c0_14] : memref<68x129xbf16, #tpu.memory_space<vmem>>, vector<68x129xbf16>
    %cst_15 = arith.constant dense<0.000000e+00> : vector<68x32xf32>
    %37 = tpu.matmul %36, %35, %cst_15 {dimension_numbers = #tpu.dot_dimension_numbers<[1], [0], [0], [1], [0, 0, 1, 1], [], []>} : vector<68x129xbf16>, vector<129x32xbf16>, vector<68x32xf32> -> vector<68x32xf32>
    %38 = vector.extract_strided_slice %0 {offsets = [2, 0], sizes = [1, 32], strides = [1, 1]} : vector<8x128xf32> to vector<1x32xf32>
    %39 = vector.extract_strided_slice %37 {offsets = [0, 0], sizes = [66, 32], strides = [1, 1]} : vector<68x32xf32> to vector<66x32xf32>
    %40 = vector.extract_strided_slice %37 {offsets = [1, 0], sizes = [66, 32], strides = [1, 1]} : vector<68x32xf32> to vector<66x32xf32>
    %41 = vector.extract_strided_slice %37 {offsets = [2, 0], sizes = [66, 32], strides = [1, 1]} : vector<68x32xf32> to vector<66x32xf32>
    %42 = tpu.concatenate %39, %40, %41 in 1 : vector<66x32xf32>, vector<66x32xf32>, vector<66x32xf32> -> vector<66x96xf32>
    %43 = arith.truncf %42 : vector<66x96xf32> to vector<66x96xbf16>
    %c0_16 = arith.constant 0 : index
    %c0_17 = arith.constant 0 : index
    %44 = vector.load %arg3[%c0_16, %c0_17] : memref<96x32xbf16, #tpu.memory_space<vmem>>, vector<96x32xbf16>
    %cst_18 = arith.constant dense<0.000000e+00> : vector<66x32xf32>
    %45 = tpu.matmul %43, %44, %cst_18 {dimension_numbers = #tpu.dot_dimension_numbers<[1], [0], [0], [1], [0, 0, 1, 1], [], []>} : vector<66x96xbf16>, vector<96x32xbf16>, vector<66x32xf32> -> vector<66x32xf32>
    %46 = vector.broadcast %38 : vector<1x32xf32> to vector<66x32xf32>
    %47 = arith.addf %45, %46 : vector<66x32xf32>
    %cst_19 = arith.constant 0.000000e+00 : f32
    %48 = vector.broadcast %cst_19 : f32 to vector<66x32xf32>
    %49 = arith.maximumf %47, %48 : vector<66x32xf32>
    %50 = vector.extract_strided_slice %49 {offsets = [0, 0], sizes = [65, 32], strides = [1, 1]} : vector<66x32xf32> to vector<65x32xf32>
    %51 = vector.extract_strided_slice %49 {offsets = [1, 0], sizes = [65, 32], strides = [1, 1]} : vector<66x32xf32> to vector<65x32xf32>
    %52 = arith.maximumf %50, %51 : vector<65x32xf32>
    %53 = arith.truncf %52 : vector<65x32xf32> to vector<65x32xbf16>
    %c0_20 = arith.constant 0 : index
    %c0_21 = arith.constant 0 : index
    %54 = vector.load %arg8[%c0_20, %c0_21] : memref<36x65xbf16, #tpu.memory_space<vmem>>, vector<36x65xbf16>
    %cst_22 = arith.constant dense<0.000000e+00> : vector<36x32xf32>
    %55 = tpu.matmul %54, %53, %cst_22 {dimension_numbers = #tpu.dot_dimension_numbers<[1], [0], [0], [1], [0, 0, 1, 1], [], []>} : vector<36x65xbf16>, vector<65x32xbf16>, vector<36x32xf32> -> vector<36x32xf32>
    %56 = vector.extract_strided_slice %0 {offsets = [3, 0], sizes = [1, 64], strides = [1, 1]} : vector<8x128xf32> to vector<1x64xf32>
    %57 = vector.extract_strided_slice %55 {offsets = [0, 0], sizes = [34, 32], strides = [1, 1]} : vector<36x32xf32> to vector<34x32xf32>
    %58 = vector.extract_strided_slice %55 {offsets = [1, 0], sizes = [34, 32], strides = [1, 1]} : vector<36x32xf32> to vector<34x32xf32>
    %59 = vector.extract_strided_slice %55 {offsets = [2, 0], sizes = [34, 32], strides = [1, 1]} : vector<36x32xf32> to vector<34x32xf32>
    %60 = tpu.concatenate %57, %58, %59 in 1 : vector<34x32xf32>, vector<34x32xf32>, vector<34x32xf32> -> vector<34x96xf32>
    %61 = arith.truncf %60 : vector<34x96xf32> to vector<34x96xbf16>
    %c0_23 = arith.constant 0 : index
    %c0_24 = arith.constant 0 : index
    %62 = vector.load %arg4[%c0_23, %c0_24] : memref<96x64xbf16, #tpu.memory_space<vmem>>, vector<96x64xbf16>
    %cst_25 = arith.constant dense<0.000000e+00> : vector<34x64xf32>
    %63 = tpu.matmul %61, %62, %cst_25 {dimension_numbers = #tpu.dot_dimension_numbers<[1], [0], [0], [1], [0, 0, 1, 1], [], []>} : vector<34x96xbf16>, vector<96x64xbf16>, vector<34x64xf32> -> vector<34x64xf32>
    %64 = vector.broadcast %56 : vector<1x64xf32> to vector<34x64xf32>
    %65 = arith.addf %63, %64 : vector<34x64xf32>
    %cst_26 = arith.constant 0.000000e+00 : f32
    %66 = vector.broadcast %cst_26 : f32 to vector<34x64xf32>
    %67 = arith.maximumf %65, %66 : vector<34x64xf32>
    %68 = vector.extract_strided_slice %67 {offsets = [0, 0], sizes = [33, 64], strides = [1, 1]} : vector<34x64xf32> to vector<33x64xf32>
    %69 = vector.extract_strided_slice %67 {offsets = [1, 0], sizes = [33, 64], strides = [1, 1]} : vector<34x64xf32> to vector<33x64xf32>
    %70 = arith.maximumf %68, %69 : vector<33x64xf32>
    %71 = arith.truncf %70 : vector<33x64xf32> to vector<33x64xbf16>
    %c0_27 = arith.constant 0 : index
    %c0_28 = arith.constant 0 : index
    %72 = vector.load %arg9[%c0_27, %c0_28] : memref<20x33xbf16, #tpu.memory_space<vmem>>, vector<20x33xbf16>
    %cst_29 = arith.constant dense<0.000000e+00> : vector<20x64xf32>
    %73 = tpu.matmul %72, %71, %cst_29 {dimension_numbers = #tpu.dot_dimension_numbers<[1], [0], [0], [1], [0, 0, 1, 1], [], []>} : vector<20x33xbf16>, vector<33x64xbf16>, vector<20x64xf32> -> vector<20x64xf32>
    %74 = vector.extract_strided_slice %0 {offsets = [4, 0], sizes = [1, 64], strides = [1, 1]} : vector<8x128xf32> to vector<1x64xf32>
    %75 = vector.extract_strided_slice %73 {offsets = [0, 0], sizes = [16, 64], strides = [1, 1]} : vector<20x64xf32> to vector<16x64xf32>
    %76 = vector.extract_strided_slice %73 {offsets = [1, 0], sizes = [16, 64], strides = [1, 1]} : vector<20x64xf32> to vector<16x64xf32>
    %77 = vector.extract_strided_slice %73 {offsets = [2, 0], sizes = [16, 64], strides = [1, 1]} : vector<20x64xf32> to vector<16x64xf32>
    %78 = vector.extract_strided_slice %73 {offsets = [3, 0], sizes = [16, 64], strides = [1, 1]} : vector<20x64xf32> to vector<16x64xf32>
    %79 = vector.extract_strided_slice %73 {offsets = [4, 0], sizes = [16, 64], strides = [1, 1]} : vector<20x64xf32> to vector<16x64xf32>
    %80 = tpu.concatenate %75, %76, %77, %78, %79 in 1 : vector<16x64xf32>, vector<16x64xf32>, vector<16x64xf32>, vector<16x64xf32>, vector<16x64xf32> -> vector<16x320xf32>
    %81 = arith.truncf %80 : vector<16x320xf32> to vector<16x320xbf16>
    %c0_30 = arith.constant 0 : index
    %c0_31 = arith.constant 0 : index
    %82 = vector.load %arg5[%c0_30, %c0_31] : memref<320x64xbf16, #tpu.memory_space<vmem>>, vector<320x64xbf16>
    %cst_32 = arith.constant dense<0.000000e+00> : vector<16x64xf32>
    %83 = tpu.matmul %81, %82, %cst_32 {dimension_numbers = #tpu.dot_dimension_numbers<[1], [0], [0], [1], [0, 0, 1, 1], [], []>} : vector<16x320xbf16>, vector<320x64xbf16>, vector<16x64xf32> -> vector<16x64xf32>
    %84 = vector.broadcast %74 : vector<1x64xf32> to vector<16x64xf32>
    %85 = arith.addf %83, %84 : vector<16x64xf32>
    %cst_33 = arith.constant 0.000000e+00 : f32
    %86 = vector.broadcast %cst_33 : f32 to vector<16x64xf32>
    %87 = arith.maximumf %85, %86 : vector<16x64xf32>
    %88 = vector.extract_strided_slice %87 {offsets = [0, 0], sizes = [15, 64], strides = [1, 1]} : vector<16x64xf32> to vector<15x64xf32>
    %89 = vector.extract_strided_slice %87 {offsets = [1, 0], sizes = [15, 64], strides = [1, 1]} : vector<16x64xf32> to vector<15x64xf32>
    %90 = arith.maximumf %88, %89 : vector<15x64xf32>
    %91 = arith.truncf %90 : vector<15x64xf32> to vector<15x64xbf16>
    %c0_34 = arith.constant 0 : index
    %c0_35 = arith.constant 0 : index
    %92 = vector.load %arg10[%c0_34, %c0_35] : memref<6x15xbf16, #tpu.memory_space<vmem>>, vector<6x15xbf16>
    %cst_36 = arith.constant dense<0.000000e+00> : vector<6x64xf32>
    %93 = tpu.matmul %92, %91, %cst_36 {dimension_numbers = #tpu.dot_dimension_numbers<[1], [0], [0], [1], [0, 0, 1, 1], [], []>} : vector<6x15xbf16>, vector<15x64xbf16>, vector<6x64xf32> -> vector<6x64xf32>
    %94 = vector.extract_strided_slice %0 {offsets = [5, 0], sizes = [1, 32], strides = [1, 1]} : vector<8x128xf32> to vector<1x32xf32>
    %95 = vector.extract_strided_slice %93 {offsets = [0, 0], sizes = [2, 64], strides = [1, 1]} : vector<6x64xf32> to vector<2x64xf32>
    %96 = vector.extract_strided_slice %93 {offsets = [2, 0], sizes = [2, 64], strides = [1, 1]} : vector<6x64xf32> to vector<2x64xf32>
    %97 = vector.extract_strided_slice %93 {offsets = [4, 0], sizes = [2, 64], strides = [1, 1]} : vector<6x64xf32> to vector<2x64xf32>
    %98 = tpu.concatenate %95, %96, %97 in 1 : vector<2x64xf32>, vector<2x64xf32>, vector<2x64xf32> -> vector<2x192xf32>
    %99 = arith.truncf %98 : vector<2x192xf32> to vector<2x192xbf16>
    %c0_37 = arith.constant 0 : index
    %c0_38 = arith.constant 0 : index
    %100 = vector.load %arg11[%c0_37, %c0_38] : memref<192x32xbf16, #tpu.memory_space<vmem>>, vector<192x32xbf16>
    %cst_39 = arith.constant dense<0.000000e+00> : vector<2x32xf32>
    %101 = tpu.matmul %99, %100, %cst_39 {dimension_numbers = #tpu.dot_dimension_numbers<[1], [0], [0], [1], [0, 0, 1, 1], [], []>} : vector<2x192xbf16>, vector<192x32xbf16>, vector<2x32xf32> -> vector<2x32xf32>
    %102 = vector.broadcast %94 : vector<1x32xf32> to vector<2x32xf32>
    %103 = arith.addf %101, %102 : vector<2x32xf32>
    %cst_40 = arith.constant 0.000000e+00 : f32
    %104 = vector.broadcast %cst_40 : f32 to vector<2x32xf32>
    %105 = arith.maximumf %103, %104 : vector<2x32xf32>
    %c0_41 = arith.constant 0 : index
    %c0_42 = arith.constant 0 : index
    %106 = vector.load %arg13[%c0_41, %c0_42] : memref<2x32xf32, #tpu.memory_space<vmem>>, vector<2x32xf32>
    tpu.vector_store %arg13[%c0_41, %c0_42], %105 {strides = array<i32>} : memref<2x32xf32, #tpu.memory_space<vmem>>, vector<2x32xf32>,
    return
  }
}

module attributes {stable_mosaic.version = 11 : i64} {
  func.func @kernel(%arg0: memref<260x6xf32, #tpu.memory_space<vmem>>, %arg1: memref<18x16xbf16, #tpu.memory_space<vmem>>, %arg2: memref<48x32xbf16, #tpu.memory_space<vmem>>, %arg3: memref<96x32xbf16, #tpu.memory_space<vmem>>, %arg4: memref<96x64xbf16, #tpu.memory_space<vmem>>, %arg5: memref<320x64xbf16, #tpu.memory_space<vmem>>, %arg6: memref<132x257xbf16, #tpu.memory_space<vmem>>, %arg7: memref<68x129xbf16, #tpu.memory_space<vmem>>, %arg8: memref<36x65xbf16, #tpu.memory_space<vmem>>, %arg9: memref<20x33xbf16, #tpu.memory_space<vmem>>, %arg10: memref<6x15xbf16, #tpu.memory_space<vmem>>, %arg11: memref<192x32xbf16, #tpu.memory_space<vmem>>, %arg12: memref<8x128xf32, #tpu.memory_space<vmem>>, %arg13: memref<2x32xf32, #tpu.memory_space<vmem>>) attributes {dimension_semantics = [], scalar_prefetch = 0 : i64, scratch_operands = 0 : i64, tpu.core_type = #tpu.core_type<tc>} {
    %c0 = arith.constant 0 : index
    %c0_0 = arith.constant 0 : index
    %0 = vector.load %arg12[%c0, %c0_0] : memref<8x128xf32, #tpu.memory_space<vmem>>, vector<8x128xf32>
    %c0_1 = arith.constant 0 : index
    %c0_2 = arith.constant 0 : index
    %1 = vector.load %arg0[%c0_1, %c0_2] : memref<260x6xf32, #tpu.memory_space<vmem>>, vector<260x6xf32>
    %2 = vector.extract_strided_slice %0 {offsets = [0, 0], sizes = [1, 16], strides = [1, 1]} : vector<8x128xf32> to vector<1x16xf32>
    %3 = vector.extract_strided_slice %1 {offsets = [0, 0], sizes = [258, 6], strides = [1, 1]} : vector<260x6xf32> to vector<258x6xf32>
    %4 = arith.truncf %3 : vector<258x6xf32> to vector<258x6xbf16>
    %c0_3 = arith.constant 0 : index
    %c0_4 = arith.constant 0 : index
    %5 = vector.load %arg1[%c0_3, %c0_4] : memref<18x16xbf16, #tpu.memory_space<vmem>>, vector<6x16xbf16>
    %cst = arith.constant dense<0.000000e+00> : vector<258x16xf32>
    %6 = tpu.matmul %4, %5, %cst {dimension_numbers = #tpu.dot_dimension_numbers<[1], [0], [0], [1], [0, 0, 1, 1], [], []>} : vector<258x6xbf16>, vector<6x16xbf16>, vector<258x16xf32> -> vector<258x16xf32>
    %7 = vector.extract_strided_slice %1 {offsets = [1, 0], sizes = [258, 6], strides = [1, 1]} : vector<260x6xf32> to vector<258x6xf32>
    %8 = arith.truncf %7 : vector<258x6xf32> to vector<258x6xbf16>
    %c6 = arith.constant 6 : index
    %c0_5 = arith.constant 0 : index
    %9 = vector.load %arg1[%c6, %c0_5] : memref<18x16xbf16, #tpu.memory_space<vmem>>, vector<6x16xbf16>
    %cst_6 = arith.constant dense<0.000000e+00> : vector<258x16xf32>
    %10 = tpu.matmul %8, %9, %cst_6 {dimension_numbers = #tpu.dot_dimension_numbers<[1], [0], [0], [1], [0, 0, 1, 1], [], []>} : vector<258x6xbf16>, vector<6x16xbf16>, vector<258x16xf32> -> vector<258x16xf32>
    %11 = arith.addf %6, %10 : vector<258x16xf32>
    %12 = vector.extract_strided_slice %1 {offsets = [2, 0], sizes = [258, 6], strides = [1, 1]} : vector<260x6xf32> to vector<258x6xf32>
    %13 = arith.truncf %12 : vector<258x6xf32> to vector<258x6xbf16>
    %c12 = arith.constant 12 : index
    %c0_7 = arith.constant 0 : index
    %14 = vector.load %arg1[%c12, %c0_7] : memref<18x16xbf16, #tpu.memory_space<vmem>>, vector<6x16xbf16>
    %cst_8 = arith.constant dense<0.000000e+00> : vector<258x16xf32>
    %15 = tpu.matmul %13, %14, %cst_8 {dimension_numbers = #tpu.dot_dimension_numbers<[1], [0], [0], [1], [0, 0, 1, 1], [], []>} : vector<258x6xbf16>, vector<6x16xbf16>, vector<258x16xf32> -> vector<258x16xf32>
    %16 = arith.addf %11, %15 : vector<258x16xf32>
    %17 = vector.broadcast %2 : vector<1x16xf32> to vector<258x16xf32>
    %18 = arith.addf %16, %17 : vector<258x16xf32>
    %cst_9 = arith.constant 0.000000e+00 : f32
    %19 = vector.broadcast %cst_9 : f32 to vector<258x16xf32>
    %20 = arith.maximumf %18, %19 : vector<258x16xf32>
    %21 = vector.extract_strided_slice %20 {offsets = [0, 0], sizes = [257, 16], strides = [1, 1]} : vector<258x16xf32> to vector<257x16xf32>
    %22 = vector.extract_strided_slice %20 {offsets = [1, 0], sizes = [257, 16], strides = [1, 1]} : vector<258x16xf32> to vector<257x16xf32>
    %23 = arith.maximumf %21, %22 : vector<257x16xf32>
    %24 = arith.truncf %23 : vector<257x16xf32> to vector<257x16xbf16>
    %c0_10 = arith.constant 0 : index
    %c0_11 = arith.constant 0 : index
    %25 = vector.load %arg6[%c0_10, %c0_11] : memref<132x257xbf16, #tpu.memory_space<vmem>>, vector<132x257xbf16>
    %cst_12 = arith.constant dense<0.000000e+00> : vector<132x16xf32>
    %26 = tpu.matmul %25, %24, %cst_12 {dimension_numbers = #tpu.dot_dimension_numbers<[1], [0], [0], [1], [0, 0, 1, 1], [], []>} : vector<132x257xbf16>, vector<257x16xbf16>, vector<132x16xf32> -> vector<132x16xf32>
    %27 = vector.extract_strided_slice %0 {offsets = [1, 0], sizes = [1, 32], strides = [1, 1]} : vector<8x128xf32> to vector<1x32xf32>
    %28 = vector.extract_strided_slice %26 {offsets = [0, 0], sizes = [130, 16], strides = [1, 1]} : vector<132x16xf32> to vector<130x16xf32>
    %29 = arith.truncf %28 : vector<130x16xf32> to vector<130x16xbf16>
    %c0_13 = arith.constant 0 : index
    %c0_14 = arith.constant 0 : index
    %30 = vector.load %arg2[%c0_13, %c0_14] : memref<48x32xbf16, #tpu.memory_space<vmem>>, vector<16x32xbf16>
    %cst_15 = arith.constant dense<0.000000e+00> : vector<130x32xf32>
    %31 = tpu.matmul %29, %30, %cst_15 {dimension_numbers = #tpu.dot_dimension_numbers<[1], [0], [0], [1], [0, 0, 1, 1], [], []>} : vector<130x16xbf16>, vector<16x32xbf16>, vector<130x32xf32> -> vector<130x32xf32>
    %32 = vector.extract_strided_slice %26 {offsets = [1, 0], sizes = [130, 16], strides = [1, 1]} : vector<132x16xf32> to vector<130x16xf32>
    %33 = arith.truncf %32 : vector<130x16xf32> to vector<130x16xbf16>
    %c16 = arith.constant 16 : index
    %c0_16 = arith.constant 0 : index
    %34 = vector.load %arg2[%c16, %c0_16] : memref<48x32xbf16, #tpu.memory_space<vmem>>, vector<16x32xbf16>
    %cst_17 = arith.constant dense<0.000000e+00> : vector<130x32xf32>
    %35 = tpu.matmul %33, %34, %cst_17 {dimension_numbers = #tpu.dot_dimension_numbers<[1], [0], [0], [1], [0, 0, 1, 1], [], []>} : vector<130x16xbf16>, vector<16x32xbf16>, vector<130x32xf32> -> vector<130x32xf32>
    %36 = arith.addf %31, %35 : vector<130x32xf32>
    %37 = vector.extract_strided_slice %26 {offsets = [2, 0], sizes = [130, 16], strides = [1, 1]} : vector<132x16xf32> to vector<130x16xf32>
    %38 = arith.truncf %37 : vector<130x16xf32> to vector<130x16xbf16>
    %c32 = arith.constant 32 : index
    %c0_18 = arith.constant 0 : index
    %39 = vector.load %arg2[%c32, %c0_18] : memref<48x32xbf16, #tpu.memory_space<vmem>>, vector<16x32xbf16>
    %cst_19 = arith.constant dense<0.000000e+00> : vector<130x32xf32>
    %40 = tpu.matmul %38, %39, %cst_19 {dimension_numbers = #tpu.dot_dimension_numbers<[1], [0], [0], [1], [0, 0, 1, 1], [], []>} : vector<130x16xbf16>, vector<16x32xbf16>, vector<130x32xf32> -> vector<130x32xf32>
    %41 = arith.addf %36, %40 : vector<130x32xf32>
    %42 = vector.broadcast %27 : vector<1x32xf32> to vector<130x32xf32>
    %43 = arith.addf %41, %42 : vector<130x32xf32>
    %cst_20 = arith.constant 0.000000e+00 : f32
    %44 = vector.broadcast %cst_20 : f32 to vector<130x32xf32>
    %45 = arith.maximumf %43, %44 : vector<130x32xf32>
    %46 = vector.extract_strided_slice %45 {offsets = [0, 0], sizes = [129, 32], strides = [1, 1]} : vector<130x32xf32> to vector<129x32xf32>
    %47 = vector.extract_strided_slice %45 {offsets = [1, 0], sizes = [129, 32], strides = [1, 1]} : vector<130x32xf32> to vector<129x32xf32>
    %48 = arith.maximumf %46, %47 : vector<129x32xf32>
    %49 = arith.truncf %48 : vector<129x32xf32> to vector<129x32xbf16>
    %c0_21 = arith.constant 0 : index
    %c0_22 = arith.constant 0 : index
    %50 = vector.load %arg7[%c0_21, %c0_22] : memref<68x129xbf16, #tpu.memory_space<vmem>>, vector<68x129xbf16>
    %cst_23 = arith.constant dense<0.000000e+00> : vector<68x32xf32>
    %51 = tpu.matmul %50, %49, %cst_23 {dimension_numbers = #tpu.dot_dimension_numbers<[1], [0], [0], [1], [0, 0, 1, 1], [], []>} : vector<68x129xbf16>, vector<129x32xbf16>, vector<68x32xf32> -> vector<68x32xf32>
    %52 = vector.extract_strided_slice %0 {offsets = [2, 0], sizes = [1, 32], strides = [1, 1]} : vector<8x128xf32> to vector<1x32xf32>
    %53 = vector.extract_strided_slice %51 {offsets = [0, 0], sizes = [66, 32], strides = [1, 1]} : vector<68x32xf32> to vector<66x32xf32>
    %54 = arith.truncf %53 : vector<66x32xf32> to vector<66x32xbf16>
    %c0_24 = arith.constant 0 : index
    %c0_25 = arith.constant 0 : index
    %55 = vector.load %arg3[%c0_24, %c0_25] : memref<96x32xbf16, #tpu.memory_space<vmem>>, vector<32x32xbf16>
    %cst_26 = arith.constant dense<0.000000e+00> : vector<66x32xf32>
    %56 = tpu.matmul %54, %55, %cst_26 {dimension_numbers = #tpu.dot_dimension_numbers<[1], [0], [0], [1], [0, 0, 1, 1], [], []>} : vector<66x32xbf16>, vector<32x32xbf16>, vector<66x32xf32> -> vector<66x32xf32>
    %57 = vector.extract_strided_slice %51 {offsets = [1, 0], sizes = [66, 32], strides = [1, 1]} : vector<68x32xf32> to vector<66x32xf32>
    %58 = arith.truncf %57 : vector<66x32xf32> to vector<66x32xbf16>
    %c32_27 = arith.constant 32 : index
    %c0_28 = arith.constant 0 : index
    %59 = vector.load %arg3[%c32_27, %c0_28] : memref<96x32xbf16, #tpu.memory_space<vmem>>, vector<32x32xbf16>
    %cst_29 = arith.constant dense<0.000000e+00> : vector<66x32xf32>
    %60 = tpu.matmul %58, %59, %cst_29 {dimension_numbers = #tpu.dot_dimension_numbers<[1], [0], [0], [1], [0, 0, 1, 1], [], []>} : vector<66x32xbf16>, vector<32x32xbf16>, vector<66x32xf32> -> vector<66x32xf32>
    %61 = arith.addf %56, %60 : vector<66x32xf32>
    %62 = vector.extract_strided_slice %51 {offsets = [2, 0], sizes = [66, 32], strides = [1, 1]} : vector<68x32xf32> to vector<66x32xf32>
    %63 = arith.truncf %62 : vector<66x32xf32> to vector<66x32xbf16>
    %c64 = arith.constant 64 : index
    %c0_30 = arith.constant 0 : index
    %64 = vector.load %arg3[%c64, %c0_30] : memref<96x32xbf16, #tpu.memory_space<vmem>>, vector<32x32xbf16>
    %cst_31 = arith.constant dense<0.000000e+00> : vector<66x32xf32>
    %65 = tpu.matmul %63, %64, %cst_31 {dimension_numbers = #tpu.dot_dimension_numbers<[1], [0], [0], [1], [0, 0, 1, 1], [], []>} : vector<66x32xbf16>, vector<32x32xbf16>, vector<66x32xf32> -> vector<66x32xf32>
    %66 = arith.addf %61, %65 : vector<66x32xf32>
    %67 = vector.broadcast %52 : vector<1x32xf32> to vector<66x32xf32>
    %68 = arith.addf %66, %67 : vector<66x32xf32>
    %cst_32 = arith.constant 0.000000e+00 : f32
    %69 = vector.broadcast %cst_32 : f32 to vector<66x32xf32>
    %70 = arith.maximumf %68, %69 : vector<66x32xf32>
    %71 = vector.extract_strided_slice %70 {offsets = [0, 0], sizes = [65, 32], strides = [1, 1]} : vector<66x32xf32> to vector<65x32xf32>
    %72 = vector.extract_strided_slice %70 {offsets = [1, 0], sizes = [65, 32], strides = [1, 1]} : vector<66x32xf32> to vector<65x32xf32>
    %73 = arith.maximumf %71, %72 : vector<65x32xf32>
    %74 = arith.truncf %73 : vector<65x32xf32> to vector<65x32xbf16>
    %c0_33 = arith.constant 0 : index
    %c0_34 = arith.constant 0 : index
    %75 = vector.load %arg8[%c0_33, %c0_34] : memref<36x65xbf16, #tpu.memory_space<vmem>>, vector<36x65xbf16>
    %cst_35 = arith.constant dense<0.000000e+00> : vector<36x32xf32>
    %76 = tpu.matmul %75, %74, %cst_35 {dimension_numbers = #tpu.dot_dimension_numbers<[1], [0], [0], [1], [0, 0, 1, 1], [], []>} : vector<36x65xbf16>, vector<65x32xbf16>, vector<36x32xf32> -> vector<36x32xf32>
    %77 = vector.extract_strided_slice %0 {offsets = [3, 0], sizes = [1, 64], strides = [1, 1]} : vector<8x128xf32> to vector<1x64xf32>
    %78 = vector.extract_strided_slice %76 {offsets = [0, 0], sizes = [34, 32], strides = [1, 1]} : vector<36x32xf32> to vector<34x32xf32>
    %79 = arith.truncf %78 : vector<34x32xf32> to vector<34x32xbf16>
    %c0_36 = arith.constant 0 : index
    %c0_37 = arith.constant 0 : index
    %80 = vector.load %arg4[%c0_36, %c0_37] : memref<96x64xbf16, #tpu.memory_space<vmem>>, vector<32x64xbf16>
    %cst_38 = arith.constant dense<0.000000e+00> : vector<34x64xf32>
    %81 = tpu.matmul %79, %80, %cst_38 {dimension_numbers = #tpu.dot_dimension_numbers<[1], [0], [0], [1], [0, 0, 1, 1], [], []>} : vector<34x32xbf16>, vector<32x64xbf16>, vector<34x64xf32> -> vector<34x64xf32>
    %82 = vector.extract_strided_slice %76 {offsets = [1, 0], sizes = [34, 32], strides = [1, 1]} : vector<36x32xf32> to vector<34x32xf32>
    %83 = arith.truncf %82 : vector<34x32xf32> to vector<34x32xbf16>
    %c32_39 = arith.constant 32 : index
    %c0_40 = arith.constant 0 : index
    %84 = vector.load %arg4[%c32_39, %c0_40] : memref<96x64xbf16, #tpu.memory_space<vmem>>, vector<32x64xbf16>
    %cst_41 = arith.constant dense<0.000000e+00> : vector<34x64xf32>
    %85 = tpu.matmul %83, %84, %cst_41 {dimension_numbers = #tpu.dot_dimension_numbers<[1], [0], [0], [1], [0, 0, 1, 1], [], []>} : vector<34x32xbf16>, vector<32x64xbf16>, vector<34x64xf32> -> vector<34x64xf32>
    %86 = arith.addf %81, %85 : vector<34x64xf32>
    %87 = vector.extract_strided_slice %76 {offsets = [2, 0], sizes = [34, 32], strides = [1, 1]} : vector<36x32xf32> to vector<34x32xf32>
    %88 = arith.truncf %87 : vector<34x32xf32> to vector<34x32xbf16>
    %c64_42 = arith.constant 64 : index
    %c0_43 = arith.constant 0 : index
    %89 = vector.load %arg4[%c64_42, %c0_43] : memref<96x64xbf16, #tpu.memory_space<vmem>>, vector<32x64xbf16>
    %cst_44 = arith.constant dense<0.000000e+00> : vector<34x64xf32>
    %90 = tpu.matmul %88, %89, %cst_44 {dimension_numbers = #tpu.dot_dimension_numbers<[1], [0], [0], [1], [0, 0, 1, 1], [], []>} : vector<34x32xbf16>, vector<32x64xbf16>, vector<34x64xf32> -> vector<34x64xf32>
    %91 = arith.addf %86, %90 : vector<34x64xf32>
    %92 = vector.broadcast %77 : vector<1x64xf32> to vector<34x64xf32>
    %93 = arith.addf %91, %92 : vector<34x64xf32>
    %cst_45 = arith.constant 0.000000e+00 : f32
    %94 = vector.broadcast %cst_45 : f32 to vector<34x64xf32>
    %95 = arith.maximumf %93, %94 : vector<34x64xf32>
    %96 = vector.extract_strided_slice %95 {offsets = [0, 0], sizes = [33, 64], strides = [1, 1]} : vector<34x64xf32> to vector<33x64xf32>
    %97 = vector.extract_strided_slice %95 {offsets = [1, 0], sizes = [33, 64], strides = [1, 1]} : vector<34x64xf32> to vector<33x64xf32>
    %98 = arith.maximumf %96, %97 : vector<33x64xf32>
    %99 = arith.truncf %98 : vector<33x64xf32> to vector<33x64xbf16>
    %c0_46 = arith.constant 0 : index
    %c0_47 = arith.constant 0 : index
    %100 = vector.load %arg9[%c0_46, %c0_47] : memref<20x33xbf16, #tpu.memory_space<vmem>>, vector<20x33xbf16>
    %cst_48 = arith.constant dense<0.000000e+00> : vector<20x64xf32>
    %101 = tpu.matmul %100, %99, %cst_48 {dimension_numbers = #tpu.dot_dimension_numbers<[1], [0], [0], [1], [0, 0, 1, 1], [], []>} : vector<20x33xbf16>, vector<33x64xbf16>, vector<20x64xf32> -> vector<20x64xf32>
    %102 = vector.extract_strided_slice %0 {offsets = [4, 0], sizes = [1, 64], strides = [1, 1]} : vector<8x128xf32> to vector<1x64xf32>
    %103 = vector.extract_strided_slice %101 {offsets = [0, 0], sizes = [16, 64], strides = [1, 1]} : vector<20x64xf32> to vector<16x64xf32>
    %104 = arith.truncf %103 : vector<16x64xf32> to vector<16x64xbf16>
    %c0_49 = arith.constant 0 : index
    %c0_50 = arith.constant 0 : index
    %105 = vector.load %arg5[%c0_49, %c0_50] : memref<320x64xbf16, #tpu.memory_space<vmem>>, vector<64x64xbf16>
    %cst_51 = arith.constant dense<0.000000e+00> : vector<16x64xf32>
    %106 = tpu.matmul %104, %105, %cst_51 {dimension_numbers = #tpu.dot_dimension_numbers<[1], [0], [0], [1], [0, 0, 1, 1], [], []>} : vector<16x64xbf16>, vector<64x64xbf16>, vector<16x64xf32> -> vector<16x64xf32>
    %107 = vector.extract_strided_slice %101 {offsets = [1, 0], sizes = [16, 64], strides = [1, 1]} : vector<20x64xf32> to vector<16x64xf32>
    %108 = arith.truncf %107 : vector<16x64xf32> to vector<16x64xbf16>
    %c64_52 = arith.constant 64 : index
    %c0_53 = arith.constant 0 : index
    %109 = vector.load %arg5[%c64_52, %c0_53] : memref<320x64xbf16, #tpu.memory_space<vmem>>, vector<64x64xbf16>
    %cst_54 = arith.constant dense<0.000000e+00> : vector<16x64xf32>
    %110 = tpu.matmul %108, %109, %cst_54 {dimension_numbers = #tpu.dot_dimension_numbers<[1], [0], [0], [1], [0, 0, 1, 1], [], []>} : vector<16x64xbf16>, vector<64x64xbf16>, vector<16x64xf32> -> vector<16x64xf32>
    %111 = arith.addf %106, %110 : vector<16x64xf32>
    %112 = vector.extract_strided_slice %101 {offsets = [2, 0], sizes = [16, 64], strides = [1, 1]} : vector<20x64xf32> to vector<16x64xf32>
    %113 = arith.truncf %112 : vector<16x64xf32> to vector<16x64xbf16>
    %c128 = arith.constant 128 : index
    %c0_55 = arith.constant 0 : index
    %114 = vector.load %arg5[%c128, %c0_55] : memref<320x64xbf16, #tpu.memory_space<vmem>>, vector<64x64xbf16>
    %cst_56 = arith.constant dense<0.000000e+00> : vector<16x64xf32>
    %115 = tpu.matmul %113, %114, %cst_56 {dimension_numbers = #tpu.dot_dimension_numbers<[1], [0], [0], [1], [0, 0, 1, 1], [], []>} : vector<16x64xbf16>, vector<64x64xbf16>, vector<16x64xf32> -> vector<16x64xf32>
    %116 = arith.addf %111, %115 : vector<16x64xf32>
    %117 = vector.extract_strided_slice %101 {offsets = [3, 0], sizes = [16, 64], strides = [1, 1]} : vector<20x64xf32> to vector<16x64xf32>
    %118 = arith.truncf %117 : vector<16x64xf32> to vector<16x64xbf16>
    %c192 = arith.constant 192 : index
    %c0_57 = arith.constant 0 : index
    %119 = vector.load %arg5[%c192, %c0_57] : memref<320x64xbf16, #tpu.memory_space<vmem>>, vector<64x64xbf16>
    %cst_58 = arith.constant dense<0.000000e+00> : vector<16x64xf32>
    %120 = tpu.matmul %118, %119, %cst_58 {dimension_numbers = #tpu.dot_dimension_numbers<[1], [0], [0], [1], [0, 0, 1, 1], [], []>} : vector<16x64xbf16>, vector<64x64xbf16>, vector<16x64xf32> -> vector<16x64xf32>
    %121 = arith.addf %116, %120 : vector<16x64xf32>
    %122 = vector.extract_strided_slice %101 {offsets = [4, 0], sizes = [16, 64], strides = [1, 1]} : vector<20x64xf32> to vector<16x64xf32>
    %123 = arith.truncf %122 : vector<16x64xf32> to vector<16x64xbf16>
    %c256 = arith.constant 256 : index
    %c0_59 = arith.constant 0 : index
    %124 = vector.load %arg5[%c256, %c0_59] : memref<320x64xbf16, #tpu.memory_space<vmem>>, vector<64x64xbf16>
    %cst_60 = arith.constant dense<0.000000e+00> : vector<16x64xf32>
    %125 = tpu.matmul %123, %124, %cst_60 {dimension_numbers = #tpu.dot_dimension_numbers<[1], [0], [0], [1], [0, 0, 1, 1], [], []>} : vector<16x64xbf16>, vector<64x64xbf16>, vector<16x64xf32> -> vector<16x64xf32>
    %126 = arith.addf %121, %125 : vector<16x64xf32>
    %127 = vector.broadcast %102 : vector<1x64xf32> to vector<16x64xf32>
    %128 = arith.addf %126, %127 : vector<16x64xf32>
    %cst_61 = arith.constant 0.000000e+00 : f32
    %129 = vector.broadcast %cst_61 : f32 to vector<16x64xf32>
    %130 = arith.maximumf %128, %129 : vector<16x64xf32>
    %131 = vector.extract_strided_slice %130 {offsets = [0, 0], sizes = [15, 64], strides = [1, 1]} : vector<16x64xf32> to vector<15x64xf32>
    %132 = vector.extract_strided_slice %130 {offsets = [1, 0], sizes = [15, 64], strides = [1, 1]} : vector<16x64xf32> to vector<15x64xf32>
    %133 = arith.maximumf %131, %132 : vector<15x64xf32>
    %134 = arith.truncf %133 : vector<15x64xf32> to vector<15x64xbf16>
    %c0_62 = arith.constant 0 : index
    %c0_63 = arith.constant 0 : index
    %135 = vector.load %arg10[%c0_62, %c0_63] : memref<6x15xbf16, #tpu.memory_space<vmem>>, vector<6x15xbf16>
    %cst_64 = arith.constant dense<0.000000e+00> : vector<6x64xf32>
    %136 = tpu.matmul %135, %134, %cst_64 {dimension_numbers = #tpu.dot_dimension_numbers<[1], [0], [0], [1], [0, 0, 1, 1], [], []>} : vector<6x15xbf16>, vector<15x64xbf16>, vector<6x64xf32> -> vector<6x64xf32>
    %137 = vector.extract_strided_slice %0 {offsets = [5, 0], sizes = [1, 32], strides = [1, 1]} : vector<8x128xf32> to vector<1x32xf32>
    %138 = vector.extract_strided_slice %136 {offsets = [0, 0], sizes = [2, 64], strides = [1, 1]} : vector<6x64xf32> to vector<2x64xf32>
    %139 = arith.truncf %138 : vector<2x64xf32> to vector<2x64xbf16>
    %c0_65 = arith.constant 0 : index
    %c0_66 = arith.constant 0 : index
    %140 = vector.load %arg11[%c0_65, %c0_66] : memref<192x32xbf16, #tpu.memory_space<vmem>>, vector<64x32xbf16>
    %cst_67 = arith.constant dense<0.000000e+00> : vector<2x32xf32>
    %141 = tpu.matmul %139, %140, %cst_67 {dimension_numbers = #tpu.dot_dimension_numbers<[1], [0], [0], [1], [0, 0, 1, 1], [], []>} : vector<2x64xbf16>, vector<64x32xbf16>, vector<2x32xf32> -> vector<2x32xf32>
    %142 = vector.extract_strided_slice %136 {offsets = [2, 0], sizes = [2, 64], strides = [1, 1]} : vector<6x64xf32> to vector<2x64xf32>
    %143 = arith.truncf %142 : vector<2x64xf32> to vector<2x64xbf16>
    %c64_68 = arith.constant 64 : index
    %c0_69 = arith.constant 0 : index
    %144 = vector.load %arg11[%c64_68, %c0_69] : memref<192x32xbf16, #tpu.memory_space<vmem>>, vector<64x32xbf16>
    %cst_70 = arith.constant dense<0.000000e+00> : vector<2x32xf32>
    %145 = tpu.matmul %143, %144, %cst_70 {dimension_numbers = #tpu.dot_dimension_numbers<[1], [0], [0], [1], [0, 0, 1, 1], [], []>} : vector<2x64xbf16>, vector<64x32xbf16>, vector<2x32xf32> -> vector<2x32xf32>
    %146 = arith.addf %141, %145 : vector<2x32xf32>
    %147 = vector.extract_strided_slice %136 {offsets = [4, 0], sizes = [2, 64], strides = [1, 1]} : vector<6x64xf32> to vector<2x64xf32>
    %148 = arith.truncf %147 : vector<2x64xf32> to vector<2x64xbf16>
    %c128_71 = arith.constant 128 : index
    %c0_72 = arith.constant 0 : index
    %149 = vector.load %arg11[%c128_71, %c0_72] : memref<192x32xbf16, #tpu.memory_space<vmem>>, vector<64x32xbf16>
    %cst_73 = arith.constant dense<0.000000e+00> : vector<2x32xf32>
    %150 = tpu.matmul %148, %149, %cst_73 {dimension_numbers = #tpu.dot_dimension_numbers<[1], [0], [0], [1], [0, 0, 1, 1], [], []>} : vector<2x64xbf16>, vector<64x32xbf16>, vector<2x32xf32> -> vector<2x32xf32>
    %151 = arith.addf %146, %150 : vector<2x32xf32>
    %152 = vector.broadcast %137 : vector<1x32xf32> to vector<2x32xf32>
    %153 = arith.addf %151, %152 : vector<2x32xf32>
    %cst_74 = arith.constant 0.000000e+00 : f32
    %154 = vector.broadcast %cst_74 : f32 to vector<2x32xf32>
    %155 = arith.maximumf %153, %154 : vector<2x32xf32>
    %c0_75 = arith.constant 0 : index
    %c0_76 = arith.constant 0 : index
    %156 = vector.load %arg13[%c0_75, %c0_76] : memref<2x32xf32, #tpu.memory_space<vmem>>, vector<2x32xf32>
    tpu.vector_store %arg13[%c0_75, %c0_76], %155 {strides = array<i32>} : memref<2x32xf32, #tpu.memory_space<vmem>>, vector<2x32xf32>,
    return
  }
}

</mosaic_0001>

<bundles_post_ra>
// kernel: fn.1
= control target key start
LH: loop header
LB: loop body
LE: loop exit
PB: predicated region body
PF: predicated region fallthrough
CT: control target
= control target key end

     0   :  { %18 = vsyncpa [#allocation3], 0  ;;  %s5419_s0 = inlined_call_operand.vmem [shape: f32[260,6], index: 0, kind: input, shape index: {}]   ;;  %s5420_s1 = inlined_call_operand.hbm [shape: bf16[18,16], index: 1, kind: input, shape index: {}]   ;;  %s5421_s2 = inlined_call_operand.hbm [shape: bf16[48,32], index: 2, kind: input, shape index: {}]   ;;  %s5422_s3 = inlined_call_operand.hbm [shape: bf16[96,32], index: 3, kind: input, shape index: {}]   ;;  %s5423_s4 = inlined_call_operand.hbm [shape: bf16[96,64], index: 4, kind: input, shape index: {}]   ;;  %s5424_s5 = inlined_call_operand.vmem [shape: bf16[320,64], index: 5, kind: input, shape index: {}]   ;;  %s5425_s6 = inlined_call_operand.vmem [shape: bf16[132,257], index: 6, kind: input, shape index: {}]   ;;  %s5426_s7 = inlined_call_operand.hbm [shape: bf16[68,129], index: 7, kind: input, shape index: {}]   ;;  %s5427_s8 = inlined_call_operand.hbm [shape: bf16[36,65], index: 8, kind: input, shape index: {}]   ;;  %s5428_s9 = inlined_call_operand.vmem [shape: bf16[20,33], index: 9, kind: input, shape index: {}]   ;;  %s5429_s10 = inlined_call_operand.vmem [shape: bf16[6,15], index: 10, kind: input, shape index: {}]   ;;  %s5430_s11 = inlined_call_operand.hbm [shape: bf16[192,32], index: 11, kind: input, shape index: {}]   ;;  %s5431_s12 = inlined_call_operand.hbm [shape: f32[8,128], index: 12, kind: input, shape index: {}]   ;;  %s5432_s13 = inlined_call_operand.hbm [shape: f32[2,32], index: 13, kind: output, shape index: {}]  }
   0x1   :  { %19 = vsyncpa [#allocation6], 0 }
   0x2   :  { %20 = vsyncpa [#allocation9], 0 }
   0x3   :  { %21 = vsyncpa [#allocation12], 0 }
   0x4   :  { %22 = vsyncpa [#allocation15], 0 }
   0x5   :  { %23 = vsyncpa [#allocation4], 0  ;;  %s43_s27 = sshll.u32 %s5421_s2, 4  ;;  %s3993_s28 = smov [#allocation5]   ;;  %s44_s27 = int_to_ptr.hbm [resolvable:$true] %s43_s27 }
   0x6   :  { %s45_s29 = sshll.u32 %s3993_s28, 4  ;;  %s69_s15 = sshll.u32 %s5423_s4, 4  ;;  %s46_s29 = int_to_ptr.vmem [resolvable:$true] %s45_s29  ;;  %s70_s15 = int_to_ptr.hbm [resolvable:$true] %s69_s15 }
   0x7   :  { %s3994_s16 = smov 64   ;;  %s3995_s17 = smov 4  }
   0x8   :  { %51 = dma.hbm_to_vmem [thread:$0]  %s44_s27, 384, %s46_s29, [#allocation6], %s3994_s16, %s3994_s16, %s3995_s17  }
   0x9   :  { %s3996_s18 = smov [#allocation8]   ;;  %s99_s2 = sshll.u32 %s5427_s8, 4  ;;  %s100_s2 = int_to_ptr.hbm [resolvable:$true] %s99_s2 }
   0xa   :  { %s71_s19 = sshll.u32 %s3996_s18, 4  ;;  %s30_s23 = sshll.u32 %s5420_s1, 4  ;;  %s72_s19 = int_to_ptr.vmem [resolvable:$true] %s71_s19  ;;  %s31_s23 = int_to_ptr.hbm [resolvable:$true] %s30_s23 }
   0xb   :  { %77 = dma.hbm_to_vmem [thread:$0]  %s70_s15, 768, %s72_s19, [#allocation9], %s3994_s16, %s3994_s16, %s3995_s17  }
   0xc   :  { %s3997_s24 = smov [#allocation11]   ;;  %s3998_s26 = smov [#allocation2]  }
   0xd   :  { %s101_s25 = sshll.u32 %s3997_s24, 4  ;;  %s32_s8 = sshll.u32 %s3998_s26, 4  ;;  %s102_s25 = int_to_ptr.vmem [resolvable:$true] %s101_s25  ;;  %s33_s8 = int_to_ptr.vmem [resolvable:$true] %s32_s8 }
   0xe   :  { %107 = dma.hbm_to_vmem [thread:$0]  %s100_s2, 320, %s102_s25, [#allocation12], %s3994_s16, %s3994_s16, %s3995_s17  }
   0xf   :  { %s56_s29 = sshll.u32 %s5422_s3, 4  ;;  %s86_s14 = sshll.u32 %s5426_s7, 4  ;;  %s57_s29 = int_to_ptr.hbm [resolvable:$true] %s56_s29  ;;  %s87_s14 = int_to_ptr.hbm [resolvable:$true] %s86_s14 }
  0x10   :  { %38 = dma.hbm_to_vmem [thread:$0]  %s31_s23, 192, %s33_s8, [#allocation3], %s3994_s16, %s3994_s16, %s3995_s17  }
  0x11   :  { %s3999_s15 = smov [#allocation7]   ;;  %s4000_s19 = smov [#allocation10]  }
  0x12   :  { %s58_s18 = sshll.u32 %s3999_s15, 4  ;;  %s88_s3 = sshll.u32 %s4000_s19, 4  ;;  %s59_s18 = int_to_ptr.vmem [resolvable:$true] %s58_s18  ;;  %s89_s3 = int_to_ptr.vmem [resolvable:$true] %s88_s3 }
  0x13   :  { %64 = dma.hbm_to_vmem [thread:$0]  %s57_s29, 768, %s59_s18, [#allocation6], %s3994_s16, %s3994_s16, %s3995_s17  }
  0x14   :  { %s4001_s20 = smov 128   ;;  %s4002_s21 = smov 8  }
  0x15   :  { %94 = dma.hbm_to_vmem [thread:$0]  %s87_s14, 1152, %s89_s3, [#allocation9], %s4001_s20, %s4001_s20, %s4002_s21  }
  0x16   :  { %s116_s22 = sshll.u32 %s5430_s11, 4  ;;  %s4003_s7 = smov [#allocation13]   ;;  %s117_s22 = int_to_ptr.hbm [resolvable:$true] %s116_s22 }
  0x17   :  { %s118_s23 = sshll.u32 %s4003_s7, 4  ;;  %s130_s26 = sshll.u32 %s5431_s12, 4  ;;  %s119_s23 = int_to_ptr.vmem [resolvable:$true] %s118_s23  ;;  %s131_s26 = int_to_ptr.hbm [resolvable:$true] %s130_s26 }
  0x18   :  { %124 = dma.hbm_to_vmem [thread:$0]  %s117_s22, 1536, %s119_s23, [#allocation12], %s3994_s16, %s3994_s16, %s3995_s17  }
  0x19   :  { %s4004_s8 = smov [#allocation14]  }
  0x1a   :  { %s132_s27 = sshll.u32 %s4004_s8, 4  ;;  %s133_s27 = int_to_ptr.vmem [resolvable:$true] %s132_s27 }
  0x1b   :  { %135 = dma.hbm_to_vmem [thread:$0]  %s131_s26, 128, %s133_s27, [#allocation15]  }
  0x1c   :  { %3981 = dma.done.wait [#allocation3], 192  }
  0x1d   :  { %3982 = vsyncadd [#allocation3], 4294967104 }
  0x1e   :  { %3983 = dma.done.wait [#allocation6], 1152  }
  0x1f   :  { %3984 = vsyncadd [#allocation6], 4294966144 }
  0x20   :  { %3985 = dma.done.wait [#allocation9], 1920  }
  0x21   :  { %3986 = vsyncadd [#allocation9], 4294965376 }
  0x22   :  { %3987 = dma.done.wait [#allocation12], 1856  }
  0x23   :  { %3988 = vsyncadd [#allocation12], 4294965440 }
  0x24   :  { %3989 = dma.done.wait [#allocation15], 128  }
  0x25   :  { %3990 = vsyncadd [#allocation15], 4294967168  ;;  %v4127_v0 = vld [vmem:[%s5419_s0] sm:$0xff]  ;;  %v4132_v1 = vld [vmem:[%s5419_s0 + $0x8] sm:$0xff]  ;;  %vm236_vm0 = vcmask 1046528   ;;  %vm401_vm1 = vcmask 1045504  }
  0x26   :  { %v4137_v2 = vld [vmem:[%s5419_s0 + $0x10] sm:$0xff]  ;;  %v237_v3 = vrot.slane %v4127_v0, 1  ;;  %v238_v4 = vrot.slane %v4132_v1, 1  ;;  %v4145_v6 = vld [vmem:[%s5419_s0 + $0x18] sm:$0xff]  ;;  %v4150_v7 = vld [vmem:[%s5419_s0 + $0x20] sm:$0xff]  ;;  %v402_v8 = vrot.slane %v4127_v0, 2 }
  0x27   :  { %v240_v5 = vrot.slane %v4137_v2, 1  ;;  %v242_v9 = vrot.slane %v4145_v6, 1  ;;  %v244_v10 = vrot.slane %v4150_v7, 1  ;;  %v403_v13 = vrot.slane %v4132_v1, 2  ;;  %v4162_v15 = vld [vmem:[%s5419_s0 + $0x28] sm:$0xff]  ;;  %v4167_v16 = vld [vmem:[%s5419_s0 + $0x30] sm:$0xff] }
  0x28   :  { %v239_v11 = vsel %vm236_vm0, %v237_v3, %v238_v4  ;;  %v405_v14 = vrot.slane %v4137_v2, 2  ;;  %v407_v20 = vrot.slane %v4145_v6, 2  ;;  %v409_v21 = vrot.slane %v4150_v7, 2  ;;  %s4005_s2 = smov 6   ;;  %v4184_v29 = vld [vmem:[%s5419_s0 + $0x38] sm:$0xff]  ;;  %v4189_v30 = vld [vmem:[%s5419_s0 + $0x40] sm:$0xff] }
  0x29   :  { %v241_v12 = vsel %vm236_vm0, %v238_v4, %v240_v5  ;;  %v243_v18 = vsel %vm236_vm0, %v240_v5, %v242_v9  ;;  %v245_v19 = vsel %vm236_vm0, %v242_v9, %v244_v10  ;;  %v246_v23 = vrot.slane %v4162_v15, 1  ;;  %s4006_s24 = smov 12   ;;  %v4208_v47 = vld [vmem:[%s5419_s0 + $0x48] sm:$0xff]  ;;  %v4214_v48 = vld [vmem:[%s5419_s0 + $0x50] sm:$0xff]  ;;  %v4222_v53 = vld [vmem:[%s5419_s0 + $0x58] sm:$0xff]  ;;  %s2949_s23 = sshll.u32 %s5432_s13, 4  ;;  %s2950_s23 = int_to_ptr.hbm [resolvable:$true] %s2949_s23 }
  0x2a   :  { %v3453_v17 = vpack.i.bf16 %v241_v12, %v239_v11  ;;  %v3463_v22 = vpack.i.bf16 %v245_v19, %v243_v18  ;;  %v248_v24 = vrot.slane %v4167_v16, 1  ;;  %v404_v25 = vsel %vm401_vm1, %v402_v8, %v403_v13  ;;  %v4227_v54 = vld [vmem:[%s5419_s0 + $0x60] sm:$0xff]  ;;  %v4244_v5 = vld [vmem:[%s5419_s0 + $0x68] sm:$0xff]  ;;  %v4249_v8 = vld [vmem:[%s5419_s0 + $0x70] sm:$0xff] }
  0x2b   :  { %v406_v26 = vsel %vm401_vm1, %v403_v13, %v405_v14  ;;  %v247_v27 = vsel %vm236_vm0, %v244_v10, %v246_v23  ;;  %v413_v31 = vrot.slane %v4167_v16, 2  ;;  %v411_v32 = vrot.slane %v4162_v15, 2 }
  0x2c   :  { %3454 = vrot.lane.b32.xlu0 %v3453_v17, %s4005_s2  ;;  %3464 = vrot.lane.b32.xlu1 %v3463_v22, %s4005_s2  ;;  %v249_v28 = vsel %vm236_vm0, %v246_v23, %v248_v24  ;;  %v408_v33 = vsel %vm401_vm1, %v405_v14, %v407_v20  ;;  %v410_v34 = vsel %vm401_vm1, %v407_v20, %v409_v21  ;;  %v250_v37 = vrot.slane %v4184_v29, 1 }
  0x2d   :  { %v3473_v35 = vpack.i.bf16 %v249_v28, %v247_v27  ;;  %v3458_v36 = vpack.i.bf16 %v406_v26, %v404_v25  ;;  %v252_v38 = vrot.slane %v4189_v30, 1  ;;  %v3468_v39 = vpack.i.bf16 %v410_v34, %v408_v33  ;;  %v4279_v33 = vld [vmem:[%s5419_s0 + $0x80] sm:$0xff] }
  0x2e   :  { %v412_v40 = vsel %vm401_vm1, %v409_v21, %v411_v32  ;;  %v414_v41 = vsel %vm401_vm1, %v411_v32, %v413_v31  ;;  %v415_v42 = vrot.slane %v4184_v29, 2  ;;  %v417_v43 = vrot.slane %v4189_v30, 2  ;;  %v4274_v32 = vld [vmem:[%s5419_s0 + $0x78] sm:$0xff] }
  0x2f   :  { %3474 = vrot.lane.b32.xlu2 %v3473_v35, %s4005_s2  ;;  %v251_v44 = vsel %vm236_vm0, %v248_v24, %v250_v37  ;;  %v253_v45 = vsel %vm236_vm0, %v250_v37, %v252_v38  ;;  %v3478_v46 = vpack.i.bf16 %v414_v41, %v412_v40  ;;  %v254_v49 = vrot.slane %v4208_v47, 1 }
  0x30   :  { %v416_v50 = vsel %vm401_vm1, %v413_v31, %v415_v42  ;;  %v418_v51 = vsel %vm401_vm1, %v415_v42, %v417_v43  ;;  %v3483_v52 = vpack.i.bf16 %v253_v45, %v251_v44  ;;  %v256_v55 = vrot.slane %v4214_v48, 1  ;;  %v4290_v44 = vld [vmem:[%s5419_s0 + $0x88] sm:$0xff]  ;;  %v4295_v45 = vld [vmem:[%s5419_s0 + $0x90] sm:$0xff] }
  0x31   :  { %v419_v56 = vrot.slane %v4208_v47, 2  ;;  %v421_v57 = vrot.slane %v4214_v48, 2  ;;  %v3488_v58 = vpack.i.bf16 %v418_v51, %v416_v50  ;;  %v255_v59 = vsel %vm236_vm0, %v252_v38, %v254_v49 }
  0x32   :  { %v257_v60 = vsel %vm236_vm0, %v254_v49, %v256_v55  ;;  %v258_v61 = vrot.slane %v4222_v53, 1  ;;  %v260_v62 = vrot.slane %v4227_v54, 1  ;;  %v423_v9 = vrot.slane %v4222_v53, 2 }
  0x33   :  { %v420_v63 = vsel %vm401_vm1, %v417_v43, %v419_v56  ;;  %v422_v3 = vsel %vm401_vm1, %v419_v56, %v421_v57  ;;  %v3493_v4 = vpack.i.bf16 %v257_v60, %v255_v59  ;;  %v425_v13 = vrot.slane %v4227_v54, 2  ;;  %v3351_v43 = vld [vmem:[#allocation2] sm:$0xff]  ;;  %v4310_v60 = vld [vmem:[%s5419_s0 + $0x98] sm:$0xff] }
  0x34   :  { %3459 = vrot.lane.b32.xlu0 %v3458_v36, %s4006_s24  ;;  %3469 = vrot.lane.b32.xlu1 %v3468_v39, %s4006_s24  ;;  %v259_v10 = vsel %vm236_vm0, %v256_v55, %v258_v61  ;;  %v261_v11 = vsel %vm236_vm0, %v258_v61, %v260_v62  ;;  %v3498_v12 = vpack.i.bf16 %v422_v3, %v420_v63  ;;  %v262_v14 = vrot.slane %v4244_v5, 1  ;;  %v653_v36 = vld [vmem:[#allocation2 + $0x8] sm:$0x1]  ;;  %v4315_v61 = vld [vmem:[%s5419_s0 + $0xa0] sm:$0xff] }
  0x35   :  { %v264_v17 = vrot.slane %v4249_v8, 1  ;;  %v3503_v18 = vpack.i.bf16 %v261_v11, %v259_v10  ;;  %v424_v19 = vsel %vm401_vm1, %v421_v57, %v423_v9  ;;  %v426_v20 = vsel %vm401_vm1, %v423_v9, %v425_v13 }
  0x36   :  { %v427_v21 = vrot.slane %v4244_v5, 2  ;;  %v429_v22 = vrot.slane %v4249_v8, 2  ;;  %v263_v23 = vsel %vm236_vm0, %v260_v62, %v262_v14  ;;  %v3508_v25 = vpack.i.bf16 %v426_v20, %v424_v19 }
  0x37   :  { %3479 = vrot.lane.b32.xlu2 %v3478_v46, %s4006_s24  ;;  %v265_v24 = vsel %vm236_vm0, %v262_v14, %v264_v17  ;;  %v431_v34 = vrot.slane %v4274_v32, 2  ;;  %v433_v35 = vrot.slane %v4279_v33, 2  ;;  %v660_v37 = vunpack.c.l.b16 %v653_v36 }
  0x38   :  { %v428_v26 = vsel %vm401_vm1, %v425_v13, %v427_v21  ;;  %v430_v27 = vsel %vm401_vm1, %v427_v21, %v429_v22  ;;  %v3513_v28 = vpack.i.bf16 %v265_v24, %v263_v23  ;;  %vm716_vm2 = vcmask 1040384  }
  0x39   :  { %v3518_v31 = vpack.i.bf16 %v430_v27, %v428_v26  ;;  %v432_v38 = vsel %vm401_vm1, %v429_v22, %v431_v34  ;;  %v434_v39 = vsel %vm401_vm1, %v431_v34, %v433_v35  ;;  %v662_v41 = vpack.c.b16 %v660_v37, %v660_v37 }
  0x3a   :  { %v3528_v40 = vpack.i.bf16 %v434_v39, %v432_v38  ;;  %v268_v46 = vrot.slane %v4279_v33, 1  ;;  %v266_v49 = vrot.slane %v4274_v32, 1  ;;  %v270_v50 = vrot.slane %v4290_v44, 1  ;;  %v4342_v38 = vld [vmem:[%s5419_s0 + $0xa8] sm:$0xff] }
  0x3b   :  { %v718_v42 = vsel %vm716_vm2, %v662_v41, 0  ;;  %v272_v51 = vrot.slane %v4295_v45, 1  ;;  %v437_v62 = vrot.slane %v4295_v45, 2  ;;  %v435_v63 = vrot.slane %v4290_v44, 2 }
  0x3c   :  { %3484 = vrot.lane.b32.xlu0 %v3483_v52, %s4005_s2  ;;  %3489 = vrot.lane.b32.xlu1 %v3488_v58, %s4006_s24  ;;  %v267_v52 = vsel %vm236_vm0, %v264_v17, %v266_v49  ;;  %v269_v55 = vsel %vm236_vm0, %v266_v49, %v268_v46  ;;  %v271_v56 = vsel %vm236_vm0, %v268_v46, %v270_v50  ;;  %v274_v3 = vrot.slane %v4310_v60, 1 }
  0x3d   :  { %726 = vmatpush.bf16.msra.mxu0 %v718_v42  ;;  %v273_v57 = vsel %vm236_vm0, %v270_v50, %v272_v51  ;;  %v3523_v59 = vpack.i.bf16 %v269_v55, %v267_v52  ;;  %v439_v10 = vrot.slane %v4310_v60, 2  ;;  %v441_v11 = vrot.slane %v4315_v61, 2 }
  0x3e   :  { %v3533_v58 = vpack.i.bf16 %v273_v57, %v271_v56  ;;  %v438_v13 = vsel %vm401_vm1, %v435_v63, %v437_v62  ;;  %v275_v14 = vsel %vm236_vm0, %v272_v51, %v274_v3  ;;  %vm566_vm3 = vcmask 48128  }
  0x3f   :  { %3494 = vrot.lane.b32.xlu2 %v3493_v4, %s4005_s2  ;;  %v276_v4 = vrot.slane %v4315_v61, 1  ;;  %v440_v19 = vsel %vm401_vm1, %v437_v62, %v439_v10  ;;  %v442_v20 = vsel %vm401_vm1, %v439_v10, %v441_v11  ;;  %vm600_vm4 = vcmask 97280   ;;  %v4366_v62 = vld [vmem:[%s5419_s0 + $0xb8] sm:$0xff] }
  0x40   :  { %v3548_v22 = vpack.i.bf16 %v442_v20, %v440_v19  ;;  %vm664_vm5 = vcmask 146432   ;;  %vm1191_vm6 = vcmask 7168   ;;  %vm1568_vm7 = vcmask 130048  }
  0x41   :  { %727 = vmatpush.bf16.msra.mxu0 %v3351_v43  ;;  %v277_v17 = vsel %vm236_vm0, %v274_v3, %v276_v4  ;;  %v282_v3 = vrot.slane %v4366_v62, 1  ;;  %vm1586_vm8 = vcmask 261120   ;;  %vm1638_vm9 = vcmask 392192  }
  0x42   :  { %vm2070_vm10 = vcmask 523264   ;;  %vm2134_vm11 = vcmask 785408   ;;  %vm2259_vm12 = vcmask 531456   ;;  %vm2485_vm13 = vcmask 269312  }
  0x43   :  { %vm2534_vm14 = vcmask 1044480   ;;  %vm2546_vm15 = vcmask 1043456  }
  0x44   :  { %3499 = vrot.lane.b32.xlu0 %v3498_v12, %s4006_s24  ;;  %3504 = vrot.lane.b32.xlu1 %v3503_v18, %s4005_s2  ;;  %v436_v12 = vsel %vm401_vm1, %v433_v35, %v435_v63  ;;  %v3543_v18 = vpack.i.bf16 %v277_v17, %v275_v14  ;;  %v278_v63 = vrot.slane %v4342_v38, 1 }
  0x45   :  { %v3538_v21 = vpack.i.bf16 %v438_v13, %v436_v12 }
  0x46   :  { %v279_v10 = vsel %vm236_vm0, %v276_v4, %v278_v63 }
  0x47   :  { %3509 = vrot.lane.b32.xlu2 %v3508_v25, %s4006_s24 }
  0x4c   :  { %3514 = vrot.lane.b32.xlu0 %v3513_v28, %s4005_s2  ;;  %3519 = vrot.lane.b32.xlu1 %v3518_v31, %s4006_s24 }
  0x4f   :  { %3524 = vrot.lane.b32.xlu2 %v3523_v59, %s4005_s2 }
  0x54   :  { %3529 = vrot.lane.b32.xlu0 %v3528_v40, %s4006_s24  ;;  %3534 = vrot.lane.b32.xlu1 %v3533_v58, %s4005_s2 }
  0x57   :  { %3539 = vrot.lane.b32.xlu2 %v3538_v21, %s4006_s24 }
  0x5c   :  { %3544 = vrot.lane.b32.xlu0 %v3543_v18, %s4005_s2  ;;  %3549 = vrot.lane.b32.xlu1 %v3548_v22, %s4006_s24 }
  0x89   :  { %v3475_v56 = vpop.permute.xlu2 %3474 }
  0x8a   :  { %v3477_v14 = vunpack.i.h.bf16 %v3475_v56  ;;  %v3476_v17 = vunpack.i.l.bf16 %v3475_v56 }
  0x8c   :  { %v572_v4 = vsel %vm566_vm3, %v4162_v15, %v3477_v14  ;;  %v4398_v15 = vld [vmem:[%s5419_s0 + $0xd0] sm:$0xff] }
  0x91   :  { %v3480_v18 = vpop.permute.xlu2 %3479 }
  0x92   :  { %v3482_v21 = vunpack.i.h.bf16 %v3480_v18  ;;  %v3481_v22 = vunpack.i.l.bf16 %v3480_v18 }
  0x9e   :  { %v3455_v9 = vpop.permute.xlu0 %3454  ;;  %v3465_v26 = vpop.permute.xlu1 %3464 }
  0x9f   :  { %v3457_v23 = vunpack.i.h.bf16 %v3455_v9  ;;  %v3456_v24 = vunpack.i.l.bf16 %v3455_v9  ;;  %v3467_v42 = vunpack.i.h.bf16 %v3465_v26  ;;  %v3466_v43 = vunpack.i.l.bf16 %v3465_v26 }
  0xa1   :  { %v568_v31 = vsel %vm566_vm3, %v4132_v1, %v3457_v23  ;;  %v567_v34 = vsel %vm566_vm3, %v4127_v0, %v3456_v24  ;;  %v4347_v1 = vld [vmem:[%s5419_s0 + $0xb0] sm:$0xff]  ;;  %v443_v0 = vrot.slane %v4342_v38, 2  ;;  %v570_v52 = vsel %vm566_vm3, %v4145_v6, %v3467_v42  ;;  %v4371_v6 = vld [vmem:[%s5419_s0 + $0xc0] sm:$0xff] }
  0xa2   :  { %v445_v39 = vrot.slane %v4347_v1, 2  ;;  %v569_v55 = vsel %vm566_vm3, %v4137_v2, %v3466_v43  ;;  %v280_v2 = vrot.slane %v4347_v1, 1  ;;  %v284_v9 = vrot.slane %v4371_v6, 1 }
  0xa3   :  { %v444_v40 = vsel %vm401_vm1, %v441_v11, %v443_v0  ;;  %v571_v23 = vsel %vm566_vm3, %v4150_v7, %v3476_v17  ;;  %v449_v7 = vrot.slane %v4371_v6, 2 }
  0xa4   :  { %v446_v41 = vsel %vm401_vm1, %v443_v0, %v445_v39  ;;  %v281_v11 = vsel %vm236_vm0, %v278_v63, %v280_v2  ;;  %v283_v12 = vsel %vm236_vm0, %v280_v2, %v282_v3  ;;  %v285_v13 = vsel %vm236_vm0, %v282_v3, %v284_v9 }
  0xa5   :  { %v3558_v49 = vpack.i.bf16 %v446_v41, %v444_v40  ;;  %v3563_v19 = vpack.i.bf16 %v285_v13, %v283_v12  ;;  %v3553_v20 = vpack.i.bf16 %v281_v11, %v279_v10  ;;  %v605_v24 = vsel %vm600_vm4, %v571_v23, %v3481_v22 }
  0xa6   :  { %v3460_v25 = vpop.permute.xlu0 %3459  ;;  %v3470_v46 = vpop.permute.xlu1 %3469 }
  0xa7   :  { %v3462_v27 = vunpack.i.h.bf16 %v3460_v25  ;;  %v3461_v28 = vunpack.i.l.bf16 %v3460_v25  ;;  %3559 = vrot.lane.b32.xlu0 %v3558_v49, %s4006_s24  ;;  %v3472_v50 = vunpack.i.h.bf16 %v3470_v46  ;;  %v3471_v51 = vunpack.i.l.bf16 %v3470_v46  ;;  %3564 = vrot.lane.b32.xlu1 %v3563_v19, %s4005_s2 }
  0xa8   :  { %3554 = vrot.lane.b32.xlu2 %v3553_v20, %s4005_s2  ;;  %v606_v25 = vsel %vm600_vm4, %v572_v4, %v3482_v21 }
  0xa9   :  { %v601_v35 = vsel %vm600_vm4, %v567_v34, %v3461_v28  ;;  %v602_v36 = vsel %vm600_vm4, %v568_v31, %v3462_v27  ;;  %v603_v57 = vsel %vm600_vm4, %v569_v55, %v3471_v51  ;;  %v604_v58 = vsel %vm600_vm4, %v570_v52, %v3472_v50  ;;  %v4393_v28 = vld [vmem:[%s5419_s0 + $0xc8] sm:$0xff] }
  0xaa   :  { %v634_v37 = vpack.c.bf16 %v602_v36, %v601_v35  ;;  %v635_v59 = vpack.c.bf16 %v604_v58, %v603_v57  ;;  %v636_v26 = vpack.c.bf16 %v606_v25, %v605_v24  ;;  %v447_v31 = vrot.slane %v4366_v62, 2 }
  0xab   :  { %v286_v34 = vrot.slane %v4393_v28, 1  ;;  %v288_v35 = vrot.slane %v4398_v15, 1  ;;  %v451_v36 = vrot.slane %v4393_v28, 2 }
  0xac   :  { %2967 = vmatmul.msk.bf16.vlgmr.msra.gmra.mxu0 %vm664_vm5, %v634_v37  ;;  %v453_v37 = vrot.slane %v4398_v15, 2  ;;  %v448_v56 = vsel %vm401_vm1, %v445_v39, %v447_v31  ;;  %v450_v57 = vsel %vm401_vm1, %v447_v31, %v449_v7 }
  0xad   :  { %v287_v42 = vsel %vm236_vm0, %v284_v9, %v286_v34  ;;  %v289_v43 = vsel %vm236_vm0, %v286_v34, %v288_v35  ;;  %v452_v46 = vsel %vm401_vm1, %v449_v7, %v451_v36  ;;  %v3568_v2 = vpack.i.bf16 %v450_v57, %v448_v56  ;;  %v3495_v9 = vpop.permute.xlu2 %3494 }
  0xae   :  { %v3485_v27 = vpop.permute.xlu0 %3484  ;;  %v3490_v41 = vpop.permute.xlu1 %3489  ;;  %v454_v49 = vsel %vm401_vm1, %v451_v36, %v453_v37  ;;  %v3573_v50 = vpack.i.bf16 %v289_v43, %v287_v42  ;;  %v3497_v12 = vunpack.i.h.bf16 %v3495_v9  ;;  %v3496_v13 = vunpack.i.l.bf16 %v3495_v9 }
  0xaf   :  { %v3487_v0 = vunpack.i.h.bf16 %v3485_v27  ;;  %v3486_v40 = vunpack.i.l.bf16 %v3485_v27  ;;  %v3578_v51 = vpack.i.bf16 %v454_v49, %v452_v46  ;;  %v3492_v52 = vunpack.i.h.bf16 %v3490_v41  ;;  %v4451_v27 = vld [vmem:[%s5419_s0 + $0xe8] sm:$0xff] }
  0xb0   :  { %v3491_v55 = vunpack.i.l.bf16 %v3490_v41  ;;  %3574 = vrot.lane.b32.xlu0 %v3573_v50, %s4005_s2  ;;  %3569 = vrot.lane.b32.xlu2 %v3568_v2, %s4006_s24  ;;  %v576_v22 = vsel %vm566_vm3, %v4208_v47, %v3497_v12  ;;  %v575_v4 = vsel %vm566_vm3, %v4189_v30, %v3496_v13  ;;  %v4456_v47 = vld [vmem:[%s5419_s0 + $0xf0] sm:$0xff]  ;;  %v294_v31 = vrot.slane %v4451_v27, 1 }
  0xb1   :  { %v574_v58 = vsel %vm566_vm3, %v4184_v29, %v3487_v0  ;;  %3579 = vrot.lane.b32.xlu1 %v3578_v51, %s4006_s24  ;;  %v4427_v29 = vld [vmem:[%s5419_s0 + $0xd8] sm:$0xff]  ;;  %v296_v34 = vrot.slane %v4456_v47, 1 }
  0xb2   :  { %v608_v3 = vsel %vm600_vm4, %v574_v58, %v3492_v52  ;;  %v455_v10 = vrot.slane %v4427_v29, 2  ;;  %v290_v7 = vrot.slane %v4427_v29, 1 }
  0xb3   :  { %v297_v43 = vsel %vm236_vm0, %v294_v31, %v296_v34 }
  0xb4   :  { %v456_v17 = vsel %vm401_vm1, %v453_v37, %v455_v10 }
  0xb5   :  { %v3510_v0 = vpop.permute.xlu2 %3509 }
  0xb6   :  { %v3500_v14 = vpop.permute.xlu0 %3499  ;;  %v3512_v50 = vunpack.i.h.bf16 %v3510_v0  ;;  %v3511_v51 = vunpack.i.l.bf16 %v3510_v0 }
  0xb7   :  { %v3502_v20 = vunpack.i.h.bf16 %v3500_v14  ;;  %v3501_v21 = vunpack.i.l.bf16 %v3500_v14 }
  0xb9   :  { %v609_v23 = vsel %vm600_vm4, %v575_v4, %v3501_v21  ;;  %v610_v24 = vsel %vm600_vm4, %v576_v22, %v3502_v20 }
  0xba   :  { %v638_v25 = vpack.c.bf16 %v610_v24, %v609_v23 }
  0xbc   :  { %2968 = vmatmul.msk.bf16.gmra.mxu0 %vm664_vm5, %v635_v59  ;;  %v573_v59 = vsel %vm566_vm3, %v4167_v16, %v3486_v40  ;;  %v4432_v16 = vld [vmem:[%s5419_s0 + $0xe0] sm:$0xff]  ;;  %v291_v40 = vsel %vm236_vm0, %v288_v35, %v290_v7 }
  0xbd   :  { %v607_v63 = vsel %vm600_vm4, %v573_v59, %v3491_v55  ;;  %v457_v11 = vrot.slane %v4432_v16, 2  ;;  %v292_v30 = vrot.slane %v4432_v16, 1  ;;  %v4478_v59 = vld [vmem:[%s5419_s0 + $0xf8] sm:$0xff] }
  0xbe   :  { %v637_v39 = vpack.c.bf16 %v608_v3, %v607_v63  ;;  %v3515_v58 = vpop.permute.xlu0 %3514  ;;  %v298_v2 = vrot.slane %v4478_v59, 1  ;;  %v463_v3 = vrot.slane %v4478_v59, 2 }
  0xbf   :  { %v458_v18 = vsel %vm401_vm1, %v455_v10, %v457_v11  ;;  %v293_v41 = vsel %vm236_vm0, %v290_v7, %v292_v30  ;;  %v295_v42 = vsel %vm236_vm0, %v292_v30, %v294_v31  ;;  %v3517_v9 = vunpack.i.h.bf16 %v3515_v58 }
  0xc0   :  { %v3588_v19 = vpack.i.bf16 %v458_v18, %v456_v17  ;;  %v3593_v46 = vpack.i.bf16 %v297_v43, %v295_v42  ;;  %v3583_v49 = vpack.i.bf16 %v293_v41, %v291_v40  ;;  %v3516_v10 = vunpack.i.l.bf16 %v3515_v58  ;;  %v169_v58 = vld [vmem:[#allocation14] sm:$0xff] }
  0xc1   :  { %v299_v13 = vsel %vm236_vm0, %v296_v34, %v298_v2  ;;  %v580_v4 = vsel %vm566_vm3, %v4244_v5, %v3517_v9 }
  0xc2   :  { %3589 = vrot.lane.b32.xlu0 %v3588_v19, %s4006_s24  ;;  %3594 = vrot.lane.b32.xlu1 %v3593_v46, %s4005_s2  ;;  %v579_v23 = vsel %vm566_vm3, %v4227_v54, %v3516_v10  ;;  %v3525_v54 = vpop.permute.xlu2 %3524 }
  0xc3   :  { %3584 = vrot.lane.b32.xlu2 %v3583_v49, %s4005_s2  ;;  %v3527_v34 = vunpack.i.h.bf16 %v3525_v54 }
  0xc5   :  { %v582_v41 = vsel %vm566_vm3, %v4274_v32, %v3527_v34 }
  0xcc   :  { %2969 = vmatmul.msk.bf16.gmra.mxu0 %vm664_vm5, %v636_v26  ;;  %v3505_v26 = vpop.permute.xlu1 %3504 }
  0xcd   :  { %v3507_v36 = vunpack.i.h.bf16 %v3505_v26  ;;  %v3506_v37 = vunpack.i.l.bf16 %v3505_v26  ;;  %v459_v26 = vrot.slane %v4451_v27, 2 }
  0xcf   :  { %v578_v52 = vsel %vm566_vm3, %v4222_v53, %v3507_v36  ;;  %v577_v55 = vsel %vm566_vm3, %v4214_v48, %v3506_v37  ;;  %v4483_v48 = vld [vmem:[%s5419_s0 + $0x100] sm:$0xf]  ;;  %v461_v53 = vrot.slane %v4456_v47, 2  ;;  %v460_v7 = vsel %vm401_vm1, %v457_v11, %v459_v26  ;;  %v3530_v37 = vpop.permute.xlu0 %3529  ;;  %s4009_s0 = smov 16  }
  0xd0   :  { %v611_v35 = vsel %vm600_vm4, %v577_v55, %v3511_v51  ;;  %v612_v56 = vsel %vm600_vm4, %v578_v52, %v3512_v50  ;;  %v300_v63 = vrot.slane %v4483_v48, 1  ;;  %v3526_v36 = vunpack.i.l.bf16 %v3525_v54  ;;  %v3540_v52 = vpop.permute.xlu2 %3539 }
  0xd1   :  { %v639_v57 = vpack.c.bf16 %v612_v56, %v611_v35  ;;  %v464_v17 = vsel %vm401_vm1, %v461_v53, %v463_v3  ;;  %v462_v5 = vsel %vm401_vm1, %v459_v26, %v461_v53  ;;  %v3532_v0 = vunpack.i.h.bf16 %v3530_v37 }
  0xd2   :  { %v301_v14 = vsel %vm236_vm0, %v298_v2, %v300_v63  ;;  %v3598_v31 = vpack.i.bf16 %v462_v5, %v460_v7  ;;  %v3531_v40 = vunpack.i.l.bf16 %v3530_v37  ;;  %v581_v11 = vsel %vm566_vm3, %v4249_v8, %v3526_v36 }
  0xd3   :  { %v3603_v19 = vpack.i.bf16 %v301_v14, %v299_v13  ;;  %v616_v43 = vsel %vm600_vm4, %v582_v41, %v3532_v0  ;;  %v3542_v55 = vunpack.i.h.bf16 %v3540_v52  ;;  %v3541_v35 = vunpack.i.l.bf16 %v3540_v52 }
  0xd4   :  { %v3520_v12 = vpop.permute.xlu1 %3519  ;;  %3599 = vrot.lane.b32.xlu2 %v3598_v31, %s4006_s24  ;;  %v615_v42 = vsel %vm600_vm4, %v581_v11, %v3531_v40 }
  0xd5   :  { %v3522_v21 = vunpack.i.h.bf16 %v3520_v12  ;;  %v3521_v22 = vunpack.i.l.bf16 %v3520_v12  ;;  %3604 = vrot.lane.b32.xlu0 %v3603_v19, %s4005_s2  ;;  %v641_v46 = vpack.c.bf16 %v616_v43, %v615_v42 }
  0xd7   :  { %v613_v24 = vsel %vm600_vm4, %v579_v23, %v3521_v22 }
  0xdc   :  { %2970 = vmatmul.msk.bf16.gmra.mxu0 %vm664_vm5, %v637_v39  ;;  %v465_v39 = vrot.slane %v4483_v48, 2  ;;  %366 = vrot.lane.b32.xlu2 %v300_v63, %s4005_s2  ;;  %v3535_v49 = vpop.permute.xlu1 %3534  ;;  %v4524_v63 = vperm.slane %v169_v58, 0 }
  0xdd   :  { %v3537_v50 = vunpack.i.h.bf16 %v3535_v49  ;;  %v3536_v51 = vunpack.i.l.bf16 %v3535_v49 }
  0xde   :  { %v466_v18 = vsel %vm401_vm1, %v463_v3, %v465_v39  ;;  %531 = vrot.lane.b32.xlu0 %v465_v39, %s4006_s24  ;;  %v3545_v3 = vpop.permute.xlu0 %3544 }
  0xdf   :  { %v3608_v20 = vpack.i.bf16 %v466_v18, %v464_v17  ;;  %v584_v32 = vsel %vm566_vm3, %v4290_v44, %v3537_v50  ;;  %v583_v8 = vsel %vm566_vm3, %v4279_v33, %v3536_v51  ;;  %v3547_v9 = vunpack.i.h.bf16 %v3545_v3 }
  0xe0   :  { %v617_v56 = vsel %vm600_vm4, %v583_v8, %v3541_v35  ;;  %v3546_v10 = vunpack.i.l.bf16 %v3545_v3 }
  0xe1   :  { %3609 = vrot.lane.b32.xlu1 %v3608_v20, %s4006_s24  ;;  %v586_v18 = vsel %vm566_vm3, %v4310_v60, %v3547_v9 }
  0xe2   :  { %v585_v19 = vsel %vm566_vm3, %v4295_v45, %v3546_v10 }
  0xe4   :  { %v3550_v44 = vpop.permute.xlu1 %3549 }
  0xe5   :  { %v3552_v13 = vunpack.i.h.bf16 %v3550_v44  ;;  %v3551_v33 = vunpack.i.l.bf16 %v3550_v44 }
  0xe7   :  { %v620_v22 = vsel %vm600_vm4, %v586_v18, %v3552_v13 }
  0xec   :  { %2971 = vmatmul.msk.bf16.gmra.mxu0 %vm664_vm5, %v638_v25  ;;  %v614_v25 = vsel %vm600_vm4, %v580_v4, %v3522_v21  ;;  %v619_v21 = vsel %vm600_vm4, %v585_v19, %v3551_v33 }
  0xed   :  { %v640_v30 = vpack.c.bf16 %v614_v25, %v613_v24  ;;  %v643_v24 = vpack.c.bf16 %v620_v22, %v619_v21 }
  0xfc   :  { %2972 = vmatmul.msk.bf16.gmra.mxu0 %vm664_vm5, %v639_v57  ;;  %v618_v57 = vsel %vm600_vm4, %v584_v32, %v3542_v55 }
  0xfd   :  { %v642_v53 = vpack.c.bf16 %v618_v57, %v617_v56 }
 0x102   :  { %v3555_v5 = vpop.permute.xlu2 %3554 }
 0x103   :  { %v3557_v31 = vunpack.i.h.bf16 %v3555_v5  ;;  %v3556_v54 = vunpack.i.l.bf16 %v3555_v5 }
 0x105   :  { %v588_v42 = vsel %vm566_vm3, %v4342_v38, %v3557_v31  ;;  %v587_v43 = vsel %vm566_vm3, %v4315_v61, %v3556_v54 }
 0x10c   :  { %2973 = vmatmul.msk.bf16.gmra.mxu0 %vm664_vm5, %v640_v30 }
 0x119   :  { %v3560_v34 = vpop.permute.xlu0 %3559  ;;  %v3565_v56 = vpop.permute.xlu1 %3564 }
 0x11a   :  { %v3562_v0 = vunpack.i.h.bf16 %v3560_v34  ;;  %v3561_v40 = vunpack.i.l.bf16 %v3560_v34  ;;  %v3567_v58 = vunpack.i.h.bf16 %v3565_v56 }
 0x11c   :  { %2974 = vmatmul.msk.bf16.gmra.mxu0 %vm664_vm5, %v641_v46  ;;  %v621_v50 = vsel %vm600_vm4, %v587_v43, %v3561_v40  ;;  %v622_v51 = vsel %vm600_vm4, %v588_v42, %v3562_v0  ;;  %v590_v13 = vsel %vm566_vm3, %v4366_v62, %v3567_v58 }
 0x11d   :  { %v644_v55 = vpack.c.bf16 %v622_v51, %v621_v50 }
 0x123   :  { %v3580_v5 = vpop.permute.xlu1 %3579 }
 0x124   :  { %v3582_v31 = vunpack.i.h.bf16 %v3580_v5  ;;  %v3581_v54 = vunpack.i.l.bf16 %v3580_v5 }
 0x129   :  { %v729_v2 = vpop.f32.mrf.mxu0 }
 0x12a   :  { %v730_v39 = vadd.f32 %v729_v2, %v4524_v63  ;;  %v3570_v2 = vpop.permute.xlu2 %3569 }
 0x12b   :  { %v3572_v9 = vunpack.i.h.bf16 %v3570_v2  ;;  %v3571_v10 = vunpack.i.l.bf16 %v3570_v2 }
 0x12c   :  { %2975 = vmatmul.msk.bf16.gmra.mxu0 %vm664_vm5, %v642_v53  ;;  %v813_v14 = vmax.f32 %v730_v39, 0.0  ;;  %v3566_v53 = vunpack.i.l.bf16 %v3565_v56 }
 0x12d   :  { %v624_v19 = vsel %vm600_vm4, %v590_v13, %v3572_v9 }
 0x12e   :  { %v879_v4 = vrot.slane %v813_v14, 1  ;;  %v589_v33 = vsel %vm566_vm3, %v4347_v1, %v3566_v53 }
 0x12f   :  { %v623_v18 = vsel %vm600_vm4, %v589_v33, %v3571_v10 }
 0x130   :  { %v645_v21 = vpack.c.bf16 %v624_v19, %v623_v18 }
 0x131   :  { %v731_v12 = vpop.f32.mrf.mxu0 }
 0x132   :  { %v732_v17 = vadd.f32 %v731_v12, %v4524_v63 }
 0x134   :  { %v814_v20 = vmax.f32 %v732_v17, 0.0 }
 0x136   :  { %v880_v23 = vrot.slane %v814_v20, 1 }
 0x138   :  { %v881_v25 = vsel %vm236_vm0, %v879_v4, %v880_v23 }
 0x139   :  { %v734_v26 = vpop.f32.mrf.mxu0  ;;  %v4536_v30 = vmax.f32 %v813_v14, %v881_v25 }
 0x13a   :  { %v735_v7 = vadd.f32 %v734_v26, %v4524_v63 }
 0x13c   :  { %v815_v60 = vmax.f32 %v735_v7, 0.0  ;;  %2976 = vmatmul.msk.bf16.gmra.mxu0 %vm664_vm5, %v643_v24  ;;  %v3575_v24 = vpop.permute.xlu0 %3574 }
 0x13d   :  { %v3577_v26 = vunpack.i.h.bf16 %v3575_v24  ;;  %v3576_v7 = vunpack.i.l.bf16 %v3575_v24 }
 0x13e   :  { %v882_v45 = vrot.slane %v815_v60, 1 }
 0x13f   :  { %v591_v0 = vsel %vm566_vm3, %v4371_v6, %v3576_v7 }
 0x140   :  { %v883_v36 = vsel %vm236_vm0, %v880_v23, %v882_v45  ;;  %v625_v42 = vsel %vm600_vm4, %v591_v0, %v3581_v54 }
 0x141   :  { %v736_v37 = vpop.f32.mrf.mxu0  ;;  %v4541_v41 = vmax.f32 %v814_v20, %v883_v36 }
 0x142   :  { %v737_v11 = vadd.f32 %v736_v37, %v4524_v63  ;;  %v592_v37 = vsel %vm566_vm3, %v4393_v28, %v3577_v26 }
 0x143   :  { %v1010_v46 = vpack.c.bf16 %v4541_v41, %v4536_v30  ;;  %v626_v43 = vsel %vm600_vm4, %v592_v37, %v3582_v31 }
 0x144   :  { %v816_v49 = vmax.f32 %v737_v11, 0.0  ;;  %v646_v50 = vpack.c.bf16 %v626_v43, %v625_v42 }
 0x146   :  { %v884_v52 = vrot.slane %v816_v49, 1 }
 0x148   :  { %v885_v35 = vsel %vm236_vm0, %v882_v45, %v884_v52 }
 0x149   :  { %v739_v32 = vpop.f32.mrf.mxu0  ;;  %v4553_v8 = vmax.f32 %v815_v60, %v885_v35  ;;  %v3585_v35 = vpop.permute.xlu2 %3584 }
 0x14a   :  { %v740_v38 = vadd.f32 %v739_v32, %v4524_v63  ;;  %v3586_v56 = vunpack.i.l.bf16 %v3585_v35 }
 0x14c   :  { %v817_v57 = vmax.f32 %v740_v38, 0.0  ;;  %2977 = vmatmul.msk.bf16.gmra.mxu0 %vm664_vm5, %v644_v55  ;;  %v3587_v38 = vunpack.i.h.bf16 %v3585_v35  ;;  %v593_v10 = vsel %vm566_vm3, %v4398_v15, %v3586_v56 }
 0x14e   :  { %v886_v61 = vrot.slane %v817_v57, 1  ;;  %v594_v9 = vsel %vm566_vm3, %v4427_v29, %v3587_v38 }
 0x150   :  { %v887_v3 = vsel %vm236_vm0, %v884_v52, %v886_v61 }
 0x151   :  { %v741_v39 = vpop.f32.mrf.mxu0  ;;  %v4558_v44 = vmax.f32 %v816_v49, %v887_v3 }
 0x152   :  { %v742_v12 = vadd.f32 %v741_v39, %v4524_v63 }
 0x153   :  { %v1011_v14 = vpack.c.bf16 %v4558_v44, %v4553_v8 }
 0x154   :  { %v818_v17 = vmax.f32 %v742_v12, 0.0 }
 0x156   :  { %v888_v20 = vrot.slane %v818_v17, 1 }
 0x158   :  { %v889_v22 = vsel %vm236_vm0, %v886_v61, %v888_v20 }
 0x159   :  { %v744_v4 = vpop.f32.mrf.mxu0  ;;  %v4570_v23 = vmax.f32 %v817_v57, %v889_v22  ;;  %v3590_v57 = vpop.permute.xlu0 %3589 }
 0x15a   :  { %v745_v62 = vadd.f32 %v744_v4, %v4524_v63  ;;  %v3592_v53 = vunpack.i.h.bf16 %v3590_v57  ;;  %v3591_v2 = vunpack.i.l.bf16 %v3590_v57  ;;  %v3595_v4 = vpop.permute.xlu1 %3594 }
 0x15b   :  { %v3597_v24 = vunpack.i.h.bf16 %v3595_v4 }
 0x15c   :  { %v819_v25 = vmax.f32 %v745_v62, 0.0  ;;  %2978 = vmatmul.msk.bf16.gmra.mxu0 %vm664_vm5, %v645_v21  ;;  %v628_v33 = vsel %vm600_vm4, %v594_v9, %v3592_v53 }
 0x15d   :  { %v596_v31 = vsel %vm566_vm3, %v4451_v27, %v3597_v24 }
 0x15e   :  { %v890_v1 = vrot.slane %v819_v25, 1 }
 0x160   :  { %v891_v60 = vsel %vm236_vm0, %v888_v20, %v890_v1 }
 0x161   :  { %v746_v45 = vpop.f32.mrf.mxu0  ;;  %v4575_v34 = vmax.f32 %v818_v17, %v891_v60  ;;  %v627_v17 = vsel %vm600_vm4, %v593_v10, %v3591_v2  ;;  %v3605_v43 = vpop.permute.xlu0 %3604 }
 0x162   :  { %v747_v36 = vadd.f32 %v746_v45, %v4524_v63  ;;  %v647_v19 = vpack.c.bf16 %v628_v33, %v627_v17 }
 0x163   :  { %v1012_v40 = vpack.c.bf16 %v4575_v34, %v4570_v23 }
 0x164   :  { %v820_v11 = vmax.f32 %v747_v36, 0.0 }
 0x166   :  { %v892_v49 = vrot.slane %v820_v11, 1 }
 0x168   :  { %v893_v51 = vsel %vm236_vm0, %v890_v1, %v892_v49  ;;  %v3600_v1 = vpop.permute.xlu2 %3599 }
 0x169   :  { %v749_v52 = vpop.f32.mrf.mxu0  ;;  %v4587_v55 = vmax.f32 %v819_v25, %v893_v51  ;;  %v3596_v25 = vunpack.i.l.bf16 %v3595_v4  ;;  %v3602_v5 = vunpack.i.h.bf16 %v3600_v1  ;;  %v3601_v60 = vunpack.i.l.bf16 %v3600_v1  ;;  %v3610_v51 = vpop.permute.xlu1 %3609 }
 0x16a   :  { %v750_v28 = vadd.f32 %v749_v52, %v4524_v63  ;;  %v3612_v27 = vunpack.i.h.bf16 %v3610_v51  ;;  %v532_v2 = vpop.permute.xlu0 %531 }
 0x16b   :  { %v595_v54 = vsel %vm566_vm3, %v4432_v16, %v3596_v25  ;;  %v630_v0 = vsel %vm600_vm4, %v596_v31, %v3602_v5 }
 0x16c   :  { %v821_v32 = vmax.f32 %v750_v28, 0.0  ;;  %2979 = vmatmul.msk.bf16.gmra.mxu0 %vm664_vm5, %v646_v50  ;;  %v629_v37 = vsel %vm600_vm4, %v595_v54, %v3601_v60  ;;  %v3606_v50 = vunpack.i.l.bf16 %v3605_v43  ;;  %v3611_v28 = vunpack.i.l.bf16 %v3610_v51 }
 0x16e   :  { %v894_v6 = vrot.slane %v821_v32, 1  ;;  %v597_v35 = vsel %vm566_vm3, %v4456_v47, %v3606_v50 }
 0x170   :  { %v895_v61 = vsel %vm236_vm0, %v892_v49, %v894_v6  ;;  %v3607_v49 = vunpack.i.h.bf16 %v3605_v43  ;;  %v367_v57 = vpop.permute.xlu2 %366 }
 0x171   :  { %v751_v58 = vpop.f32.mrf.mxu0  ;;  %v4592_v3 = vmax.f32 %v820_v11, %v895_v61  ;;  %v648_v11 = vpack.c.bf16 %v630_v0, %v629_v37  ;;  %v599_v53 = vsel %vm566_vm3, %v4483_v48, %v367_v57 }
 0x172   :  { %v752_v39 = vadd.f32 %v751_v58, %v4524_v63  ;;  %v598_v16 = vsel %vm566_vm3, %v4478_v59, %v3607_v49  ;;  %v633_v47 = vsel %vm600_vm4, %v599_v53, %v532_v2 }
 0x173   :  { %v1013_v12 = vpack.c.bf16 %v4592_v3, %v4587_v55  ;;  %v650_v33 = vpack.c.bf16 %v633_v47, %v633_v47 }
 0x174   :  { %v822_v13 = vmax.f32 %v752_v39, 0.0 }
 0x176   :  { %v896_v18 = vrot.slane %v822_v13, 1 }
 0x178   :  { %v897_v20 = vsel %vm236_vm0, %v894_v6, %v896_v18  ;;  %v632_v6 = vsel %vm600_vm4, %v598_v16, %v3612_v27 }
 0x179   :  { %v754_v21 = vpop.f32.mrf.mxu0  ;;  %v4604_v22 = vmax.f32 %v821_v32, %v897_v20  ;;  %v631_v32 = vsel %vm600_vm4, %v597_v35, %v3611_v28 }
 0x17a   :  { %v4607_v29 = vadd.f32 %v754_v21, %v4524_v63  ;;  %v649_v38 = vpack.c.bf16 %v632_v6, %v631_v32 }
 0x17c   :  { %v823_v15 = vmax.f32 %v4607_v29, 0.0  ;;  %2980 = vmatmul.msk.bf16.gmra.mxu0 %vm664_vm5, %v647_v19 }
 0x17e   :  { %v4613_v62 = vrot.slane %v823_v15, 1 }
 0x180   :  { %v899_v26 = vsel %vm236_vm0, %v896_v18, %v4613_v62 }
 0x181   :  { %v756_v7 = vpop.f32.mrf.mxu0  ;;  %v4617_v45 = vmax.f32 %v822_v13, %v899_v26 }
 0x182   :  { %v757_v18 = vadd.f32 %v756_v7, %v4524_v63 }
 0x183   :  { %v1014_v36 = vpack.c.bf16 %v4617_v45, %v4604_v22 }
 0x184   :  { %v824_v25 = vmax.f32 %v757_v18, 0.0 }
 0x189   :  { %v759_v42 = vpop.f32.mrf.mxu0 }
 0x18a   :  { %v760_v10 = vadd.f32 %v759_v42, %v4524_v63 }
 0x18c   :  { %2981 = vmatmul.msk.bf16.gmra.mxu0 %vm664_vm5, %v648_v11  ;;  %v825_v48 = vmax.f32 %v760_v10, 0.0  ;;  %v900_v11 = vrot.slane %v824_v25, 1 }
 0x18e   :  { %v902_v60 = vrot.slane %v825_v48, 1  ;;  %v901_v16 = vsel %vm236_vm0, %v4613_v62, %v900_v11 }
 0x191   :  { %v761_v52 = vpop.f32.mrf.mxu0 }
 0x192   :  { %v762_v39 = vadd.f32 %v761_v52, %v4524_v63  ;;  %v903_v52 = vsel %vm236_vm0, %v900_v11, %v902_v60 }
 0x193   :  { %v988_v32 = vmax.f32 %v824_v25, %v903_v52 }
 0x194   :  { %v826_v19 = vmax.f32 %v762_v39, 0.0 }
 0x196   :  { %v904_v1 = vrot.slane %v826_v19, 1 }
 0x198   :  { %v905_v43 = vsel %vm236_vm0, %v902_v60, %v904_v1 }
 0x199   :  { %v764_v56 = vpop.f32.mrf.mxu0  ;;  %v989_v27 = vmax.f32 %v825_v48, %v905_v43 }
 0x19a   :  { %v765_v59 = vadd.f32 %v764_v56, %v4524_v63  ;;  %v987_v56 = vmax.f32 %v823_v15, %v901_v16 }
 0x19c   :  { %2982 = vmatmul.msk.bf16.gmra.mxu0 %vm664_vm5, %v649_v38  ;;  %v827_v13 = vmax.f32 %v765_v59, 0.0 }
 0x19e   :  { %v906_v4 = vrot.slane %v827_v13, 1 }
 0x1a0   :  { %v907_v54 = vsel %vm236_vm0, %v904_v1, %v906_v4 }
 0x1a1   :  { %v766_v61 = vpop.f32.mrf.mxu0  ;;  %v990_v50 = vmax.f32 %v826_v19, %v907_v54 }
 0x1a2   :  { %v767_v58 = vadd.f32 %v766_v61, %v4524_v63 }
 0x1a3   :  { %v1016_v35 = vpack.c.bf16 %v990_v50, %v989_v27 }
 0x1a4   :  { %v828_v9 = vmax.f32 %v767_v58, 0.0  ;;  %v1015_v58 = vpack.c.bf16 %v988_v32, %v987_v56 }
 0x1a6   :  { %v908_v20 = vrot.slane %v828_v9, 1 }
 0x1a8   :  { %v909_v5 = vsel %vm236_vm0, %v906_v4, %v908_v20 }
 0x1a9   :  { %v769_v17 = vpop.f32.mrf.mxu0  ;;  %v991_v37 = vmax.f32 %v827_v13, %v909_v5 }
 0x1aa   :  { %v770_v21 = vadd.f32 %v769_v17, %v4524_v63 }
 0x1ac   :  { %v829_v24 = vmax.f32 %v770_v21, 0.0  ;;  %2983 = vmatmul.msk.bf16.gmra.mxu0 %vm664_vm5, %v650_v33 }
 0x1ae   :  { %v910_v26 = vrot.slane %v829_v24, 1 }
 0x1b0   :  { %v911_v31 = vsel %vm236_vm0, %v908_v20, %v910_v26 }
 0x1b1   :  { %v771_v7 = vpop.f32.mrf.mxu0  ;;  %v992_v0 = vmax.f32 %v828_v9, %v911_v31 }
 0x1b2   :  { %v772_v42 = vadd.f32 %v771_v7, %v4524_v63 }
 0x1b3   :  { %v1017_v49 = vpack.c.bf16 %v992_v0, %v991_v37 }
 0x1b4   :  { %v830_v51 = vmax.f32 %v772_v42, 0.0 }
 0x1b5   :  { %1224 = vmatpush.bf16.msra.mxu1 %v1017_v49 }
 0x1b6   :  { %v912_v28 = vrot.slane %v830_v51, 1 }
 0x1b8   :  { %v913_v6 = vsel %vm236_vm0, %v910_v26, %v912_v28 }
 0x1b9   :  { %v774_v38 = vpop.f32.mrf.mxu0  ;;  %1225 = vmatpush.bf16.msra.mxu1 %v1016_v35  ;;  %v4656_v57 = vmax.f32 %v829_v24, %v913_v6 }
 0x1ba   :  { %v775_v61 = vadd.f32 %v774_v38, %v4524_v63 }
 0x1bc   :  { %v831_v53 = vmax.f32 %v775_v61, 0.0 }
 0x1bd   :  { %1226 = vmatpush.bf16.msra.mxu1 %v1015_v58 }
 0x1be   :  { %v914_v2 = vrot.slane %v831_v53, 1 }
 0x1c0   :  { %v915_v59 = vsel %vm236_vm0, %v912_v28, %v914_v2 }
 0x1c1   :  { %v776_v62 = vpop.f32.mrf.mxu0  ;;  %1227 = vmatpush.bf16.msra.mxu1 %v1014_v36  ;;  %v4663_v47 = vmax.f32 %v830_v51, %v915_v59 }
 0x1c2   :  { %v777_v29 = vadd.f32 %v776_v62, %v4524_v63 }
 0x1c3   :  { %v1018_v15 = vpack.c.bf16 %v4663_v47, %v4656_v57  ;;  %v3362_v57 = vld [vmem:[%s5425_s6 + $0x50] sm:$0xf0]  ;;  %v3355_v47 = vld [vmem:[%s5425_s6 + $0x1c] sm:$0xf] }
 0x1c4   :  { %v832_v39 = vmax.f32 %v777_v29, 0.0 }
 0x1c5   :  { %1228 = vmatpush.bf16.msra.mxu1 %v1013_v12 }
 0x1c6   :  { %v916_v9 = vrot.slane %v832_v39, 1 }
 0x1c8   :  { %v917_v10 = vsel %vm236_vm0, %v914_v2, %v916_v9 }
 0x1c9   :  { %v779_v13 = vpop.f32.mrf.mxu0  ;;  %1229 = vmatpush.bf16.msra.mxu1 %v1012_v40  ;;  %v4675_v22 = vmax.f32 %v831_v53, %v917_v10 }
 0x1ca   :  { %v780_v45 = vadd.f32 %v779_v13, %v4524_v63 }
 0x1cc   :  { %v833_v36 = vmax.f32 %v780_v45, 0.0 }
 0x1cd   :  { %1230 = vmatpush.bf16.msra.mxu1 %v1011_v14 }
 0x1ce   :  { %v918_v33 = vrot.slane %v833_v36, 1 }
 0x1d0   :  { %v919_v55 = vsel %vm236_vm0, %v916_v9, %v918_v33 }
 0x1d1   :  { %v781_v3 = vpop.f32.mrf.mxu0  ;;  %1231 = vmatpush.bf16.msra.mxu1 %v1010_v46  ;;  %v4685_v12 = vmax.f32 %v832_v39, %v919_v55 }
 0x1d2   :  { %v782_v23 = vadd.f32 %v781_v3, %v4524_v63 }
 0x1d3   :  { %v1019_v34 = vpack.c.bf16 %v4685_v12, %v4675_v22  ;;  %v3360_v22 = vld [vmem:[%s5425_s6 + $0x40] sm:$0xf0] }
 0x1d4   :  { %v834_v40 = vmax.f32 %v782_v23, 0.0 }
 0x1d6   :  { %v920_v17 = vrot.slane %v834_v40, 1 }
 0x1d8   :  { %v921_v8 = vsel %vm236_vm0, %v918_v33, %v920_v17 }
 0x1d9   :  { %v784_v44 = vpop.f32.mrf.mxu0  ;;  %v4691_v14 = vmax.f32 %v833_v36, %v921_v8 }
 0x1da   :  { %v785_v18 = vadd.f32 %v784_v44, %v4524_v63 }
 0x1dc   :  { %v835_v19 = vmax.f32 %v785_v18, 0.0  ;;  %v2986_v18 = vld [vmem:[%s5425_s6] sm:$0xf] }
 0x1de   :  { %v922_v20 = vrot.slane %v835_v19, 1 }
 0x1e0   :  { %v923_v30 = vsel %vm236_vm0, %v920_v17, %v922_v20 }
 0x1e1   :  { %v786_v41 = vpop.f32.mrf.mxu0  ;;  %v4695_v46 = vmax.f32 %v834_v40, %v923_v30 }
 0x1e2   :  { %v787_v21 = vadd.f32 %v786_v41, %v4524_v63 }
 0x1e3   :  { %v1020_v48 = vpack.c.bf16 %v4695_v46, %v4691_v14  ;;  %v2988_v14 = vld [vmem:[%s5425_s6 + $0xc] sm:$0xf0] }
 0x1e4   :  { %v836_v4 = vmax.f32 %v787_v21, 0.0  ;;  %v4007_v21 = vmov 0  }
 0x1e6   :  { %v924_v24 = vrot.slane %v836_v4, 1 }
 0x1e8   :  { %v925_v25 = vsel %vm236_vm0, %v922_v20, %v924_v24 }
 0x1e9   :  { %v789_v1 = vpop.f32.mrf.mxu0  ;;  %v4701_v26 = vmax.f32 %v835_v19, %v925_v25  ;;  %v3353_v19 = vld [vmem:[%s5425_s6 + $0x8] sm:$0xf0] }
 0x1ea   :  { %v790_v5 = vadd.f32 %v789_v1, %v4524_v63  ;;  %v2987_v41 = vor.u32 %v3353_v19, %v2986_v18 }
 0x1ec   :  { %v837_v60 = vmax.f32 %v790_v5, 0.0  ;;  %1232 = vmatmul.bf16.vlgmr.msra.gmra.mxu1 %v2987_v41  ;;  %v3058_v41 = vld [vmem:[%s5425_s6 + $0x90] sm:$0xf] }
 0x1ee   :  { %v926_v31 = vrot.slane %v837_v60, 1 }
 0x1f0   :  { %v927_v54 = vsel %vm236_vm0, %v924_v24, %v926_v31 }
 0x1f1   :  { %v791_v7 = vpop.f32.mrf.mxu0  ;;  %v4705_v37 = vmax.f32 %v836_v4, %v927_v54  ;;  %v4732_v4 = vsel %vm716_vm2, 65535, %v4007_v21  ;;  %v2994_v54 = vld [vmem:[%s5425_s6 + $0x8] sm:$0xf]  ;;  %v3371_v21 = vld [vmem:[%s5425_s6 + $0x98] sm:$0xf0]  ;;  %vm2780_vm2 = vcmask 121856  }
 0x1f2   :  { %v792_v0 = vadd.f32 %v791_v7, %v4524_v63  ;;  %v3354_v7 = vld [vmem:[%s5425_s6 + $0x10] sm:$0xf0] }
 0x1f3   :  { %v1021_v11 = vpack.c.bf16 %v4705_v37, %v4701_v26  ;;  %v3352_v26 = vld [vmem:[%s5425_s6 + $0x4] sm:$0xf]  ;;  %v3018_v37 = vld [vmem:[%s5425_s6 + $0x38] sm:$0xf] }
 0x1f4   :  { %v838_v42 = vmax.f32 %v792_v0, 0.0  ;;  %v3019_v12 = vor.u32 %v3360_v22, %v3018_v37 }
 0x1f6   :  { %v928_v43 = vrot.slane %v838_v42, 1 }
 0x1f8   :  { %v929_v49 = vsel %vm236_vm0, %v926_v31, %v928_v43 }
 0x1f9   :  { %v794_v50 = vpop.f32.mrf.mxu0  ;;  %v4711_v51 = vmax.f32 %v837_v60, %v929_v49 }
 0x1fa   :  { %v795_v52 = vadd.f32 %v794_v50, %v4524_v63 }
 0x1fc   :  { %v839_v27 = vmax.f32 %v795_v52, 0.0 }
 0x1fe   :  { %v930_v28 = vrot.slane %v839_v27, 1 }
 0x200   :  { %v931_v16 = vsel %vm236_vm0, %v928_v43, %v930_v28 }
 0x201   :  { %v796_v35 = vpop.f32.mrf.mxu0  ;;  %v1002_v32 = vmax.f32 %v838_v42, %v931_v16 }
 0x202   :  { %v797_v10 = vadd.f32 %v796_v35, %v4524_v63 }
 0x203   :  { %v1022_v6 = vpack.c.bf16 %v1002_v32, %v4711_v51  ;;  %v2995_v51 = vor.u32 %v3354_v7, %v2994_v54  ;;  %v3070_v7 = vld [vmem:[%s5425_s6 + $0xa8] sm:$0xf] }
 0x204   :  { %v840_v23 = vmax.f32 %v797_v10, 0.0  ;;  %v3365_v10 = vld [vmem:[%s5425_s6 + $0x68] sm:$0xf0] }
 0x206   :  { %v932_v5 = vrot.slane %v840_v23, 1 }
 0x208   :  { %v933_v52 = vsel %vm236_vm0, %v930_v28, %v932_v5  ;;  %v3006_v28 = vld [vmem:[%s5425_s6 + $0x20] sm:$0xf] }
 0x209   :  { %v799_v38 = vpop.f32.mrf.mxu0  ;;  %v1003_v32 = vmax.f32 %v839_v27, %v933_v52  ;;  %v3357_v27 = vld [vmem:[%s5425_s6 + $0x28] sm:$0xf0]  ;;  %v3375_v52 = vld [vmem:[%s5425_s6 + $0xb8] sm:$0xf0] }
 0x20a   :  { %v800_v29 = vadd.f32 %v799_v38, %v4524_v63 }
 0x20c   :  { %v841_v33 = vmax.f32 %v800_v29, 0.0  ;;  %v3363_v29 = vld [vmem:[%s5425_s6 + $0x58] sm:$0xf0] }
 0x20e   :  { %v934_v44 = vrot.slane %v841_v33, 1 }
 0x210   :  { %v935_v49 = vsel %vm236_vm0, %v932_v5, %v934_v44 }
 0x211   :  { %v801_v56 = vpop.f32.mrf.mxu0  ;;  %v1004_v35 = vmax.f32 %v840_v23, %v935_v49 }
 0x212   :  { %v802_v59 = vadd.f32 %v801_v56, %v4524_v63  ;;  %v2998_v56 = vld [vmem:[%s5425_s6 + $0x18] sm:$0xf] }
 0x213   :  { %v1023_v38 = vpack.c.bf16 %v1004_v35, %v1003_v32  ;;  %v1059_v35 = vld [vmem:[%s5425_s6 + $0xc0] sm:$0x33] }
 0x214   :  { %v842_v13 = vmax.f32 %v802_v59, 0.0  ;;  %v1143_v32 = vunpack.c.l.b16 %v1059_v35 }
 0x216   :  { %v936_v40 = vrot.slane %v842_v13, 1 }
 0x218   :  { %v937_v31 = vsel %vm236_vm0, %v934_v44, %v936_v40  ;;  %v3024_v44 = vld [vmem:[%s5425_s6 + $0x54] sm:$0xf0] }
 0x219   :  { %v804_v61 = vpop.f32.mrf.mxu0  ;;  %v1005_v50 = vmax.f32 %v841_v33, %v937_v31  ;;  %v3372_v31 = vld [vmem:[%s5425_s6 + $0xa0] sm:$0xf0] }
 0x21a   :  { %v805_v2 = vadd.f32 %v804_v61, %v4524_v63  ;;  %v3356_v61 = vld [vmem:[%s5425_s6 + $0x20] sm:$0xf0] }
 0x21c   :  { %v843_v39 = vmax.f32 %v805_v2, 0.0  ;;  %v3359_v2 = vld [vmem:[%s5425_s6 + $0x38] sm:$0xf0] }
 0x21e   :  { %v938_v55 = vrot.slane %v843_v39, 1 }
 0x220   :  { %v939_v30 = vsel %vm236_vm0, %v936_v40, %v938_v55  ;;  %v3046_v40 = vld [vmem:[%s5425_s6 + $0x78] sm:$0xf] }
 0x221   :  { %v806_v58 = vpop.f32.mrf.mxu0  ;;  %v1006_v42 = vmax.f32 %v842_v13, %v939_v30  ;;  %v3358_v13 = vld [vmem:[%s5425_s6 + $0x34] sm:$0xf] }
 0x222   :  { %v807_v53 = vadd.f32 %v806_v58, %v4524_v63  ;;  %v2999_v58 = vor.u32 %v3356_v61, %v2998_v56  ;;  %v3060_v56 = vld [vmem:[%s5425_s6 + $0x9c] sm:$0xf0]  ;;  %v1060_v61 = vld [vmem:[%s5425_s6 + $0xc8] sm:$0x3] }
 0x223   :  { %v1024_v16 = vpack.c.bf16 %v1006_v42, %v1005_v50  ;;  %v3367_v42 = vld [vmem:[%s5425_s6 + $0x7c] sm:$0xf] }
 0x224   :  { %v844_v62 = vmax.f32 %v807_v53, 0.0  ;;  %1237 = vmatmul.bf16.gmra.mxu1 %v2999_v58  ;;  %v3007_v53 = vor.u32 %v3357_v27, %v3006_v28  ;;  %v1170_v58 = vpack.c.b16 %v1143_v32, %v1143_v32 }
 0x226   :  { %v940_v45 = vrot.slane %v844_v62, 1 }
 0x228   :  { %v941_v8 = vsel %vm236_vm0, %v938_v55, %v940_v45  ;;  %v3042_v55 = vld [vmem:[%s5425_s6 + $0x68] sm:$0xf] }
 0x229   :  { %v809_v9 = vpop.f32.mrf.mxu0  ;;  %v1007_v25 = vmax.f32 %v843_v39, %v941_v8  ;;  %v3361_v8 = vld [vmem:[%s5425_s6 + $0x4c] sm:$0xf] }
 0x22a   :  { %v810_v36 = vadd.f32 %v809_v9, %v4524_v63  ;;  %v3034_v9 = vld [vmem:[%s5425_s6 + $0x60] sm:$0xf]  ;;  %v3027_v19 = vor.u32 %v3361_v8, %v3024_v44 }
 0x22c   :  { %v845_v3 = vmax.f32 %v810_v36, 0.0  ;;  %v3035_v36 = vor.u32 %v3365_v10, %v3034_v9 }
 0x22e   :  { %v942_v17 = vrot.slane %v845_v3, 1 }
 0x230   :  { %v943_v20 = vsel %vm236_vm0, %v940_v45, %v942_v17  ;;  %v1009_v63 = vmax.f32 %v845_v3, %v942_v17  ;;  %v3012_v45 = vld [vmem:[%s5425_s6 + $0x3c] sm:$0xf0]  ;;  %v3366_v3 = vld [vmem:[%s5425_s6 + $0x70] sm:$0xf0]  ;;  %v3368_v17 = vld [vmem:[%s5425_s6 + $0x80] sm:$0xf0] }
 0x231   :  { %v811_v24 = vpop.f32.mrf.mxu0  ;;  %v1008_v1 = vmax.f32 %v844_v62, %v943_v20  ;;  %v3030_v62 = vld [vmem:[%s5425_s6 + $0x50] sm:$0xf]  ;;  %v3015_v33 = vor.u32 %v3358_v13, %v3012_v45  ;;  %v3043_v23 = vor.u32 %v3366_v3, %v3042_v55  ;;  %v3047_v18 = vor.u32 %v3368_v17, %v3046_v40  ;;  %v3054_v20 = vld [vmem:[%s5425_s6 + $0x80] sm:$0xf] }
 0x232   :  { %v1026_v60 = vpack.c.bf16 %v1009_v63, %v1009_v63  ;;  %v3031_v39 = vor.u32 %v3363_v29, %v3030_v62  ;;  %v3369_v63 = vld [vmem:[%s5425_s6 + $0x88] sm:$0xf0]  ;;  %v3364_v24 = vld [vmem:[%s5425_s6 + $0x64] sm:$0xf] }
 0x233   :  { %v1025_v0 = vpack.c.bf16 %v1008_v1, %v1007_v25  ;;  %v3055_v30 = vor.u32 %v3369_v63, %v3054_v20  ;;  %v3036_v25 = vld [vmem:[%s5425_s6 + $0x6c] sm:$0xf0]  ;;  %v3059_v1 = vor.u32 %v3371_v21, %v3058_v41 }
 0x234   :  { %v1222_v43 = vand.u32 %v4732_v4, %v1026_v60  ;;  %v3039_v5 = vor.u32 %v3364_v24, %v3036_v25  ;;  %v3066_v60 = vld [vmem:[%s5425_s6 + $0x98] sm:$0xf] }
 0x235   :  { %1277 = vmatpush.bf16.msra.mxu2 %v1025_v0  ;;  %v3067_v54 = vor.u32 %v3372_v31, %v3066_v60  ;;  %v3374_v0 = vld [vmem:[%s5425_s6 + $0xb0] sm:$0xf0] }
 0x236   :  { %1337 = vmatpush.bf16.msra.mxu3 %v1222_v43  ;;  %v3048_v43 = vld [vmem:[%s5425_s6 + $0x84] sm:$0xf0]  ;;  %v3071_v49 = vor.u32 %v3374_v0, %v3070_v7 }
 0x237   :  { %v3051_v50 = vor.u32 %v3367_v42, %v3048_v43 }
 0x239   :  { %1278 = vmatpush.bf16.msra.mxu2 %v1024_v16  ;;  %3080 = vmatmul.msk.bf16.vlgmr.msra.gmra.mxu3 %vm1191_vm6, %v2995_v51  ;;  %v3078_v51 = vld [vmem:[%s5425_s6 + $0xb0] sm:$0xf] }
 0x23a   :  { %v3079_v16 = vor.u32 %v3375_v52, %v3078_v51 }
 0x23d   :  { %1279 = vmatpush.bf16.msra.mxu2 %v1023_v38  ;;  %v3370_v38 = vld [vmem:[%s5425_s6 + $0x94] sm:$0xf] }
 0x23e   :  { %v3063_v27 = vor.u32 %v3370_v38, %v3060_v56 }
 0x241   :  { %1280 = vmatpush.bf16.msra.mxu2 %v1022_v6  ;;  %v3010_v6 = vld [vmem:[%s5425_s6 + $0x30] sm:$0xf] }
 0x242   :  { %v3011_v46 = vor.u32 %v3359_v2, %v3010_v6 }
 0x244   :  { %1242 = vmatmul.bf16.gmra.mxu1 %v3011_v46  ;;  %v3072_v46 = vld [vmem:[%s5425_s6 + $0xb4] sm:$0xf0] }
 0x245   :  { %1281 = vmatpush.bf16.msra.mxu2 %v1021_v11 }
 0x249   :  { %1282 = vmatpush.bf16.msra.mxu2 %v1020_v48  ;;  %3081 = vmatmul.msk.bf16.gmra.mxu3 %vm1191_vm6, %v3007_v53  ;;  %v2991_v48 = vor.u32 %v3352_v26, %v2988_v14  ;;  %v1145_v53 = vunpack.c.l.b16 %v1060_v61  ;;  %v3373_v14 = vld [vmem:[%s5425_s6 + $0xac] sm:$0xf] }
 0x24a   :  { %v3075_v37 = vor.u32 %v3373_v14, %v3072_v46 }
 0x24b   :  { %v1172_v6 = vpack.c.b16 %v1145_v53, %v1145_v53 }
 0x24d   :  { %1283 = vmatpush.bf16.msra.mxu2 %v1019_v34  ;;  %v3022_v34 = vld [vmem:[%s5425_s6 + $0x48] sm:$0xf] }
 0x24e   :  { %v3023_v11 = vor.u32 %v3362_v57, %v3022_v34  ;;  %v1144_v34 = vunpack.c.h.b16 %v1059_v35 }
 0x251   :  { %1284 = vmatpush.bf16.msra.mxu2 %v1018_v15  ;;  %v3000_v15 = vld [vmem:[%s5425_s6 + $0x24] sm:$0xf0]  ;;  %s4008_s6 = smov 32  }
 0x252   :  { %v3003_v59 = vor.u32 %v3355_v47, %v3000_v15  ;;  %v1171_v15 = vpack.c.b16 %v1144_v34, %v1144_v34 }
 0x254   :  { %1285 = vmatmul.bf16.vlgmr.msra.gmra.mxu2 %v2991_v48  ;;  %1247 = vmatmul.bf16.gmra.mxu1 %v3023_v11 }
 0x259   :  { %3082 = vmatmul.msk.bf16.gmra.mxu3 %vm1191_vm6, %v3019_v12 }
 0x264   :  { %1290 = vmatmul.bf16.gmra.mxu2 %v3003_v59  ;;  %1252 = vmatmul.bf16.gmra.mxu1 %v3035_v36 }
 0x269   :  { %3083 = vmatmul.msk.bf16.gmra.mxu3 %vm1191_vm6, %v3031_v39  ;;  %v1233_v28 = vpop.f32.mrf.mxu1 }
 0x271   :  { %v1235_v2 = vpop.f32.mrf.mxu1 }
 0x274   :  { %1295 = vmatmul.bf16.gmra.mxu2 %v3015_v33  ;;  %1257 = vmatmul.bf16.gmra.mxu1 %v3047_v18 }
 0x279   :  { %3084 = vmatmul.msk.bf16.gmra.mxu3 %vm1191_vm6, %v3043_v23 }
 0x284   :  { %1300 = vmatmul.bf16.gmra.mxu2 %v3027_v19  ;;  %1262 = vmatmul.bf16.gmra.mxu1 %v3059_v1 }
 0x289   :  { %3085 = vmatmul.msk.bf16.gmra.mxu3 %vm1191_vm6, %v3055_v30 }
 0x294   :  { %1305 = vmatmul.bf16.gmra.mxu2 %v3039_v5  ;;  %1267 = vmatmul.bf16.gmra.mxu1 %v3071_v49 }
 0x299   :  { %3086 = vmatmul.msk.bf16.gmra.mxu3 %vm1191_vm6, %v3067_v54 }
 0x2a1   :  { %v1238_v48 = vpop.f32.mrf.mxu1 }
 0x2a4   :  { %1310 = vmatmul.bf16.gmra.mxu2 %v3051_v50  ;;  %1272 = vmatmul.bf16.gmra.mxu1 %v1170_v58 }
 0x2a9   :  { %3087 = vmatmul.msk.bf16.gmra.mxu3 %vm1191_vm6, %v3079_v16  ;;  %v1240_v12 = vpop.f32.mrf.mxu1 }
 0x2b4   :  { %1315 = vmatmul.bf16.gmra.mxu2 %v3063_v27 }
 0x2b9   :  { %3088 = vmatmul.msk.bf16.gmra.mxu3 %vm1191_vm6, %v1172_v6 }
 0x2bc   :  { %v1339_v26 = vpop.f32.mrf.mxu3 }
 0x2c1   :  { %v1243_v47 = vpop.f32.mrf.mxu1 }
 0x2c4   :  { %1320 = vmatmul.bf16.gmra.mxu2 %v3075_v37  ;;  %v1341_v22 = vpop.f32.mrf.mxu3 }
 0x2c9   :  { %v1245_v62 = vpop.f32.mrf.mxu1 }
 0x2cc   :  { %v1344_v57 = vpop.f32.mrf.mxu3 }
 0x2d1   :  { %v1248_v9 = vpop.f32.mrf.mxu1 }
 0x2d4   :  { %1325 = vmatmul.bf16.gmra.mxu2 %v1171_v15  ;;  %v1346_v11 = vpop.f32.mrf.mxu3 }
 0x2d7   :  { %v1286_v59 = vpop.f32.mrf.mxu2 }
 0x2d8   :  { %v1287_v13 = vadd.f32 %v1286_v59, %v1233_v28 }
 0x2d9   :  { %v4905_v55 = vpop.f32.mrf.mxu1 }
 0x2da   :  { %v4907_v3 = vadd.f32 %v1339_v26, %v1287_v13 }
 0x2dc   :  { %v1349_v29 = vpop.f32.mrf.mxu3  ;;  %v1400_v44 = vrot.slane %v4907_v3, 1  ;;  %v1484_v18 = vrot.slane %v4907_v3, 2 }
 0x2df   :  { %v1288_v39 = vpop.f32.mrf.mxu2 }
 0x2e0   :  { %v1289_v10 = vadd.f32 %v1288_v39, %v1235_v2 }
 0x2e1   :  { %v1253_v60 = vpop.f32.mrf.mxu1 }
 0x2e2   :  { %v4903_v36 = vadd.f32 %v1341_v22, %v1289_v10 }
 0x2e4   :  { %v1351_v45 = vpop.f32.mrf.mxu3  ;;  %v1401_v40 = vrot.slane %v4903_v36, 1  ;;  %v1485_v17 = vrot.slane %v4903_v36, 2 }
 0x2e6   :  { %v1486_v30 = vsel %vm401_vm1, %v1484_v18, %v1485_v17  ;;  %v1402_v21 = vsel %vm236_vm0, %v1400_v44, %v1401_v40 }
 0x2e7   :  { %v1291_v33 = vpop.f32.mrf.mxu2 }
 0x2e8   :  { %v1292_v23 = vadd.f32 %v1291_v33, %v1238_v48 }
 0x2e9   :  { %v1255_v42 = vpop.f32.mrf.mxu1 }
 0x2ea   :  { %v4911_v8 = vadd.f32 %v1344_v57, %v1292_v23 }
 0x2ec   :  { %v1403_v19 = vrot.slane %v4911_v8, 1  ;;  %v1487_v20 = vrot.slane %v4911_v8, 2  ;;  %v1354_v63 = vpop.f32.mrf.mxu3 }
 0x2ee   :  { %v1488_v41 = vsel %vm401_vm1, %v1485_v17, %v1487_v20  ;;  %v1404_v24 = vsel %vm236_vm0, %v1401_v40, %v1403_v19 }
 0x2ef   :  { %v1293_v25 = vpop.f32.mrf.mxu2  ;;  %v3618_v1 = vpack.i.bf16 %v1488_v41, %v1486_v30  ;;  %v3613_v5 = vpack.i.bf16 %v1404_v24, %v1402_v21 }
 0x2f0   :  { %v1294_v31 = vadd.f32 %v1293_v25, %v1240_v12 }
 0x2f1   :  { %3619 = vrot.lane.b32.xlu2 %v3618_v1, %s4008_s6  ;;  %3614 = vrot.lane.b32.xlu1 %v3613_v5, %s4009_s0  ;;  %v1258_v53 = vpop.f32.mrf.mxu1 }
 0x2f2   :  { %v4923_v7 = vadd.f32 %v1346_v11, %v1294_v31 }
 0x2f4   :  { %v1356_v54 = vpop.f32.mrf.mxu3  ;;  %v1405_v49 = vrot.slane %v4923_v7, 1  ;;  %v1489_v50 = vrot.slane %v4923_v7, 2 }
 0x2f6   :  { %v1490_v32 = vsel %vm401_vm1, %v1487_v20, %v1489_v50  ;;  %v1406_v56 = vsel %vm236_vm0, %v1403_v19, %v1405_v49 }
 0x2f7   :  { %v1296_v0 = vpop.f32.mrf.mxu2 }
 0x2f8   :  { %v1297_v43 = vadd.f32 %v1296_v0, %v1243_v47 }
 0x2f9   :  { %v1260_v46 = vpop.f32.mrf.mxu1 }
 0x2fa   :  { %v4927_v51 = vadd.f32 %v1349_v29, %v1297_v43 }
 0x2fc   :  { %v1407_v52 = vrot.slane %v4927_v51, 1  ;;  %v1491_v16 = vrot.slane %v4927_v51, 2  ;;  %v1359_v35 = vpop.f32.mrf.mxu3 }
 0x2fe   :  { %v1492_v38 = vsel %vm401_vm1, %v1489_v50, %v1491_v16  ;;  %v1408_v61 = vsel %vm236_vm0, %v1405_v49, %v1407_v52 }
 0x2ff   :  { %v1298_v58 = vpop.f32.mrf.mxu2  ;;  %v3628_v28 = vpack.i.bf16 %v1492_v38, %v1490_v32  ;;  %v3623_v27 = vpack.i.bf16 %v1408_v61, %v1406_v56 }
 0x300   :  { %v1299_v6 = vadd.f32 %v1298_v58, %v1245_v62 }
 0x301   :  { %3629 = vrot.lane.b32.xlu1 %v3628_v28, %s4008_s6  ;;  %3624 = vrot.lane.b32.xlu0 %v3623_v27, %s4009_s0  ;;  %v1263_v10 = vpop.f32.mrf.mxu1 }
 0x302   :  { %v4937_v26 = vadd.f32 %v1351_v45, %v1299_v6 }
 0x304   :  { %v1361_v2 = vpop.f32.mrf.mxu3  ;;  %v1409_v37 = vrot.slane %v4937_v26, 1  ;;  %v1493_v22 = vrot.slane %v4937_v26, 2 }
 0x306   :  { %v1494_v15 = vsel %vm401_vm1, %v1491_v16, %v1493_v22  ;;  %v1410_v59 = vsel %vm236_vm0, %v1407_v52, %v1409_v37 }
 0x307   :  { %v1301_v14 = vpop.f32.mrf.mxu2 }
 0x308   :  { %v1302_v48 = vadd.f32 %v1301_v14, %v1248_v9 }
 0x309   :  { %v4954_v40 = vpop.f32.mrf.mxu1 }
 0x30a   :  { %v4941_v12 = vadd.f32 %v1354_v63, %v1302_v48 }
 0x30c   :  { %v1411_v34 = vrot.slane %v4941_v12, 1  ;;  %v1495_v57 = vrot.slane %v4941_v12, 2  ;;  %v1364_v47 = vpop.f32.mrf.mxu3 }
 0x30e   :  { %v1496_v11 = vsel %vm401_vm1, %v1493_v22, %v1495_v57  ;;  %v1412_v62 = vsel %vm236_vm0, %v1409_v37, %v1411_v34 }
 0x30f   :  { %v1303_v29 = vpop.f32.mrf.mxu2  ;;  %v3638_v39 = vpack.i.bf16 %v1496_v11, %v1494_v15  ;;  %v3633_v9 = vpack.i.bf16 %v1412_v62, %v1410_v59 }
 0x310   :  { %v1304_v13 = vadd.f32 %v1303_v29, %v4905_v55 }
 0x311   :  { %3639 = vrot.lane.b32.xlu0 %v3638_v39, %s4008_s6  ;;  %3634 = vrot.lane.b32.xlu2 %v3633_v9, %s4009_s0  ;;  %v3378_v39 = vld [vmem:[#allocation5 + $0x10] sm:$0xff] }
 0x312   :  { %v4952_v33 = vadd.f32 %v1356_v54, %v1304_v13  ;;  %1671 = vmatpush.bf16.msrb.mxu3 %v3378_v39 }
 0x314   :  { %v1366_v45 = vpop.f32.mrf.mxu3  ;;  %v1413_v44 = vrot.slane %v4952_v33, 1  ;;  %v1497_v18 = vrot.slane %v4952_v33, 2 }
 0x316   :  { %v1498_v55 = vsel %vm401_vm1, %v1495_v57, %v1497_v18  ;;  %v1414_v21 = vsel %vm236_vm0, %v1411_v34, %v1413_v44 }
 0x317   :  { %v1306_v23 = vpop.f32.mrf.mxu2 }
 0x318   :  { %v1307_v17 = vadd.f32 %v1306_v23, %v1253_v60  ;;  %v1268_v60 = vpop.f32.mrf.mxu1 }
 0x31a   :  { %v4958_v19 = vadd.f32 %v1359_v35, %v1307_v17 }
 0x31c   :  { %v1415_v20 = vrot.slane %v4958_v19, 1  ;;  %v1499_v63 = vrot.slane %v4958_v19, 2  ;;  %v1369_v30 = vpop.f32.mrf.mxu3 }
 0x31e   :  { %v1500_v41 = vsel %vm401_vm1, %v1497_v18, %v1499_v63  ;;  %v1416_v24 = vsel %vm236_vm0, %v1413_v44, %v1415_v20  ;;  %v3377_v44 = vld [vmem:[#allocation5 + $0x8] sm:$0xff] }
 0x31f   :  { %v1308_v25 = vpop.f32.mrf.mxu2  ;;  %v3648_v1 = vpack.i.bf16 %v1500_v41, %v1498_v55  ;;  %v3643_v5 = vpack.i.bf16 %v1416_v24, %v1414_v21  ;;  %1672 = vmatpush.bf16.msrb.mxu3 %v3377_v44 }
 0x320   :  { %v1309_v31 = vadd.f32 %v1308_v25, %v1255_v42  ;;  %v4970_v49 = vpop.f32.mrf.mxu1 }
 0x321   :  { %3649 = vrot.lane.b32.xlu2 %v3648_v1, %s4008_s6  ;;  %3644 = vrot.lane.b32.xlu1 %v3643_v5, %s4009_s0 }
 0x322   :  { %v4968_v0 = vadd.f32 %v1361_v2, %v1309_v31 }
 0x324   :  { %v1371_v54 = vpop.f32.mrf.mxu3  ;;  %v1417_v52 = vrot.slane %v4968_v0, 1  ;;  %v1501_v16 = vrot.slane %v4968_v0, 2 }
 0x326   :  { %v1502_v42 = vsel %vm401_vm1, %v1499_v63, %v1501_v16  ;;  %v1418_v58 = vsel %vm236_vm0, %v1415_v20, %v1417_v52  ;;  %v3376_v63 = vld [vmem:[#allocation5] sm:$0xff] }
 0x327   :  { %v1311_v43 = vpop.f32.mrf.mxu2  ;;  %1673 = vmatpush.bf16.msrb.mxu3 %v3376_v63 }
 0x328   :  { %v1312_v50 = vadd.f32 %v1311_v43, %v1258_v53  ;;  %v1273_v2 = vpop.f32.mrf.mxu1 }
 0x32a   :  { %v4974_v35 = vadd.f32 %v1364_v47, %v1312_v50 }
 0x32c   :  { %v1419_v32 = vrot.slane %v4974_v35, 1  ;;  %v1503_v38 = vrot.slane %v4974_v35, 2  ;;  %v1374_v56 = vpop.f32.mrf.mxu3 }
 0x32e   :  { %v1504_v61 = vsel %vm401_vm1, %v1501_v16, %v1503_v38  ;;  %v1420_v28 = vsel %vm236_vm0, %v1417_v52, %v1419_v32 }
 0x32f   :  { %v1313_v27 = vpop.f32.mrf.mxu2  ;;  %v3658_v53 = vpack.i.bf16 %v1504_v61, %v1502_v42  ;;  %v3653_v6 = vpack.i.bf16 %v1420_v28, %v1418_v58 }
 0x330   :  { %v1314_v14 = vadd.f32 %v1313_v27, %v1260_v46  ;;  %v1275_v34 = vpop.f32.mrf.mxu1 }
 0x331   :  { %3659 = vrot.lane.b32.xlu1 %v3658_v53, %s4008_s6  ;;  %3654 = vrot.lane.b32.xlu0 %v3653_v6, %s4009_s0 }
 0x332   :  { %v4984_v37 = vadd.f32 %v1366_v45, %v1314_v14 }
 0x334   :  { %v1376_v48 = vpop.f32.mrf.mxu3  ;;  %v1421_v47 = vrot.slane %v4984_v37, 1  ;;  %v1505_v15 = vrot.slane %v4984_v37, 2 }
 0x336   :  { %v1506_v46 = vsel %vm401_vm1, %v1503_v38, %v1505_v15  ;;  %v1422_v13 = vsel %vm236_vm0, %v1419_v32, %v1421_v47 }
 0x337   :  { %v1316_v22 = vpop.f32.mrf.mxu2 }
 0x338   :  { %v1317_v57 = vadd.f32 %v1316_v22, %v1263_v10 }
 0x33a   :  { %v4988_v11 = vadd.f32 %v1369_v30, %v1317_v57 }
 0x33c   :  { %v1423_v59 = vrot.slane %v4988_v11, 1  ;;  %v1507_v62 = vrot.slane %v4988_v11, 2  ;;  %v1379_v29 = vpop.f32.mrf.mxu3 }
 0x33e   :  { %v1508_v9 = vsel %vm401_vm1, %v1505_v15, %v1507_v62  ;;  %v1424_v10 = vsel %vm236_vm0, %v1421_v47, %v1423_v59 }
 0x33f   :  { %v1318_v45 = vpop.f32.mrf.mxu2  ;;  %v3668_v23 = vpack.i.bf16 %v1508_v9, %v1506_v46  ;;  %v3663_v17 = vpack.i.bf16 %v1424_v10, %v1422_v13 }
 0x340   :  { %v1319_v18 = vadd.f32 %v1318_v45, %v4954_v40 }
 0x341   :  { %3669 = vrot.lane.b32.xlu0 %v3668_v23, %s4008_s6  ;;  %3664 = vrot.lane.b32.xlu2 %v3663_v17, %s4009_s0 }
 0x342   :  { %v4999_v30 = vadd.f32 %v1371_v54, %v1319_v18 }
 0x344   :  { %v1381_v20 = vpop.f32.mrf.mxu3  ;;  %v1425_v21 = vrot.slane %v4999_v30, 1  ;;  %v1509_v24 = vrot.slane %v4999_v30, 2 }
 0x346   :  { %v1510_v40 = vsel %vm401_vm1, %v1507_v62, %v1509_v24  ;;  %v1426_v54 = vsel %vm236_vm0, %v1423_v59, %v1425_v21 }
 0x347   :  { %v1321_v55 = vpop.f32.mrf.mxu2 }
 0x348   :  { %v1322_v41 = vadd.f32 %v1321_v55, %v1268_v60 }
 0x34a   :  { %v5003_v25 = vadd.f32 %v1374_v56, %v1322_v41 }
 0x34b   :  { %v3620_v34 = vpop.permute.xlu2 %3619 }
 0x34c   :  { %v1427_v1 = vrot.slane %v5003_v25, 1  ;;  %v1511_v5 = vrot.slane %v5003_v25, 2  ;;  %v3622_v59 = vunpack.i.h.bf16 %v3620_v34  ;;  %v3621_v62 = vunpack.i.l.bf16 %v3620_v34 }
 0x34e   :  { %v1512_v31 = vsel %vm401_vm1, %v1509_v24, %v1511_v5  ;;  %v1428_v43 = vsel %vm236_vm0, %v1425_v21, %v1427_v1 }
 0x34f   :  { %v1323_v50 = vpop.f32.mrf.mxu2  ;;  %v3678_v60 = vpack.i.bf16 %v1512_v31, %v1510_v40  ;;  %v3673_v52 = vpack.i.bf16 %v1428_v43, %v1426_v54 }
 0x350   :  { %v1324_v16 = vadd.f32 %v1323_v50, %v4970_v49 }
 0x351   :  { %3679 = vrot.lane.b32.xlu2 %v3678_v60, %s4008_s6  ;;  %3674 = vrot.lane.b32.xlu1 %v3673_v52, %s4009_s0 }
 0x352   :  { %v5014_v32 = vadd.f32 %v1376_v48, %v1324_v16 }
 0x354   :  { %v1429_v42 = vrot.slane %v5014_v32, 1  ;;  %v1513_v61 = vrot.slane %v5014_v32, 2 }
 0x356   :  { %v1514_v53 = vsel %vm401_vm1, %v1511_v5, %v1513_v61  ;;  %v1430_v6 = vsel %vm236_vm0, %v1427_v1, %v1429_v42 }
 0x357   :  { %v1326_v38 = vpop.f32.mrf.mxu2 }
 0x358   :  { %v1327_v56 = vadd.f32 %v1326_v38, %v1273_v2 }
 0x35a   :  { %v5018_v58 = vadd.f32 %v1379_v29, %v1327_v56 }
 0x35c   :  { %v1515_v28 = vrot.slane %v5018_v58, 2  ;;  %v1431_v27 = vrot.slane %v5018_v58, 1 }
 0x35e   :  { %1465 = vrot.lane.b32.xlu2 %v1431_v27, %s4009_s0  ;;  %v1516_v49 = vsel %vm401_vm1, %v1513_v61, %v1515_v28  ;;  %v1432_v2 = vsel %vm236_vm0, %v1429_v42, %v1431_v27 }
 0x35f   :  { %v1328_v14 = vpop.f32.mrf.mxu2  ;;  %v3688_v48 = vpack.i.bf16 %v1516_v49, %v1514_v53  ;;  %v3683_v22 = vpack.i.bf16 %v1432_v2, %v1430_v6 }
 0x361   :  { %3689 = vrot.lane.b32.xlu1 %v3688_v48, %s4008_s6  ;;  %3684 = vrot.lane.b32.xlu0 %v3683_v22, %s4009_s0 }
 0x363   :  { %v3615_v57 = vpop.permute.xlu1 %3614 }
 0x364   :  { %v3617_v47 = vunpack.i.h.bf16 %v3615_v57  ;;  %v3616_v15 = vunpack.i.l.bf16 %v3615_v57 }
 0x366   :  { %v1570_v29 = vsel %vm1568_vm7, %v4903_v36, %v3617_v47  ;;  %v1569_v39 = vsel %vm1568_vm7, %v4907_v3, %v3616_v15 }
 0x367   :  { %v1587_v46 = vsel %vm1586_vm8, %v1569_v39, %v3621_v62  ;;  %v1588_v9 = vsel %vm1586_vm8, %v1570_v29, %v3622_v59 }
 0x368   :  { %v1604_v13 = vpack.c.bf16 %v1588_v9, %v1587_v46 }
 0x369   :  { %1549 = vrot.lane.b32.xlu0 %v1515_v28, %s4008_s6 }
 0x36a   :  { %3101 = vmatmul.msk.bf16.vlgmr.msrb.gmra.mxu3 %vm1638_vm9, %v1604_v13 }
 0x36b   :  { %v3635_v41 = vpop.permute.xlu2 %3634 }
 0x36c   :  { %v3637_v21 = vunpack.i.h.bf16 %v3635_v41  ;;  %v3636_v24 = vunpack.i.l.bf16 %v3635_v41 }
 0x36e   :  { %v1574_v31 = vsel %vm1568_vm7, %v4937_v26, %v3637_v21 }
 0x373   :  { %v3630_v10 = vpop.permute.xlu1 %3629  ;;  %v3625_v45 = vpop.permute.xlu0 %3624 }
 0x374   :  { %v3632_v23 = vunpack.i.h.bf16 %v3630_v10  ;;  %v3631_v17 = vunpack.i.l.bf16 %v3630_v10  ;;  %v3627_v44 = vunpack.i.h.bf16 %v3625_v45  ;;  %v3626_v18 = vunpack.i.l.bf16 %v3625_v45 }
 0x376   :  { %v1572_v36 = vsel %vm1568_vm7, %v4923_v7, %v3627_v44  ;;  %v1571_v3 = vsel %vm1568_vm7, %v4911_v8, %v3626_v18  ;;  %v1573_v7 = vsel %vm1568_vm7, %v4927_v51, %v3636_v24 }
 0x377   :  { %v1589_v20 = vsel %vm1586_vm8, %v1571_v3, %v3631_v17  ;;  %v1590_v63 = vsel %vm1586_vm8, %v1572_v36, %v3632_v23 }
 0x378   :  { %v1605_v55 = vpack.c.bf16 %v1590_v63, %v1589_v20 }
 0x37a   :  { %3102 = vmatmul.msk.bf16.gmra.mxu3 %vm1638_vm9, %v1605_v55 }
 0x37b   :  { %v3650_v50 = vpop.permute.xlu2 %3649 }
 0x37c   :  { %v3652_v38 = vunpack.i.h.bf16 %v3650_v50  ;;  %v3651_v56 = vunpack.i.l.bf16 %v3650_v50  ;;  %v5090_v50 = vld [vmem:[#allocation14] sm:$0xff] }
 0x383   :  { %v3640_v1 = vpop.permute.xlu0 %3639 }
 0x384   :  { %v3642_v5 = vunpack.i.h.bf16 %v3640_v1  ;;  %v3641_v40 = vunpack.i.l.bf16 %v3640_v1 }
 0x386   :  { %v1591_v8 = vsel %vm1586_vm8, %v1573_v7, %v3641_v40  ;;  %v1592_v54 = vsel %vm1586_vm8, %v1574_v31, %v3642_v5 }
 0x387   :  { %v1606_v43 = vpack.c.bf16 %v1592_v54, %v1591_v8 }
 0x38a   :  { %3103 = vmatmul.msk.bf16.gmra.mxu3 %vm1638_vm9, %v1606_v43 }
 0x393   :  { %v3645_v60 = vpop.permute.xlu1 %3644 }
 0x394   :  { %v3647_v52 = vunpack.i.h.bf16 %v3645_v60  ;;  %v3646_v16 = vunpack.i.l.bf16 %v3645_v60 }
 0x396   :  { %v1576_v42 = vsel %vm1568_vm7, %v4952_v33, %v3647_v52  ;;  %v1575_v26 = vsel %vm1568_vm7, %v4941_v12, %v3646_v16 }
 0x397   :  { %v1593_v51 = vsel %vm1586_vm8, %v1575_v26, %v3651_v56  ;;  %v1594_v61 = vsel %vm1586_vm8, %v1576_v42, %v3652_v38 }
 0x398   :  { %v1607_v28 = vpack.c.bf16 %v1594_v61, %v1593_v51 }
 0x39a   :  { %3104 = vmatmul.msk.bf16.gmra.mxu3 %vm1638_vm9, %v1607_v28 }
 0x39b   :  { %v3665_v57 = vpop.permute.xlu2 %3664 }
 0x39c   :  { %v3667_v47 = vunpack.i.h.bf16 %v3665_v57  ;;  %v3666_v15 = vunpack.i.l.bf16 %v3665_v57 }
 0x39e   :  { %v1580_v39 = vsel %vm1568_vm7, %v4984_v37, %v3667_v47 }
 0x3a3   :  { %v3660_v27 = vpop.permute.xlu1 %3659  ;;  %v3655_v53 = vpop.permute.xlu0 %3654 }
 0x3a4   :  { %v3662_v49 = vunpack.i.h.bf16 %v3660_v27  ;;  %v3661_v6 = vunpack.i.l.bf16 %v3660_v27  ;;  %v3657_v2 = vunpack.i.h.bf16 %v3655_v53  ;;  %v3656_v14 = vunpack.i.l.bf16 %v3655_v53 }
 0x3a6   :  { %v1578_v48 = vsel %vm1568_vm7, %v4968_v0, %v3657_v2  ;;  %v1577_v33 = vsel %vm1568_vm7, %v4958_v19, %v3656_v14  ;;  %v1579_v0 = vsel %vm1568_vm7, %v4974_v35, %v3666_v15 }
 0x3a7   :  { %v1595_v12 = vsel %vm1586_vm8, %v1577_v33, %v3661_v6  ;;  %v1596_v22 = vsel %vm1586_vm8, %v1578_v48, %v3662_v49 }
 0x3a8   :  { %v1608_v34 = vpack.c.bf16 %v1596_v22, %v1595_v12 }
 0x3aa   :  { %3105 = vmatmul.msk.bf16.gmra.mxu3 %vm1638_vm9, %v1608_v34 }
 0x3ab   :  { %v3680_v13 = vpop.permute.xlu2 %3679 }
 0x3ac   :  { %v3682_v17 = vunpack.i.h.bf16 %v3680_v13  ;;  %v3681_v44 = vunpack.i.l.bf16 %v3680_v13 }
 0x3b3   :  { %v3670_v59 = vpop.permute.xlu0 %3669 }
 0x3b4   :  { %v3672_v62 = vunpack.i.h.bf16 %v3670_v59  ;;  %v3671_v29 = vunpack.i.l.bf16 %v3670_v59 }
 0x3b6   :  { %v1597_v19 = vsel %vm1586_vm8, %v1579_v0, %v3671_v29  ;;  %v1598_v46 = vsel %vm1586_vm8, %v1580_v39, %v3672_v62 }
 0x3b7   :  { %v1609_v9 = vpack.c.bf16 %v1598_v46, %v1597_v19 }
 0x3b8   :  { %v1466_v31 = vpop.permute.xlu2 %1465 }
 0x3b9   :  { %v1585_v8 = vsel %vm1568_vm7, %v5018_v58, %v1466_v31 }
 0x3ba   :  { %3106 = vmatmul.msk.bf16.gmra.mxu3 %vm1638_vm9, %v1609_v9 }
 0x3c3   :  { %v3675_v10 = vpop.permute.xlu1 %3674 }
 0x3c4   :  { %v3677_v45 = vunpack.i.h.bf16 %v3675_v10  ;;  %v3676_v23 = vunpack.i.l.bf16 %v3675_v10 }
 0x3c6   :  { %v1582_v18 = vsel %vm1568_vm7, %v4999_v30, %v3677_v45  ;;  %v1581_v37 = vsel %vm1568_vm7, %v4988_v11, %v3676_v23 }
 0x3c7   :  { %v1599_v35 = vsel %vm1586_vm8, %v1581_v37, %v3681_v44  ;;  %v1600_v36 = vsel %vm1586_vm8, %v1582_v18, %v3682_v17 }
 0x3c8   :  { %v1610_v3 = vpack.c.bf16 %v1600_v36, %v1599_v35 }
 0x3ca   :  { %3107 = vmatmul.msk.bf16.gmra.mxu3 %vm1638_vm9, %v1610_v3 }
 0x3d3   :  { %v3690_v20 = vpop.permute.xlu1 %3689  ;;  %v3685_v63 = vpop.permute.xlu0 %3684 }
 0x3d4   :  { %v3692_v55 = vunpack.i.h.bf16 %v3690_v20  ;;  %v3691_v41 = vunpack.i.l.bf16 %v3690_v20  ;;  %v3687_v21 = vunpack.i.h.bf16 %v3685_v63  ;;  %v3686_v24 = vunpack.i.l.bf16 %v3685_v63 }
 0x3d6   :  { %v1584_v1 = vsel %vm1568_vm7, %v5014_v32, %v3687_v21  ;;  %v1583_v30 = vsel %vm1568_vm7, %v5003_v25, %v3686_v24  ;;  %v5093_v25 = vperm.slane %v5090_v50, 1 }
 0x3d7   :  { %v1601_v11 = vsel %vm1586_vm8, %v1583_v30, %v3691_v41  ;;  %v1602_v5 = vsel %vm1586_vm8, %v1584_v1, %v3692_v55 }
 0x3d8   :  { %v1611_v40 = vpack.c.bf16 %v1602_v5, %v1601_v11 }
 0x3da   :  { %3108 = vmatmul.msk.bf16.gmra.mxu3 %vm1638_vm9, %v1611_v40 }
 0x3db   :  { %v1550_v7 = vpop.permute.xlu0 %1549 }
 0x3dc   :  { %v1603_v54 = vsel %vm1586_vm8, %v1585_v8, %v1550_v7 }
 0x3dd   :  { %v1612_v43 = vpack.c.bf16 %v1603_v54, %v1603_v54 }
 0x3ea   :  { %3109 = vmatmul.msk.bf16.gmra.mxu3 %vm1638_vm9, %v1612_v43 }
 0x3ed   :  { %v1675_v32 = vpop.f32.mrf.mxu3 }
 0x3ee   :  { %v1676_v60 = vadd.f32 %v1675_v32, %v5093_v25 }
 0x3f0   :  { %v1719_v16 = vmax.f32 %v1676_v60, 0.0 }
 0x3f2   :  { %v1753_v42 = vrot.slane %v1719_v16, 1 }
 0x3f5   :  { %v1677_v52 = vpop.f32.mrf.mxu3 }
 0x3f6   :  { %v1678_v38 = vadd.f32 %v1677_v52, %v5093_v25 }
 0x3f8   :  { %v1720_v56 = vmax.f32 %v1678_v38, 0.0 }
 0x3fa   :  { %v1754_v58 = vrot.slane %v1720_v56, 1 }
 0x3fc   :  { %v1755_v26 = vsel %vm236_vm0, %v1753_v42, %v1754_v58 }
 0x3fd   :  { %v1680_v51 = vpop.f32.mrf.mxu3  ;;  %v5098_v61 = vmax.f32 %v1719_v16, %v1755_v26 }
 0x3fe   :  { %v1681_v28 = vadd.f32 %v1680_v51, %v5093_v25 }
 0x400   :  { %v1721_v27 = vmax.f32 %v1681_v28, 0.0 }
 0x402   :  { %v1756_v53 = vrot.slane %v1721_v27, 1 }
 0x404   :  { %v1757_v49 = vsel %vm236_vm0, %v1754_v58, %v1756_v53 }
 0x405   :  { %v1682_v6 = vpop.f32.mrf.mxu3  ;;  %v5102_v2 = vmax.f32 %v1720_v56, %v1757_v49 }
 0x406   :  { %v1683_v14 = vadd.f32 %v1682_v6, %v5093_v25 }
 0x407   :  { %v1820_v48 = vpack.c.bf16 %v5102_v2, %v5098_v61 }
 0x408   :  { %v1722_v33 = vmax.f32 %v1683_v14, 0.0 }
 0x40a   :  { %v1758_v12 = vrot.slane %v1722_v33, 1 }
 0x40c   :  { %v1759_v22 = vsel %vm236_vm0, %v1756_v53, %v1758_v12 }
 0x40d   :  { %v1685_v34 = vpop.f32.mrf.mxu3  ;;  %v5108_v57 = vmax.f32 %v1721_v27, %v1759_v22 }
 0x40e   :  { %v1686_v47 = vadd.f32 %v1685_v34, %v5093_v25 }
 0x410   :  { %v1723_v15 = vmax.f32 %v1686_v47, 0.0 }
 0x412   :  { %v1760_v59 = vrot.slane %v1723_v15, 1 }
 0x414   :  { %v1761_v62 = vsel %vm236_vm0, %v1758_v12, %v1760_v59 }
 0x415   :  { %v1687_v29 = vpop.f32.mrf.mxu3  ;;  %v5112_v39 = vmax.f32 %v1722_v33, %v1761_v62 }
 0x416   :  { %v1688_v0 = vadd.f32 %v1687_v29, %v5093_v25 }
 0x417   :  { %v1821_v19 = vpack.c.bf16 %v5112_v39, %v5108_v57  ;;  %v3128_v39 = vld [vmem:[#allocation10 + $0x20] sm:$0xf] }
 0x418   :  { %v1724_v46 = vmax.f32 %v1688_v0, 0.0 }
 0x41a   :  { %v1762_v9 = vrot.slane %v1724_v46, 1 }
 0x41c   :  { %v1763_v13 = vsel %vm236_vm0, %v1760_v59, %v1762_v9 }
 0x41d   :  { %v1690_v10 = vpop.f32.mrf.mxu3  ;;  %v5118_v45 = vmax.f32 %v1723_v15, %v1763_v13 }
 0x41e   :  { %v1691_v23 = vadd.f32 %v1690_v10, %v5093_v25 }
 0x420   :  { %v1725_v17 = vmax.f32 %v1691_v23, 0.0 }
 0x422   :  { %v1764_v44 = vrot.slane %v1725_v17, 1 }
 0x424   :  { %v1765_v18 = vsel %vm236_vm0, %v1762_v9, %v1764_v44 }
 0x425   :  { %v1692_v37 = vpop.f32.mrf.mxu3  ;;  %v5122_v35 = vmax.f32 %v1724_v46, %v1765_v18 }
 0x426   :  { %v1693_v36 = vadd.f32 %v1692_v37, %v5093_v25 }
 0x427   :  { %v1822_v3 = vpack.c.bf16 %v5122_v35, %v5118_v45  ;;  %v3120_v45 = vld [vmem:[#allocation10 + $0x10] sm:$0xf]  ;;  %v3382_v35 = vld [vmem:[#allocation10 + $0x14] sm:$0xf0] }
 0x428   :  { %v1726_v20 = vmax.f32 %v1693_v36, 0.0 }
 0x42a   :  { %v1766_v63 = vrot.slane %v1726_v20, 1 }
 0x42c   :  { %v1767_v55 = vsel %vm236_vm0, %v1764_v44, %v1766_v63 }
 0x42d   :  { %v1695_v41 = vpop.f32.mrf.mxu3  ;;  %v5128_v21 = vmax.f32 %v1725_v17, %v1767_v55 }
 0x42e   :  { %v1696_v24 = vadd.f32 %v1695_v41, %v5093_v25 }
 0x430   :  { %v1727_v1 = vmax.f32 %v1696_v24, 0.0  ;;  %v3379_v24 = vld [vmem:[#allocation10 + $0x4] sm:$0xf] }
 0x432   :  { %v1768_v30 = vrot.slane %v1727_v1, 1 }
 0x434   :  { %v1769_v11 = vsel %vm236_vm0, %v1766_v63, %v1768_v30 }
 0x435   :  { %v1697_v5 = vpop.f32.mrf.mxu3  ;;  %v5132_v40 = vmax.f32 %v1726_v20, %v1769_v11 }
 0x436   :  { %v1698_v31 = vadd.f32 %v1697_v5, %v5093_v25 }
 0x437   :  { %v1823_v7 = vpack.c.bf16 %v5132_v40, %v5128_v21  ;;  %v3383_v21 = vld [vmem:[#allocation10 + $0x24] sm:$0xf]  ;;  %v3130_v40 = vld [vmem:[#allocation10 + $0x28] sm:$0xf0] }
 0x438   :  { %v1728_v8 = vmax.f32 %v1698_v31, 0.0 }
 0x43a   :  { %v1770_v54 = vrot.slane %v1728_v8, 1 }
 0x43c   :  { %v1771_v43 = vsel %vm236_vm0, %v1768_v30, %v1770_v54 }
 0x43d   :  { %v1700_v32 = vpop.f32.mrf.mxu3  ;;  %v1811_v60 = vmax.f32 %v1727_v1, %v1771_v43  ;;  %v3114_v1 = vld [vmem:[#allocation10 + $0x8] sm:$0xf0] }
 0x43e   :  { %v1701_v52 = vadd.f32 %v1700_v32, %v5093_v25 }
 0x440   :  { %v1729_v16 = vmax.f32 %v1701_v52, 0.0 }
 0x442   :  { %v1772_v38 = vrot.slane %v1729_v16, 1 }
 0x444   :  { %v1773_v56 = vsel %vm236_vm0, %v1770_v54, %v1772_v38  ;;  %v3117_v54 = vor.u32 %v3379_v24, %v3114_v1 }
 0x445   :  { %v1702_v42 = vpop.f32.mrf.mxu3  ;;  %v1812_v58 = vmax.f32 %v1728_v8, %v1773_v56 }
 0x446   :  { %v1703_v47 = vadd.f32 %v1702_v42, %v5093_v25  ;;  %v3381_v42 = vld [vmem:[#allocation10 + $0x14] sm:$0xf] }
 0x447   :  { %v1824_v26 = vpack.c.bf16 %v1812_v58, %v1811_v60  ;;  %v3122_v58 = vld [vmem:[#allocation10 + $0x18] sm:$0xf0] }
 0x448   :  { %v1730_v9 = vmax.f32 %v1703_v47, 0.0 }
 0x44a   :  { %v1774_v55 = vrot.slane %v1730_v9, 1 }
 0x44c   :  { %v1775_v43 = vsel %vm236_vm0, %v1772_v38, %v1774_v55  ;;  %v3380_v38 = vld [vmem:[#allocation10 + $0x4] sm:$0xf0] }
 0x44d   :  { %v1705_v51 = vpop.f32.mrf.mxu3  ;;  %v1813_v52 = vmax.f32 %v1729_v16, %v1775_v43  ;;  %v3112_v16 = vld [vmem:[#allocation10] sm:$0xf] }
 0x44e   :  { %v1706_v12 = vadd.f32 %v1705_v51, %v5093_v25  ;;  %v3125_v51 = vor.u32 %v3381_v42, %v3122_v58 }
 0x450   :  { %v1731_v29 = vmax.f32 %v1706_v12, 0.0 }
 0x452   :  { %v1776_v17 = vrot.slane %v1731_v29, 1 }
 0x454   :  { %v1777_v31 = vsel %vm236_vm0, %v1774_v55, %v1776_v17 }
 0x455   :  { %v1707_v28 = vpop.f32.mrf.mxu3  ;;  %v1814_v60 = vmax.f32 %v1730_v9, %v1777_v31 }
 0x456   :  { %v1708_v14 = vadd.f32 %v1707_v28, %v5093_v25  ;;  %v3385_v28 = vld [vmem:[#allocation10 + $0x34] sm:$0xf] }
 0x457   :  { %v1825_v56 = vpack.c.bf16 %v1814_v60, %v1813_v52 }
 0x458   :  { %v1732_v15 = vmax.f32 %v1708_v14, 0.0 }
 0x45a   :  { %v1778_v13 = vrot.slane %v1732_v15, 1 }
 0x45d   :  { %v1710_v27 = vpop.f32.mrf.mxu3 }
 0x45e   :  { %v1711_v6 = vadd.f32 %v1710_v27, %v5093_v25  ;;  %v3138_v27 = vld [vmem:[#allocation10 + $0x38] sm:$0xf0] }
 0x45f   :  { %v3141_v57 = vor.u32 %v3385_v28, %v3138_v27 }
 0x460   :  { %v1733_v22 = vmax.f32 %v1711_v6, 0.0  ;;  %v3386_v6 = vld [vmem:[#allocation10 + $0x34] sm:$0xf0] }
 0x462   :  { %v1780_v0 = vrot.slane %v1733_v22, 1 }
 0x464   :  { %v1781_v37 = vsel %vm236_vm0, %v1778_v13, %v1780_v0 }
 0x465   :  { %v1712_v53 = vpop.f32.mrf.mxu3  ;;  %v1816_v11 = vmax.f32 %v1732_v15, %v1781_v37 }
 0x466   :  { %v1713_v49 = vadd.f32 %v1712_v53, %v5093_v25  ;;  %v1837_v53 = vld [vmem:[#allocation10 + $0x40] sm:$0x33] }
 0x467   :  { %v1864_v2 = vunpack.c.h.b16 %v1837_v53 }
 0x468   :  { %v1734_v33 = vmax.f32 %v1713_v49, 0.0  ;;  %v3136_v49 = vld [vmem:[#allocation10 + $0x30] sm:$0xf] }
 0x469   :  { %v3137_v14 = vor.u32 %v3386_v6, %v3136_v49 }
 0x46a   :  { %v1782_v59 = vrot.slane %v1734_v33, 1 }
 0x46c   :  { %v1783_v23 = vsel %vm236_vm0, %v1780_v0, %v1782_v59 }
 0x46d   :  { %v1715_v34 = vpop.f32.mrf.mxu3  ;;  %v1817_v20 = vmax.f32 %v1733_v22, %v1783_v23 }
 0x46e   :  { %v1716_v62 = vadd.f32 %v1715_v34, %v5093_v25  ;;  %v1779_v25 = vsel %vm236_vm0, %v1776_v17, %v1778_v13 }
 0x46f   :  { %v1815_v8 = vmax.f32 %v1731_v29, %v1779_v25 }
 0x470   :  { %v1735_v46 = vmax.f32 %v1716_v62, 0.0 }
 0x471   :  { %v1826_v32 = vpack.c.bf16 %v1816_v11, %v1815_v8 }
 0x472   :  { %v1784_v10 = vrot.slane %v1735_v46, 1 }
 0x474   :  { %v1819_v44 = vmax.f32 %v1735_v46, %v1784_v10  ;;  %v1785_v18 = vsel %vm236_vm0, %v1782_v59, %v1784_v10 }
 0x475   :  { %v1717_v36 = vpop.f32.mrf.mxu3  ;;  %v1818_v63 = vmax.f32 %v1734_v33, %v1785_v18  ;;  %v1863_v33 = vunpack.c.l.b16 %v1837_v53 }
 0x476   :  { %v1828_v41 = vpack.c.bf16 %v1819_v44, %v1819_v44 }
 0x477   :  { %v1827_v30 = vpack.c.bf16 %v1818_v63, %v1817_v20  ;;  %v1873_v12 = vpack.c.b16 %v1863_v33, %v1863_v33 }
 0x478   :  { %v1896_v5 = vand.u32 %v1828_v41, %v4732_v4 }
 0x479   :  { %1898 = vmatpush.bf16.msrb.mxu1 %v1827_v30 }
 0x47a   :  { %1938 = vmatpush.bf16.msrb.mxu2 %v1896_v5 }
 0x47d   :  { %1899 = vmatpush.bf16.msrb.mxu1 %v1826_v32  ;;  %3142 = vmatmul.msk.bf16.vlgmr.msrb.gmra.mxu2 %vm1191_vm6, %v3117_v54 }
 0x481   :  { %1900 = vmatpush.bf16.msrb.mxu1 %v1825_v56 }
 0x485   :  { %1901 = vmatpush.bf16.msrb.mxu1 %v1824_v26  ;;  %v3113_v26 = vor.u32 %v3380_v38, %v3112_v16 }
 0x489   :  { %1902 = vmatpush.bf16.msrb.mxu1 %v1823_v7  ;;  %v3133_v7 = vor.u32 %v3383_v21, %v3130_v40 }
 0x48d   :  { %1903 = vmatpush.bf16.msrb.mxu1 %v1822_v3  ;;  %3143 = vmatmul.msk.bf16.gmra.mxu2 %vm1191_vm6, %v3125_v51  ;;  %v3121_v3 = vor.u32 %v3382_v35, %v3120_v45 }
 0x491   :  { %1904 = vmatpush.bf16.msrb.mxu1 %v1821_v19  ;;  %v3384_v19 = vld [vmem:[#allocation10 + $0x24] sm:$0xf0] }
 0x492   :  { %v3129_v61 = vor.u32 %v3384_v19, %v3128_v39 }
 0x495   :  { %1905 = vmatpush.bf16.msrb.mxu1 %v1820_v48  ;;  %v1874_v48 = vpack.c.b16 %v1864_v2, %v1864_v2 }
 0x498   :  { %1906 = vmatmul.bf16.vlgmr.msrb.gmra.mxu1 %v3113_v26 }
 0x49d   :  { %3144 = vmatmul.msk.bf16.gmra.mxu2 %vm1191_vm6, %v3133_v7 }
 0x4a8   :  { %1911 = vmatmul.bf16.gmra.mxu1 %v3121_v3 }
 0x4ad   :  { %3145 = vmatmul.msk.bf16.gmra.mxu2 %vm1191_vm6, %v3141_v57 }
 0x4b8   :  { %1916 = vmatmul.bf16.gmra.mxu1 %v3129_v61 }
 0x4bd   :  { %3146 = vmatmul.msk.bf16.gmra.mxu2 %vm1191_vm6, %v1874_v48 }
 0x4c8   :  { %1921 = vmatmul.bf16.gmra.mxu1 %v3137_v14 }
 0x4d8   :  { %1926 = vmatmul.bf16.gmra.mxu1 %v1873_v12 }
 0x500   :  { %v1940_v22 = vpop.f32.mrf.mxu2 }
 0x508   :  { %v1942_v34 = vpop.f32.mrf.mxu2 }
 0x510   :  { %v1945_v47 = vpop.f32.mrf.mxu2 }
 0x515   :  { %v1907_v15 = vpop.f32.mrf.mxu1 }
 0x516   :  { %v5172_v46 = vadd.f32 %v1940_v22, %v1907_v15 }
 0x518   :  { %v1947_v59 = vpop.f32.mrf.mxu2  ;;  %v1973_v17 = vrot.slane %v5172_v46, 1  ;;  %v2017_v44 = vrot.slane %v5172_v46, 2 }
 0x51d   :  { %v1909_v62 = vpop.f32.mrf.mxu1 }
 0x51e   :  { %v5170_v0 = vadd.f32 %v1942_v34, %v1909_v62 }
 0x520   :  { %v1950_v29 = vpop.f32.mrf.mxu2  ;;  %v1974_v13 = vrot.slane %v5170_v0, 1  ;;  %v2018_v10 = vrot.slane %v5170_v0, 2 }
 0x522   :  { %v2019_v20 = vsel %vm401_vm1, %v2017_v44, %v2018_v10  ;;  %v1975_v55 = vsel %vm236_vm0, %v1973_v17, %v1974_v13  ;;  %v3391_v17 = vld [vmem:[#allocation7 + $0x20] sm:$0xff]  ;;  %v3390_v44 = vld [vmem:[#allocation7 + $0x18] sm:$0xff] }
 0x525   :  { %v1912_v9 = vpop.f32.mrf.mxu1 }
 0x526   :  { %v5176_v23 = vadd.f32 %v1945_v47, %v1912_v9 }
 0x528   :  { %v1976_v18 = vrot.slane %v5176_v23, 1  ;;  %v2020_v37 = vrot.slane %v5176_v23, 2  ;;  %v1952_v36 = vpop.f32.mrf.mxu2 }
 0x52a   :  { %v2021_v63 = vsel %vm401_vm1, %v2018_v10, %v2020_v37  ;;  %v1977_v41 = vsel %vm236_vm0, %v1974_v13, %v1976_v18  ;;  %v3392_v10 = vld [vmem:[#allocation7 + $0x28] sm:$0xff] }
 0x52b   :  { %v3698_v25 = vpack.i.bf16 %v2021_v63, %v2019_v20  ;;  %v3693_v24 = vpack.i.bf16 %v1977_v41, %v1975_v55  ;;  %2152 = vmatpush.bf16.msra.mxu1 %v3392_v10 }
 0x52d   :  { %3699 = vrot.lane.b32.xlu2 %v3698_v25, %s3994_s16  ;;  %3694 = vrot.lane.b32.xlu1 %v3693_v24, %s4008_s6  ;;  %v1914_v1 = vpop.f32.mrf.mxu1 }
 0x52e   :  { %v5188_v11 = vadd.f32 %v1947_v59, %v1914_v1 }
 0x52f   :  { %2153 = vmatpush.bf16.msra.mxu1 %v3391_v17 }
 0x530   :  { %v1955_v30 = vpop.f32.mrf.mxu2  ;;  %v1978_v31 = vrot.slane %v5188_v11, 1  ;;  %v2022_v8 = vrot.slane %v5188_v11, 2 }
 0x532   :  { %v2023_v52 = vsel %vm401_vm1, %v2020_v37, %v2022_v8  ;;  %v1979_v42 = vsel %vm236_vm0, %v1976_v18, %v1978_v31  ;;  %v3389_v18 = vld [vmem:[#allocation7 + $0x10] sm:$0xff]  ;;  %v3388_v37 = vld [vmem:[#allocation7 + $0x8] sm:$0xff] }
 0x533   :  { %2154 = vmatpush.bf16.msra.mxu1 %v3390_v44 }
 0x535   :  { %v1917_v5 = vpop.f32.mrf.mxu1 }
 0x536   :  { %v5192_v54 = vadd.f32 %v1950_v29, %v1917_v5 }
 0x537   :  { %2155 = vmatpush.bf16.msra.mxu1 %v3389_v18 }
 0x538   :  { %v1980_v43 = vrot.slane %v5192_v54, 1  ;;  %v2024_v32 = vrot.slane %v5192_v54, 2  ;;  %v1957_v60 = vpop.f32.mrf.mxu2 }
 0x53a   :  { %v2025_v56 = vsel %vm401_vm1, %v2022_v8, %v2024_v32  ;;  %v1981_v58 = vsel %vm236_vm0, %v1978_v31, %v1980_v43 }
 0x53b   :  { %v3708_v51 = vpack.i.bf16 %v2025_v56, %v2023_v52  ;;  %v3703_v16 = vpack.i.bf16 %v1981_v58, %v1979_v42  ;;  %2156 = vmatpush.bf16.msra.mxu1 %v3388_v37 }
 0x53d   :  { %3709 = vrot.lane.b32.xlu1 %v3708_v51, %s3994_s16  ;;  %3704 = vrot.lane.b32.xlu0 %v3703_v16, %s4008_s6  ;;  %v1919_v38 = vpop.f32.mrf.mxu1 }
 0x53e   :  { %v5202_v21 = vadd.f32 %v1952_v36, %v1919_v38  ;;  %v3387_v36 = vld [vmem:[#allocation7] sm:$0xff] }
 0x53f   :  { %2157 = vmatpush.bf16.msra.mxu1 %v3387_v36 }
 0x540   :  { %v1960_v26 = vpop.f32.mrf.mxu2  ;;  %v1982_v7 = vrot.slane %v5202_v21, 1  ;;  %v2026_v45 = vrot.slane %v5202_v21, 2 }
 0x542   :  { %v2027_v57 = vsel %vm401_vm1, %v2024_v32, %v2026_v45  ;;  %v1983_v19 = vsel %vm236_vm0, %v1980_v43, %v1982_v7 }
 0x545   :  { %v1922_v40 = vpop.f32.mrf.mxu1 }
 0x546   :  { %v5206_v35 = vadd.f32 %v1955_v30, %v1922_v40 }
 0x548   :  { %v1984_v3 = vrot.slane %v5206_v35, 1  ;;  %v2028_v28 = vrot.slane %v5206_v35, 2  ;;  %v1962_v27 = vpop.f32.mrf.mxu2 }
 0x54a   :  { %v2029_v39 = vsel %vm401_vm1, %v2026_v45, %v2028_v28  ;;  %v1985_v53 = vsel %vm236_vm0, %v1982_v7, %v1984_v3 }
 0x54b   :  { %v3718_v61 = vpack.i.bf16 %v2029_v39, %v2027_v57  ;;  %v3713_v2 = vpack.i.bf16 %v1985_v53, %v1983_v19 }
 0x54d   :  { %3719 = vrot.lane.b32.xlu0 %v3718_v61, %s3994_s16  ;;  %3714 = vrot.lane.b32.xlu2 %v3713_v2, %s4008_s6  ;;  %v1924_v48 = vpop.f32.mrf.mxu1 }
 0x54e   :  { %v5216_v49 = vadd.f32 %v1957_v60, %v1924_v48 }
 0x550   :  { %v1986_v14 = vrot.slane %v5216_v49, 1  ;;  %v2030_v33 = vrot.slane %v5216_v49, 2 }
 0x552   :  { %v2031_v47 = vsel %vm401_vm1, %v2028_v28, %v2030_v33  ;;  %v1987_v59 = vsel %vm236_vm0, %v1984_v3, %v1986_v14 }
 0x555   :  { %v1927_v6 = vpop.f32.mrf.mxu1 }
 0x556   :  { %v5220_v12 = vadd.f32 %v1960_v26, %v1927_v6 }
 0x558   :  { %v2032_v22 = vrot.slane %v5220_v12, 2  ;;  %v1988_v34 = vrot.slane %v5220_v12, 1 }
 0x55a   :  { %2006 = vrot.lane.b32.xlu0 %v1988_v34, %s4008_s6  ;;  %v2033_v15 = vsel %vm401_vm1, %v2030_v33, %v2032_v22  ;;  %v1989_v62 = vsel %vm236_vm0, %v1986_v14, %v1988_v34 }
 0x55b   :  { %v3728_v29 = vpack.i.bf16 %v2033_v15, %v2031_v47  ;;  %v3723_v9 = vpack.i.bf16 %v1989_v62, %v1987_v59 }
 0x55d   :  { %3729 = vrot.lane.b32.xlu2 %v3728_v29, %s3994_s16  ;;  %3724 = vrot.lane.b32.xlu1 %v3723_v9, %s4008_s6  ;;  %v1929_v13 = vpop.f32.mrf.mxu1 }
 0x565   :  { %2050 = vrot.lane.b32.xlu1 %v2032_v22, %s3994_s16 }
 0x587   :  { %v3700_v20 = vpop.permute.xlu2 %3699 }
 0x588   :  { %v3702_v25 = vunpack.i.h.bf16 %v3700_v20  ;;  %v3701_v24 = vunpack.i.l.bf16 %v3700_v20 }
 0x59f   :  { %v3695_v63 = vpop.permute.xlu1 %3694 }
 0x5a0   :  { %v3697_v55 = vunpack.i.h.bf16 %v3695_v63  ;;  %v3696_v41 = vunpack.i.l.bf16 %v3695_v63 }
 0x5a2   :  { %v2062_v1 = vsel %vm1586_vm8, %v5170_v0, %v3697_v55  ;;  %v2061_v30 = vsel %vm1586_vm8, %v5172_v46, %v3696_v41 }
 0x5a3   :  { %v2072_v5 = vsel %vm2070_vm10, %v2062_v1, %v3702_v25  ;;  %v2071_v31 = vsel %vm2070_vm10, %v2061_v30, %v3701_v24 }
 0x5a4   :  { %v2080_v8 = vpack.c.bf16 %v2072_v5, %v2071_v31 }
 0x5a6   :  { %3171 = vmatmul.msk.bf16.vlgmr.msra.gmra.mxu1 %vm2134_vm11, %v2080_v8 }
 0x5a7   :  { %v3715_v38 = vpop.permute.xlu2 %3714 }
 0x5a8   :  { %v3717_v26 = vunpack.i.h.bf16 %v3715_v38  ;;  %v3716_v40 = vunpack.i.l.bf16 %v3715_v38 }
 0x5aa   :  { %v2066_v28 = vsel %vm1586_vm8, %v5202_v21, %v3717_v26 }
 0x5af   :  { %v3710_v43 = vpop.permute.xlu1 %3709  ;;  %v3705_v32 = vpop.permute.xlu0 %3704 }
 0x5b0   :  { %v3712_v60 = vunpack.i.h.bf16 %v3710_v43  ;;  %v3711_v52 = vunpack.i.l.bf16 %v3710_v43  ;;  %v3707_v56 = vunpack.i.h.bf16 %v3705_v32  ;;  %v3706_v42 = vunpack.i.l.bf16 %v3705_v32 }
 0x5b2   :  { %v2064_v0 = vsel %vm1586_vm8, %v5188_v11, %v3707_v56  ;;  %v2063_v46 = vsel %vm1586_vm8, %v5176_v23, %v3706_v42  ;;  %v2065_v11 = vsel %vm1586_vm8, %v5192_v54, %v3716_v40 }
 0x5b3   :  { %v2073_v58 = vsel %vm2070_vm10, %v2063_v46, %v3711_v52  ;;  %v2074_v51 = vsel %vm2070_vm10, %v2064_v0, %v3712_v60 }
 0x5b4   :  { %v2081_v16 = vpack.c.bf16 %v2074_v51, %v2073_v58 }
 0x5b6   :  { %3172 = vmatmul.msk.bf16.gmra.mxu1 %vm2134_vm11, %v2081_v16 }
 0x5b7   :  { %v3730_v39 = vpop.permute.xlu2 %3729 }
 0x5b8   :  { %v3732_v2 = vunpack.i.h.bf16 %v3730_v39  ;;  %v3731_v48 = vunpack.i.l.bf16 %v3730_v39 }
 0x5bf   :  { %v3720_v7 = vpop.permute.xlu0 %3719 }
 0x5c0   :  { %v3722_v45 = vunpack.i.h.bf16 %v3720_v7  ;;  %v3721_v3 = vunpack.i.l.bf16 %v3720_v7 }
 0x5c2   :  { %v2075_v23 = vsel %vm2070_vm10, %v2065_v11, %v3721_v3  ;;  %v2076_v27 = vsel %vm2070_vm10, %v2066_v28, %v3722_v45 }
 0x5c3   :  { %v2082_v57 = vpack.c.bf16 %v2076_v27, %v2075_v23 }
 0x5c6   :  { %3173 = vmatmul.msk.bf16.gmra.mxu1 %vm2134_vm11, %v2082_v57 }
 0x5cc   :  { %v2007_v22 = vpop.permute.xlu0 %2006 }
 0x5cd   :  { %v2069_v47 = vsel %vm1586_vm8, %v5220_v12, %v2007_v22 }
 0x5cf   :  { %v3725_v19 = vpop.permute.xlu1 %3724 }
 0x5d0   :  { %v3727_v53 = vunpack.i.h.bf16 %v3725_v19  ;;  %v3726_v61 = vunpack.i.l.bf16 %v3725_v19 }
 0x5d2   :  { %v2068_v6 = vsel %vm1586_vm8, %v5216_v49, %v3727_v53  ;;  %v2067_v21 = vsel %vm1586_vm8, %v5206_v35, %v3726_v61  ;;  %v2097_v35 = vperm.slane %v5090_v50, 2 }
 0x5d3   :  { %v2077_v54 = vsel %vm2070_vm10, %v2067_v21, %v3731_v48  ;;  %v2078_v14 = vsel %vm2070_vm10, %v2068_v6, %v3732_v2 }
 0x5d4   :  { %v2083_v33 = vpack.c.bf16 %v2078_v14, %v2077_v54 }
 0x5d6   :  { %3174 = vmatmul.msk.bf16.gmra.mxu1 %vm2134_vm11, %v2083_v33 }
 0x5d7   :  { %v2051_v34 = vpop.permute.xlu1 %2050 }
 0x5d8   :  { %v2079_v15 = vsel %vm2070_vm10, %v2069_v47, %v2051_v34 }
 0x5d9   :  { %v2084_v59 = vpack.c.bf16 %v2079_v15, %v2079_v15 }
 0x5e6   :  { %3175 = vmatmul.msk.bf16.gmra.mxu1 %vm2134_vm11, %v2084_v59  ;;  %v3393_v59 = vld [vmem:[#allocation11] sm:$0xff] }
 0x623   :  { %v2159_v49 = vpop.f32.mrf.mxu1 }
 0x624   :  { %v2160_v62 = vadd.f32 %v2159_v49, %v2097_v35  ;;  %v3394_v49 = vld [vmem:[#allocation11 + $0x8] sm:$0xff] }
 0x626   :  { %v2183_v9 = vmax.f32 %v2160_v62, 0.0 }
 0x628   :  { %v2201_v17 = vrot.slane %v2183_v9, 1 }
 0x62b   :  { %v2161_v29 = vpop.f32.mrf.mxu1 }
 0x62c   :  { %v2162_v13 = vadd.f32 %v2161_v29, %v2097_v35 }
 0x62e   :  { %v2184_v10 = vmax.f32 %v2162_v13, 0.0 }
 0x630   :  { %v2202_v44 = vrot.slane %v2184_v10, 1 }
 0x632   :  { %v2203_v18 = vsel %vm236_vm0, %v2201_v17, %v2202_v44  ;;  %v3399_v17 = vld [vmem:[#allocation8 + $0x20] sm:$0xff] }
 0x633   :  { %v2164_v37 = vpop.f32.mrf.mxu1  ;;  %v2227_v36 = vmax.f32 %v2183_v9, %v2203_v18  ;;  %v3400_v9 = vld [vmem:[#allocation8 + $0x28] sm:$0xff] }
 0x634   :  { %v2165_v12 = vadd.f32 %v2164_v37, %v2097_v35  ;;  %2421 = vmatpush.bf16.msrb.mxu0 %v3400_v9 }
 0x636   :  { %v2185_v20 = vmax.f32 %v2165_v12, 0.0 }
 0x638   :  { %v2204_v63 = vrot.slane %v2185_v20, 1  ;;  %2422 = vmatpush.bf16.msrb.mxu0 %v3399_v17  ;;  %v2373_v17 = vperm.slane %v5090_v50, 3 }
 0x63a   :  { %v2205_v55 = vsel %vm236_vm0, %v2202_v44, %v2204_v63 }
 0x63b   :  { %v2166_v41 = vpop.f32.mrf.mxu1  ;;  %v2228_v25 = vmax.f32 %v2184_v10, %v2205_v55 }
 0x63c   :  { %v2167_v51 = vadd.f32 %v2166_v41, %v2097_v35 }
 0x63d   :  { %v2236_v24 = vpack.c.bf16 %v2228_v25, %v2227_v36  ;;  %v3398_v36 = vld [vmem:[#allocation8 + $0x18] sm:$0xff] }
 0x63e   :  { %v2186_v11 = vmax.f32 %v2167_v51, 0.0  ;;  %2423 = vmatpush.bf16.msrb.mxu0 %v3398_v36 }
 0x640   :  { %v2206_v2 = vrot.slane %v2186_v11, 1 }
 0x642   :  { %v2207_v33 = vsel %vm236_vm0, %v2204_v63, %v2206_v2 }
 0x643   :  { %v2169_v1 = vpop.f32.mrf.mxu1  ;;  %v2229_v47 = vmax.f32 %v2185_v20, %v2207_v33 }
 0x644   :  { %v2170_v0 = vadd.f32 %v2169_v1, %v2097_v35 }
 0x646   :  { %v2187_v40 = vmax.f32 %v2170_v0, 0.0 }
 0x648   :  { %v2208_v19 = vrot.slane %v2187_v40, 1 }
 0x64a   :  { %v2209_v54 = vsel %vm236_vm0, %v2206_v2, %v2208_v19 }
 0x64b   :  { %v2171_v30 = vpop.f32.mrf.mxu1  ;;  %v2230_v34 = vmax.f32 %v2186_v11, %v2209_v54 }
 0x64c   :  { %v2172_v52 = vadd.f32 %v2171_v30, %v2097_v35 }
 0x64d   :  { %v2237_v15 = vpack.c.bf16 %v2230_v34, %v2229_v47 }
 0x64e   :  { %v2188_v16 = vmax.f32 %v2172_v52, 0.0 }
 0x650   :  { %v2210_v23 = vrot.slane %v2188_v16, 1 }
 0x652   :  { %v2211_v48 = vsel %vm236_vm0, %v2208_v19, %v2210_v23 }
 0x653   :  { %v2174_v5 = vpop.f32.mrf.mxu1  ;;  %v2231_v14 = vmax.f32 %v2187_v40, %v2211_v48  ;;  %v3395_v40 = vld [vmem:[#allocation8] sm:$0xff] }
 0x654   :  { %v2175_v43 = vadd.f32 %v2174_v5, %v2097_v35 }
 0x656   :  { %v2189_v46 = vmax.f32 %v2175_v43, 0.0 }
 0x658   :  { %v2212_v7 = vrot.slane %v2189_v46, 1 }
 0x65a   :  { %v2213_v53 = vsel %vm236_vm0, %v2210_v23, %v2212_v7 }
 0x65b   :  { %v2176_v31 = vpop.f32.mrf.mxu1  ;;  %v2232_v21 = vmax.f32 %v2188_v16, %v2213_v53 }
 0x65c   :  { %v2177_v8 = vadd.f32 %v2176_v31, %v2097_v35 }
 0x65d   :  { %v2238_v22 = vpack.c.bf16 %v2232_v21, %v2231_v14 }
 0x65e   :  { %v2190_v56 = vmax.f32 %v2177_v8, 0.0 }
 0x660   :  { %v2214_v38 = vrot.slane %v2190_v56, 1 }
 0x662   :  { %v2215_v27 = vsel %vm236_vm0, %v2212_v7, %v2214_v38 }
 0x663   :  { %v2179_v32 = vpop.f32.mrf.mxu1  ;;  %v2233_v61 = vmax.f32 %v2189_v46, %v2215_v27 }
 0x664   :  { %v2180_v60 = vadd.f32 %v2179_v32, %v2097_v35  ;;  %v2245_v35 = vld [vmem:[#allocation11 + $0x10] sm:$0x3] }
 0x665   :  { %v2255_v62 = vunpack.c.l.b16 %v2245_v35 }
 0x666   :  { %v2191_v42 = vmax.f32 %v2180_v60, 0.0 }
 0x667   :  { %v2258_v29 = vpack.c.b16 %v2255_v62, %v2255_v62 }
 0x668   :  { %v2216_v58 = vrot.slane %v2191_v42, 1 }
 0x66a   :  { %v2235_v26 = vmax.f32 %v2191_v42, %v2216_v58  ;;  %v2217_v3 = vsel %vm236_vm0, %v2214_v38, %v2216_v58  ;;  %v3397_v38 = vld [vmem:[#allocation8 + $0x10] sm:$0xff] }
 0x66b   :  { %v2181_v45 = vpop.f32.mrf.mxu1  ;;  %v2234_v39 = vmax.f32 %v2190_v56, %v2217_v3  ;;  %2424 = vmatpush.bf16.msrb.mxu0 %v3397_v38 }
 0x66c   :  { %v2240_v28 = vpack.c.bf16 %v2235_v26, %v2235_v26  ;;  %v3396_v26 = vld [vmem:[#allocation8 + $0x8] sm:$0xff] }
 0x66d   :  { %v2239_v6 = vpack.c.bf16 %v2234_v39, %v2233_v61 }
 0x66e   :  { %v2270_v57 = vand.u32 %v2240_v28, %v4732_v4 }
 0x66f   :  { %2425 = vmatpush.bf16.msrb.mxu0 %v3396_v26 }
 0x670   :  { %2275 = vmatpush.bf16.msra.mxu2 %v2270_v57 }
 0x673   :  { %2426 = vmatpush.bf16.msrb.mxu0 %v3395_v40  ;;  %v3401_v40 = vld [vmem:[%s5428_s9] sm:$0xff] }
 0x674   :  { %2276 = vmatpush.bf16.msra.mxu2 %v2239_v6 }
 0x678   :  { %2277 = vmatpush.bf16.msra.mxu2 %v2238_v22 }
 0x67c   :  { %2278 = vmatpush.bf16.msra.mxu2 %v2237_v15 }
 0x680   :  { %2279 = vmatpush.bf16.msra.mxu2 %v2236_v24 }
 0x683   :  { %3184 = vmatmul.msk.bf16.vlgmr.msra.gmra.mxu2 %vm2259_vm12, %v3393_v59 }
 0x693   :  { %3185 = vmatmul.msk.bf16.gmra.mxu2 %vm2259_vm12, %v3394_v49 }
 0x6a3   :  { %3186 = vmatmul.msk.bf16.gmra.mxu2 %vm2259_vm12, %v2258_v29 }
 0x706   :  { %v2281_v13 = vpop.f32.mrf.mxu2 }
 0x707   :  { %v2300_v12 = vrot.slane %v2281_v13, 1  ;;  %v2324_v20 = vrot.slane %v2281_v13, 2 }
 0x70e   :  { %v2283_v10 = vpop.f32.mrf.mxu2 }
 0x70f   :  { %v2301_v44 = vrot.slane %v2283_v10, 1  ;;  %v2325_v18 = vrot.slane %v2283_v10, 2 }
 0x711   :  { %v2326_v41 = vsel %vm401_vm1, %v2324_v20, %v2325_v18  ;;  %v2302_v24 = vsel %vm236_vm0, %v2300_v12, %v2301_v44 }
 0x716   :  { %v2286_v37 = vpop.f32.mrf.mxu2 }
 0x717   :  { %v2303_v63 = vrot.slane %v2286_v37, 1  ;;  %v2327_v55 = vrot.slane %v2286_v37, 2 }
 0x719   :  { %v2328_v25 = vsel %vm401_vm1, %v2325_v18, %v2327_v55  ;;  %v2304_v1 = vsel %vm236_vm0, %v2301_v44, %v2303_v63 }
 0x71a   :  { %v3738_v30 = vpack.i.bf16 %v2328_v25, %v2326_v41  ;;  %v3733_v5 = vpack.i.bf16 %v2304_v1, %v2302_v24 }
 0x71c   :  { %3739 = vrot.lane.b32.xlu0 %v3738_v30, %s3994_s16  ;;  %3734 = vrot.lane.b32.xlu2 %v3733_v5, %s4008_s6 }
 0x71e   :  { %v2288_v31 = vpop.f32.mrf.mxu2 }
 0x71f   :  { %v2305_v8 = vrot.slane %v2288_v31, 1  ;;  %v2329_v43 = vrot.slane %v2288_v31, 2 }
 0x721   :  { %v2330_v56 = vsel %vm401_vm1, %v2327_v55, %v2329_v43  ;;  %v2306_v0 = vsel %vm236_vm0, %v2303_v63, %v2305_v8 }
 0x726   :  { %v2291_v32 = vpop.f32.mrf.mxu2 }
 0x727   :  { %v2307_v60 = vrot.slane %v2291_v32, 1  ;;  %v2331_v52 = vrot.slane %v2291_v32, 2 }
 0x729   :  { %2317 = vrot.lane.b32.xlu0 %v2307_v60, %s4008_s6  ;;  %v2332_v42 = vsel %vm401_vm1, %v2329_v43, %v2331_v52  ;;  %v2308_v46 = vsel %vm236_vm0, %v2305_v8, %v2307_v60 }
 0x72a   :  { %v3748_v58 = vpack.i.bf16 %v2332_v42, %v2330_v56  ;;  %v3743_v51 = vpack.i.bf16 %v2308_v46, %v2306_v0 }
 0x72c   :  { %3749 = vrot.lane.b32.xlu2 %v3748_v58, %s3994_s16  ;;  %3744 = vrot.lane.b32.xlu1 %v3743_v51, %s4008_s6 }
 0x72e   :  { %v2293_v16 = vpop.f32.mrf.mxu2 }
 0x734   :  { %2341 = vrot.lane.b32.xlu1 %v2331_v52, %s3994_s16 }
 0x776   :  { %v3735_v7 = vpop.permute.xlu2 %3734 }
 0x777   :  { %v3737_v45 = vunpack.i.h.bf16 %v3735_v7  ;;  %v3736_v3 = vunpack.i.l.bf16 %v3735_v7 }
 0x779   :  { %v2349_v27 = vsel %vm1586_vm8, %v2283_v10, %v3737_v45  ;;  %v2348_v57 = vsel %vm1586_vm8, %v2281_v13, %v3736_v3  ;;  %v3409_v3 = vld [vmem:[%s5424_s5 + $0x38] sm:$0xff] }
 0x77a   :  { %2725 = vmatpush.bf16.msrb.mxu2 %v3409_v3 }
 0x786   :  { %v3750_v61 = vpop.permute.xlu2 %3749 }
 0x787   :  { %v3752_v21 = vunpack.i.h.bf16 %v3750_v61  ;;  %v3751_v54 = vunpack.i.l.bf16 %v3750_v61  ;;  %v3403_v61 = vld [vmem:[%s5424_s5 + $0x8] sm:$0xff] }
 0x78e   :  { %v3740_v28 = vpop.permute.xlu0 %3739 }
 0x78f   :  { %v3742_v11 = vunpack.i.h.bf16 %v3740_v28  ;;  %v3741_v23 = vunpack.i.l.bf16 %v3740_v28  ;;  %v3408_v28 = vld [vmem:[%s5424_s5 + $0x30] sm:$0xff] }
 0x790   :  { %2726 = vmatpush.bf16.msrb.mxu2 %v3408_v28 }
 0x791   :  { %v2353_v39 = vsel %vm2070_vm10, %v2348_v57, %v3741_v23  ;;  %v2354_v19 = vsel %vm2070_vm10, %v2349_v27, %v3742_v11  ;;  %v3417_v11 = vld [vmem:[%s5424_s5 + $0x78] sm:$0xff]  ;;  %v3407_v23 = vld [vmem:[%s5424_s5 + $0x28] sm:$0xff]  ;;  %v3406_v57 = vld [vmem:[%s5424_s5 + $0x20] sm:$0xff] }
 0x792   :  { %v2358_v53 = vpack.c.bf16 %v2354_v19, %v2353_v39  ;;  %v3405_v39 = vld [vmem:[%s5424_s5 + $0x18] sm:$0xff] }
 0x794   :  { %3211 = vmatmul.msk.bf16.vlgmr.msrb.gmra.mxu0 %vm2134_vm11, %v2358_v53  ;;  %2727 = vmatpush.bf16.msrb.mxu2 %v3407_v23  ;;  %v3404_v53 = vld [vmem:[%s5424_s5 + $0x10] sm:$0xff] }
 0x798   :  { %2728 = vmatpush.bf16.msrb.mxu2 %v3406_v57 }
 0x79b   :  { %v2318_v15 = vpop.permute.xlu0 %2317 }
 0x79c   :  { %v2352_v49 = vsel %vm1586_vm8, %v2291_v32, %v2318_v15  ;;  %2729 = vmatpush.bf16.msrb.mxu2 %v3405_v39 }
 0x79e   :  { %v3745_v2 = vpop.permute.xlu1 %3744 }
 0x79f   :  { %v3747_v48 = vunpack.i.h.bf16 %v3745_v2  ;;  %v3746_v6 = vunpack.i.l.bf16 %v3745_v2 }
 0x7a0   :  { %2730 = vmatpush.bf16.msrb.mxu2 %v3404_v53 }
 0x7a1   :  { %v2351_v14 = vsel %vm1586_vm8, %v2288_v31, %v3747_v48  ;;  %v2350_v33 = vsel %vm1586_vm8, %v2286_v37, %v3746_v6 }
 0x7a2   :  { %v2355_v22 = vsel %vm2070_vm10, %v2350_v33, %v3751_v54  ;;  %v2356_v34 = vsel %vm2070_vm10, %v2351_v14, %v3752_v21 }
 0x7a3   :  { %v2359_v47 = vpack.c.bf16 %v2356_v34, %v2355_v22 }
 0x7a4   :  { %2731 = vmatpush.bf16.msrb.mxu2 %v3403_v61 }
 0x7a5   :  { %3212 = vmatmul.msk.bf16.gmra.mxu0 %vm2134_vm11, %v2359_v47 }
 0x7a6   :  { %v2342_v59 = vpop.permute.xlu1 %2341 }
 0x7a7   :  { %v2357_v35 = vsel %vm2070_vm10, %v2352_v49, %v2342_v59 }
 0x7a8   :  { %v2360_v62 = vpack.c.bf16 %v2357_v35, %v2357_v35 }
 0x7b5   :  { %3213 = vmatmul.msk.bf16.gmra.mxu0 %vm2134_vm11, %v2360_v62  ;;  %v3402_v62 = vld [vmem:[%s5424_s5] sm:$0xff] }
 0x7b6   :  { %2732 = vmatpush.bf16.msrb.mxu2 %v3402_v62  ;;  %v3431_v62 = vld [vmem:[#allocation13 + $0x48] sm:$0xff] }
 0x811   :  { %v2428_v29 = vpop.f32.mrf.mxu0 }
 0x812   :  { %v2429_v55 = vadd.f32 %v2428_v29, %v2373_v17  ;;  %v3416_v29 = vld [vmem:[%s5424_s5 + $0x70] sm:$0xff] }
 0x814   :  { %v2442_v5 = vmax.f32 %v2429_v55, 0.0 }
 0x816   :  { %v2452_v42 = vrot.slane %v2442_v5, 1 }
 0x819   :  { %v2430_v9 = vpop.f32.mrf.mxu0 }
 0x81a   :  { %v2431_v12 = vadd.f32 %v2430_v9, %v2373_v17  ;;  %v3415_v9 = vld [vmem:[%s5424_s5 + $0x68] sm:$0xff] }
 0x81c   :  { %v2443_v24 = vmax.f32 %v2431_v12, 0.0  ;;  %v3411_v12 = vld [vmem:[%s5424_s5 + $0x48] sm:$0xff] }
 0x81e   :  { %v2453_v50 = vrot.slane %v2443_v24, 1 }
 0x820   :  { %v2454_v58 = vsel %vm236_vm0, %v2452_v42, %v2453_v50 }
 0x821   :  { %v2466_v38 = vmax.f32 %v2442_v5, %v2454_v58 }
 0x822   :  { %v2433_v13 = vpop.f32.mrf.mxu0 }
 0x823   :  { %v2434_v18 = vadd.f32 %v2433_v13, %v2373_v17  ;;  %v3421_v13 = vld [vmem:[%s5424_s5 + $0x98] sm:$0xff] }
 0x824   :  { %2757 = vmatpush.bf16.msra.mxu2 %v3421_v13  ;;  %v3428_v13 = vld [vmem:[#allocation13 + $0x30] sm:$0xff] }
 0x825   :  { %v2444_v41 = vmax.f32 %v2434_v18, 0.0  ;;  %v3419_v18 = vld [vmem:[%s5424_s5 + $0x88] sm:$0xff] }
 0x827   :  { %v2455_v31 = vrot.slane %v2444_v41, 1 }
 0x829   :  { %v2456_v0 = vsel %vm236_vm0, %v2453_v50, %v2455_v31 }
 0x82a   :  { %v2435_v10 = vpop.f32.mrf.mxu0  ;;  %v2467_v16 = vmax.f32 %v2443_v24, %v2456_v0 }
 0x82b   :  { %v2436_v44 = vadd.f32 %v2435_v10, %v2373_v17  ;;  %v3414_v10 = vld [vmem:[%s5424_s5 + $0x60] sm:$0xff] }
 0x82c   :  { %v2471_v26 = vpack.c.bf16 %v2467_v16, %v2466_v38 }
 0x82d   :  { %v2445_v20 = vmax.f32 %v2436_v44, 0.0  ;;  %v3413_v44 = vld [vmem:[%s5424_s5 + $0x58] sm:$0xff] }
 0x82f   :  { %v2457_v1 = vrot.slane %v2445_v20, 1 }
 0x831   :  { %v2458_v60 = vsel %vm236_vm0, %v2455_v31, %v2457_v1 }
 0x832   :  { %v2438_v37 = vpop.f32.mrf.mxu0  ;;  %v2468_v46 = vmax.f32 %v2444_v41, %v2458_v60 }
 0x833   :  { %v2439_v36 = vadd.f32 %v2438_v37, %v2373_v17  ;;  %v3420_v17 = vld [vmem:[%s5424_s5 + $0x90] sm:$0xff] }
 0x834   :  { %2758 = vmatpush.bf16.msra.mxu2 %v3420_v17  ;;  %v3412_v37 = vld [vmem:[%s5424_s5 + $0x50] sm:$0xff]  ;;  %v3426_v17 = vld [vmem:[#allocation13 + $0x20] sm:$0xff] }
 0x835   :  { %v2446_v63 = vmax.f32 %v2439_v36, 0.0  ;;  %v3418_v36 = vld [vmem:[%s5424_s5 + $0x80] sm:$0xff] }
 0x837   :  { %v2459_v25 = vrot.slane %v2446_v63, 1 }
 0x838   :  { %2759 = vmatpush.bf16.msra.mxu2 %v3419_v18  ;;  %v3424_v18 = vld [vmem:[#allocation13 + $0x10] sm:$0xff] }
 0x839   :  { %v2470_v30 = vmax.f32 %v2446_v63, %v2459_v25  ;;  %v2460_v43 = vsel %vm236_vm0, %v2457_v1, %v2459_v25 }
 0x83a   :  { %v2440_v8 = vpop.f32.mrf.mxu0  ;;  %v2469_v56 = vmax.f32 %v2445_v20, %v2460_v43  ;;  %v3410_v20 = vld [vmem:[%s5424_s5 + $0x40] sm:$0xff] }
 0x83b   :  { %v2473_v32 = vpack.c.bf16 %v2470_v30, %v2470_v30 }
 0x83c   :  { %v2472_v51 = vpack.c.bf16 %v2469_v56, %v2468_v46  ;;  %2760 = vmatpush.bf16.msra.mxu2 %v3418_v36 }
 0x83d   :  { %v2493_v52 = vand.u32 %v2473_v32, %v4732_v4  ;;  %v2476_v4 = vld [vmem:[%s5428_s9 + $0x8] sm:$0x3] }
 0x83e   :  { %v2482_v7 = vunpack.c.l.b16 %v2476_v4  ;;  %v5404_v4 = vld [vmem:[#allocation14] sm:$0xff] }
 0x83f   :  { %2500 = vmatpush.bf16.msra.mxu3 %v2493_v52 }
 0x840   :  { %v2484_v45 = vpack.c.b16 %v2482_v7, %v2482_v7  ;;  %v2601_v7 = vperm.slane %v5404_v4, 4 }
 0x843   :  { %2501 = vmatpush.bf16.msra.mxu3 %v2472_v51 }
 0x847   :  { %2502 = vmatpush.bf16.msra.mxu3 %v2471_v26 }
 0x84a   :  { %3218 = vmatmul.msk.bf16.vlgmr.msra.gmra.mxu3 %vm2485_vm13, %v3401_v40 }
 0x84b   :  { %2739 = vmatpush.bf16.msrb.mxu3 %v3417_v11 }
 0x84f   :  { %2740 = vmatpush.bf16.msrb.mxu3 %v3416_v29  ;;  %v3430_v29 = vld [vmem:[#allocation13 + $0x40] sm:$0xff] }
 0x853   :  { %2741 = vmatpush.bf16.msrb.mxu3 %v3415_v9  ;;  %v3429_v9 = vld [vmem:[#allocation13 + $0x38] sm:$0xff] }
 0x854   :  { %2913 = vmatpush.bf16.msrb.mxu1 %v3429_v9 }
 0x857   :  { %2742 = vmatpush.bf16.msrb.mxu3 %v3414_v10  ;;  %v3427_v10 = vld [vmem:[#allocation13 + $0x28] sm:$0xff] }
 0x858   :  { %2914 = vmatpush.bf16.msrb.mxu1 %v3428_v13 }
 0x85a   :  { %3219 = vmatmul.msk.bf16.gmra.mxu3 %vm2485_vm13, %v2484_v45 }
 0x85b   :  { %2743 = vmatpush.bf16.msrb.mxu3 %v3413_v44  ;;  %v3425_v44 = vld [vmem:[#allocation13 + $0x18] sm:$0xff] }
 0x85c   :  { %2915 = vmatpush.bf16.msrb.mxu1 %v3427_v10 }
 0x85f   :  { %2744 = vmatpush.bf16.msrb.mxu3 %v3412_v37  ;;  %v3423_v37 = vld [vmem:[#allocation13 + $0x8] sm:$0xff] }
 0x860   :  { %2916 = vmatpush.bf16.msrb.mxu1 %v3426_v17 }
 0x863   :  { %2745 = vmatpush.bf16.msrb.mxu3 %v3411_v12 }
 0x864   :  { %2917 = vmatpush.bf16.msrb.mxu1 %v3425_v44 }
 0x867   :  { %2746 = vmatpush.bf16.msrb.mxu3 %v3410_v20 }
 0x868   :  { %2918 = vmatpush.bf16.msrb.mxu1 %v3424_v18 }
 0x86c   :  { %2919 = vmatpush.bf16.msrb.mxu1 %v3423_v37 }
 0x8cd   :  { %v5325_v27 = vpop.f32.mrf.mxu3 }
 0x8ce   :  { %v2535_v14 = vrot.slane %v5325_v27, 3  ;;  %v2516_v33 = vrot.slane %v5325_v27, 1  ;;  %v2547_v31 = vrot.slane %v5325_v27, 4  ;;  %v2527_v52 = vrot.slane %v5325_v27, 2 }
 0x8d5   :  { %v5333_v19 = vpop.f32.mrf.mxu3 }
 0x8d6   :  { %v2536_v2 = vrot.slane %v5333_v19, 3  ;;  %v2517_v48 = vrot.slane %v5333_v19, 1  ;;  %v2548_v5 = vrot.slane %v5333_v19, 4  ;;  %v2528_v50 = vrot.slane %v5333_v19, 2 }
 0x8d8   :  { %v2537_v22 = vsel %vm2534_vm14, %v2535_v14, %v2536_v2  ;;  %v2518_v47 = vsel %vm236_vm0, %v2516_v33, %v2517_v48  ;;  %v2549_v43 = vsel %vm2546_vm15, %v2547_v31, %v2548_v5  ;;  %v2529_v46 = vsel %vm401_vm1, %v2527_v52, %v2528_v50 }
 0x8d9   :  { %v2837_v31 = vperm.slane %v5404_v4, 5 }
 0x8dd   :  { %v5343_v6 = vpop.f32.mrf.mxu3 }
 0x8de   :  { %v2519_v21 = vrot.slane %v5343_v6, 1  ;;  %v2538_v54 = vrot.slane %v5343_v6, 3  ;;  %v2550_v30 = vrot.slane %v5343_v6, 4  ;;  %v2530_v60 = vrot.slane %v5343_v6, 2 }
 0x8e0   :  { %v2539_v34 = vsel %vm2534_vm14, %v2536_v2, %v2538_v54  ;;  %v2520_v15 = vsel %vm236_vm0, %v2517_v48, %v2519_v21  ;;  %v2551_v8 = vsel %vm2546_vm15, %v2548_v5, %v2550_v30  ;;  %v2531_v58 = vsel %vm401_vm1, %v2528_v50, %v2530_v60 }
 0x8e1   :  { %v3758_v59 = vpack.i.bf16 %v2539_v34, %v2537_v22  ;;  %v3753_v49 = vpack.i.bf16 %v2520_v15, %v2518_v47  ;;  %v2560_v32 = vpack.c.bf16 %v2551_v8, %v2549_v43  ;;  %vm2784_vm1 = vcmask 1047552  }
 0x8e2   :  { %v4010_v21 = vmov 65535  }
 0x8e3   :  { %3759 = vrot.lane.b32.xlu0 %v3758_v59, %s3994_s16  ;;  %3754 = vrot.lane.b32.xlu2 %v3753_v49, %s3994_s16  ;;  %v2785_v54 = vsel %vm236_vm0, 4294967295, %v4010_v21  ;;  %v2779_v59 = vld [vmem:[%s5429_s10] sm:$0x7]  ;;  %v3433_v49 = vld [vmem:[#allocation13 + $0x58] sm:$0xff]  ;;  %s4011_s10 = smov [#allocation16]  }
 0x8e4   :  { %v2786_v34 = vsel %vm2784_vm1, %v2785_v54, 0  ;;  %s2947_s22 = sshll.u32 %s4011_s10, 4  ;;  %s2948_s22 = int_to_ptr.vmem [resolvable:$true] %s2947_s22 }
 0x8e5   :  { %v2511_v35 = vpop.f32.mrf.mxu3 }
 0x8e6   :  { %v3432_v35 = vld [vmem:[#allocation13 + $0x50] sm:$0xff] }
 0x93d   :  { %v3755_v63 = vpop.permute.xlu2 %3754 }
 0x93e   :  { %v3757_v55 = vunpack.i.h.bf16 %v3755_v63  ;;  %v3756_v41 = vunpack.i.l.bf16 %v3755_v63 }
 0x940   :  { %v2555_v25 = vsel %vm2070_vm10, %v5333_v19, %v3757_v55  ;;  %v2554_v24 = vsel %vm2070_vm10, %v5325_v27, %v3756_v41  ;;  %v3422_v41 = vld [vmem:[#allocation13] sm:$0xff] }
 0x941   :  { %v2558_v1 = vpack.c.bf16 %v2555_v25, %v2554_v24  ;;  %2920 = vmatpush.bf16.msrb.mxu1 %v3422_v41 }
 0x943   :  { %2733 = vmatmul.bf16.vlgmr.msrb.gmra.mxu2 %v2558_v1 }
 0x944   :  { %2930 = vmatpush.bf16.msrb.mxu2 %v3433_v49 }
 0x948   :  { %2931 = vmatpush.bf16.msrb.mxu2 %v3432_v35 }
 0x94c   :  { %2932 = vmatpush.bf16.msrb.mxu2 %v3431_v62 }
 0x950   :  { %2933 = vmatpush.bf16.msrb.mxu2 %v3430_v29 }
 0x953   :  { %3300 = vmatmul.msk.bf16.vlgmr.msra.gmra.mxu2 %vm2070_vm10, %v2560_v32 }
 0x955   :  { %v3760_v56 = vpop.permute.xlu0 %3759 }
 0x956   :  { %v3762_v42 = vunpack.i.h.bf16 %v3760_v56  ;;  %v3761_v0 = vunpack.i.l.bf16 %v3760_v56 }
 0x958   :  { %v2556_v51 = vsel %vm2070_vm10, %v2529_v46, %v3761_v0  ;;  %v2557_v16 = vsel %vm2070_vm10, %v2531_v58, %v3762_v42 }
 0x959   :  { %v2559_v38 = vpack.c.bf16 %v2557_v16, %v2556_v51 }
 0x95b   :  { %2747 = vmatmul.bf16.vlgmr.msrb.gmra.mxu3 %v2559_v38 }
 0x9c6   :  { %v2734_v26 = vpop.f32.mrf.mxu2 }
 0x9c7   :  { %v2735_v28 = vadd.f32 %v2734_v26, %v2601_v7 }
 0x9ce   :  { %v2736_v40 = vpop.f32.mrf.mxu2 }
 0x9cf   :  { %v2737_v23 = vadd.f32 %v2736_v40, %v2601_v7 }
 0x9d6   :  { %v2762_v45 = vpop.f32.mrf.mxu2 }
 0x9de   :  { %v2748_v3 = vpop.f32.mrf.mxu3  ;;  %v2764_v19 = vpop.f32.mrf.mxu2 }
 0x9df   :  { %v2749_v11 = vadd.f32 %v2748_v3, %v2735_v28 }
 0x9e1   :  { %v2763_v27 = vadd.f32 %v2762_v45, %v2749_v11 }
 0x9e3   :  { %v2767_v53 = vmax.f32 %v2763_v27, 0.0 }
 0x9e5   :  { %v2771_v48 = vrot.slane %v2767_v53, 1 }
 0x9e6   :  { %v2750_v57 = vpop.f32.mrf.mxu3 }
 0x9e7   :  { %v2751_v39 = vadd.f32 %v2750_v57, %v2737_v23 }
 0x9e9   :  { %v2765_v61 = vadd.f32 %v2764_v19, %v2751_v39 }
 0x9eb   :  { %v2768_v2 = vmax.f32 %v2765_v61, 0.0 }
 0x9ed   :  { %v2772_v6 = vrot.slane %v2768_v2, 1 }
 0x9ef   :  { %v2773_v14 = vsel %vm236_vm0, %v2771_v48, %v2772_v6  ;;  %v2777_v33 = vmax.f32 %v2768_v2, %v2772_v6  ;;  %vm2940_vm0 = vcmask 254976  }
 0x9f0   :  { %v2776_v22 = vmax.f32 %v2767_v53, %v2773_v14 }
 0x9f2   :  { %v2778_v47 = vpack.c.bf16 %v2777_v33, %v2776_v22 }
 0x9f4   :  { %v2788_v15 = vand.u32 %v2786_v34, %v2778_v47 }
 0x9f6   :  { %2797 = vmatpush.bf16.msra.mxu0 %v2788_v15 }
 0x9f9   :  { %3301 = vmatmul.msk.bf16.vlgmr.msra.gmra.mxu0 %vm2780_vm2, %v2779_v59 }
 0xa76   :  { %v2799_v36 = vpop.f32.mrf.mxu0 }
 0xa77   :  { %v2808_v12 = vrot.slane %v2799_v36, 4  ;;  %v2804_v20 = vrot.slane %v2799_v36, 2 }
 0xa79   :  { %v2812_v63 = vpack.c.bf16 %v2808_v12, %v2808_v12  ;;  %2805 = vrot.lane.b32.xlu1 %v2804_v20, %s3994_s16 }
 0xa7b   :  { %3350 = vmatmul.msk.bf16.vlgmr.msrb.gmra.mxu2 %vm2070_vm10, %v2812_v63 }
 0xa7e   :  { %v2801_v55 = vpop.f32.mrf.mxu0 }
 0xaeb   :  { %v2806_v25 = vpop.permute.xlu1 %2805 }
 0xaec   :  { %v2810_v24 = vsel %vm2070_vm10, %v2799_v36, %v2806_v25 }
 0xaed   :  { %v2811_v1 = vpack.c.bf16 %v2810_v24, %v2810_v24 }
 0xaef   :  { %2921 = vmatmul.bf16.vlgmr.msrb.gmra.mxu1 %v2811_v1 }
 0xafe   :  { %v2935_v30 = vpop.f32.mrf.mxu2 }
 0xb06   :  { %v2937_v5 = vpop.f32.mrf.mxu2 }
 0xb6c   :  { %v2922_v8 = vpop.f32.mrf.mxu1 }
 0xb6d   :  { %v2923_v43 = vadd.f32 %v2922_v8, %v2837_v31 }
 0xb6f   :  { %v2936_v32 = vadd.f32 %v2935_v30, %v2923_v43 }
 0xb71   :  { %v2939_v50 = vmax.f32 %v2936_v32, 0.0 }
 0xb73   :  { %2941 = vst.msk [vmem:[#allocation16] sm:$0x3] %vm2940_vm0, %v2939_v50 }
 0xb74   :  { %v2924_v60 = vpop.f32.mrf.mxu1  ;;  %2952 = dma.vmem_to_hbm [thread:$0]  %s2948_s22, 32, %s2950_s23, [#allocation4]  }
 0xb75   :  { %3991 = dma.done.wait [#allocation4], 32  }
 0xb76   :  { %3992 = vsyncadd [#allocation4], 4294967264 }
 0xb77   :  { %2957 = vsyncpa [#allocation3], 1 }
 0xb78   :  { %2958 = vsyncpa [#allocation6], 1 }
 0xb79   :  { %2959 = vsyncpa [#allocation9], 1 }
 0xb7a   :  { %2960 = vsyncpa [#allocation12], 1 }
 0xb7b   :  { %2961 = vsyncpa [#allocation15], 1 }
 0xb7c   :  { %2962 = vsyncpa [#allocation4], 1 }

// kernel: fn.1
= control target key start
LH: loop header
LB: loop body
LE: loop exit
PB: predicated region body
PF: predicated region fallthrough
CT: control target
= control target key end

     0   :  { %18 = vsyncpa [#allocation3], 0  ;;  %s5068_s0 = inlined_call_operand.vmem [shape: f32[260,6], index: 0, kind: input, shape index: {}]   ;;  %s5069_s1 = inlined_call_operand.hbm [shape: bf16[18,16], index: 1, kind: input, shape index: {}]   ;;  %s5070_s2 = inlined_call_operand.hbm [shape: bf16[48,32], index: 2, kind: input, shape index: {}]   ;;  %s5071_s3 = inlined_call_operand.hbm [shape: bf16[96,32], index: 3, kind: input, shape index: {}]   ;;  %s5072_s4 = inlined_call_operand.hbm [shape: bf16[96,64], index: 4, kind: input, shape index: {}]   ;;  %s5073_s5 = inlined_call_operand.vmem [shape: bf16[320,64], index: 5, kind: input, shape index: {}]   ;;  %s5074_s6 = inlined_call_operand.vmem [shape: bf16[132,257], index: 6, kind: input, shape index: {}]   ;;  %s5075_s7 = inlined_call_operand.hbm [shape: bf16[68,129], index: 7, kind: input, shape index: {}]   ;;  %s5076_s8 = inlined_call_operand.hbm [shape: bf16[36,65], index: 8, kind: input, shape index: {}]   ;;  %s5077_s9 = inlined_call_operand.vmem [shape: bf16[20,33], index: 9, kind: input, shape index: {}]   ;;  %s5078_s10 = inlined_call_operand.vmem [shape: bf16[6,15], index: 10, kind: input, shape index: {}]   ;;  %s5079_s11 = inlined_call_operand.hbm [shape: bf16[192,32], index: 11, kind: input, shape index: {}]   ;;  %s5080_s12 = inlined_call_operand.hbm [shape: f32[8,128], index: 12, kind: input, shape index: {}]   ;;  %s5081_s13 = inlined_call_operand.hbm [shape: f32[2,32], index: 13, kind: output, shape index: {}]  }
   0x1   :  { %19 = vsyncpa [#allocation6], 0 }
   0x2   :  { %20 = vsyncpa [#allocation9], 0 }
   0x3   :  { %21 = vsyncpa [#allocation12], 0 }
   0x4   :  { %22 = vsyncpa [#allocation15], 0 }
   0x5   :  { %23 = vsyncpa [#allocation4], 0  ;;  %s43_s27 = sshll.u32 %s5070_s2, 4  ;;  %s4058_s28 = smov [#allocation5]   ;;  %s44_s27 = int_to_ptr.hbm [resolvable:$true] %s43_s27 }
   0x6   :  { %s45_s29 = sshll.u32 %s4058_s28, 4  ;;  %s69_s15 = sshll.u32 %s5072_s4, 4  ;;  %s46_s29 = int_to_ptr.vmem [resolvable:$true] %s45_s29  ;;  %s70_s15 = int_to_ptr.hbm [resolvable:$true] %s69_s15 }
   0x7   :  { %s4059_s16 = smov 64   ;;  %s4060_s17 = smov 4  }
   0x8   :  { %51 = dma.hbm_to_vmem [thread:$0]  %s44_s27, 384, %s46_s29, [#allocation6], %s4059_s16, %s4059_s16, %s4060_s17  }
   0x9   :  { %s4061_s18 = smov [#allocation8]   ;;  %s99_s2 = sshll.u32 %s5076_s8, 4  ;;  %s100_s2 = int_to_ptr.hbm [resolvable:$true] %s99_s2 }
   0xa   :  { %s71_s19 = sshll.u32 %s4061_s18, 4  ;;  %s30_s23 = sshll.u32 %s5069_s1, 4  ;;  %s72_s19 = int_to_ptr.vmem [resolvable:$true] %s71_s19  ;;  %s31_s23 = int_to_ptr.hbm [resolvable:$true] %s30_s23 }
   0xb   :  { %77 = dma.hbm_to_vmem [thread:$0]  %s70_s15, 768, %s72_s19, [#allocation9], %s4059_s16, %s4059_s16, %s4060_s17  }
   0xc   :  { %s4062_s24 = smov [#allocation11]   ;;  %s4063_s26 = smov [#allocation2]  }
   0xd   :  { %s101_s25 = sshll.u32 %s4062_s24, 4  ;;  %s32_s8 = sshll.u32 %s4063_s26, 4  ;;  %s102_s25 = int_to_ptr.vmem [resolvable:$true] %s101_s25  ;;  %s33_s8 = int_to_ptr.vmem [resolvable:$true] %s32_s8 }
   0xe   :  { %107 = dma.hbm_to_vmem [thread:$0]  %s100_s2, 320, %s102_s25, [#allocation12], %s4059_s16, %s4059_s16, %s4060_s17  }
   0xf   :  { %s56_s29 = sshll.u32 %s5071_s3, 4  ;;  %s86_s14 = sshll.u32 %s5075_s7, 4  ;;  %s57_s29 = int_to_ptr.hbm [resolvable:$true] %s56_s29  ;;  %s87_s14 = int_to_ptr.hbm [resolvable:$true] %s86_s14 }
  0x10   :  { %38 = dma.hbm_to_vmem [thread:$0]  %s31_s23, 192, %s33_s8, [#allocation3], %s4059_s16, %s4059_s16, %s4060_s17  }
  0x11   :  { %s4064_s15 = smov [#allocation7]   ;;  %s4065_s19 = smov [#allocation10]  }
  0x12   :  { %s58_s18 = sshll.u32 %s4064_s15, 4  ;;  %s88_s3 = sshll.u32 %s4065_s19, 4  ;;  %s59_s18 = int_to_ptr.vmem [resolvable:$true] %s58_s18  ;;  %s89_s3 = int_to_ptr.vmem [resolvable:$true] %s88_s3 }
  0x13   :  { %64 = dma.hbm_to_vmem [thread:$0]  %s57_s29, 768, %s59_s18, [#allocation6], %s4059_s16, %s4059_s16, %s4060_s17  }
  0x14   :  { %s4066_s20 = smov 128   ;;  %s4067_s21 = smov 8  }
  0x15   :  { %94 = dma.hbm_to_vmem [thread:$0]  %s87_s14, 1152, %s89_s3, [#allocation9], %s4066_s20, %s4066_s20, %s4067_s21  }
  0x16   :  { %s116_s22 = sshll.u32 %s5079_s11, 4  ;;  %s4068_s7 = smov [#allocation13]   ;;  %s117_s22 = int_to_ptr.hbm [resolvable:$true] %s116_s22 }
  0x17   :  { %s118_s23 = sshll.u32 %s4068_s7, 4  ;;  %s130_s26 = sshll.u32 %s5080_s12, 4  ;;  %s119_s23 = int_to_ptr.vmem [resolvable:$true] %s118_s23  ;;  %s131_s26 = int_to_ptr.hbm [resolvable:$true] %s130_s26 }
  0x18   :  { %124 = dma.hbm_to_vmem [thread:$0]  %s117_s22, 1536, %s119_s23, [#allocation12], %s4059_s16, %s4059_s16, %s4060_s17  }
  0x19   :  { %s4069_s8 = smov [#allocation14]  }
  0x1a   :  { %s132_s27 = sshll.u32 %s4069_s8, 4  ;;  %s133_s27 = int_to_ptr.vmem [resolvable:$true] %s132_s27 }
  0x1b   :  { %135 = dma.hbm_to_vmem [thread:$0]  %s131_s26, 128, %s133_s27, [#allocation15]  }
  0x1c   :  { %4046 = dma.done.wait [#allocation3], 192  }
  0x1d   :  { %4047 = vsyncadd [#allocation3], 4294967104 }
  0x1e   :  { %4048 = dma.done.wait [#allocation6], 1152  }
  0x1f   :  { %4049 = vsyncadd [#allocation6], 4294966144 }
  0x20   :  { %4050 = dma.done.wait [#allocation9], 1920  }
  0x21   :  { %4051 = vsyncadd [#allocation9], 4294965376 }
  0x22   :  { %4052 = dma.done.wait [#allocation12], 1856  }
  0x23   :  { %4053 = vsyncadd [#allocation12], 4294965440 }
  0x24   :  { %4054 = dma.done.wait [#allocation15], 128  }
  0x25   :  { %4055 = vsyncadd [#allocation15], 4294967168  ;;  %vm417_vm0 = vcmask 1042432   ;;  %v220_v0 = vld [vmem:[#allocation2] sm:$0x7]  ;;  %v171_v2 = vld [vmem:[%s5068_s0 + $0x8] sm:$0xff] }
  0x26   :  { %v170_v1 = vld [vmem:[%s5068_s0] sm:$0xff]  ;;  %v549_v3 = vsel %vm417_vm0, %v220_v0, 0  ;;  %v3730_v6 = vld [vmem:[#allocation2 + $0x4] sm:$0x10]  ;;  %v172_v7 = vld [vmem:[%s5068_s0 + $0x10] sm:$0xff]  ;;  %vm365_vm1 = vcmask 48128  }
  0x27   :  { %v203_v4 = vpack.c.bf16 %v171_v2, %v170_v1  ;;  %v3303_v5 = vld [vmem:[#allocation2 + $0x4] sm:$0xc]  ;;  %558 = vmatpush.bf16.msra.mxu1 %v549_v3  ;;  %v3265_v9 = vld [vmem:[#allocation2] sm:$0x8]  ;;  %v3729_v10 = vld [vmem:[#allocation2] sm:$0x30] }
  0x28   :  { %v3304_v8 = vor.u32 %v3730_v6, %v3303_v5  ;;  %v173_v11 = vld [vmem:[%s5068_s0 + $0x18] sm:$0xff]  ;;  %v3266_v12 = vor.u32 %v3729_v10, %v3265_v9  ;;  %vm663_vm2 = vcmask 1046528   ;;  %vm223_vm3 = vsmask.f32 7424  ;;  %v174_v27 = vld [vmem:[%s5068_s0 + $0x20] sm:$0xff]  ;;  %v175_v28 = vld [vmem:[%s5068_s0 + $0x28] sm:$0xff] }
  0x29   :  { %v204_v13 = vpack.c.bf16 %v173_v11, %v172_v7  ;;  %v664_v14 = vrot.slane %v203_v4, 1  ;;  %v225_v16 = vshrl.u32 %v203_v4, 16  ;;  %v227_v17 = vshll.u32 %v203_v4, 16  ;;  %v176_v38 = vld [vmem:[%s5068_s0 + $0x30] sm:$0xff]  ;;  %v177_v39 = vld [vmem:[%s5068_s0 + $0x38] sm:$0xff]  ;;  %v178_v48 = vld [vmem:[%s5068_s0 + $0x40] sm:$0xff] }
  0x2a   :  { %v702_v15 = vrot.slane %v3304_v8, 2  ;;  %3284 = vmatmul.msk.bf16.vlgmr.msra.gmra.mxu1 %vm365_vm1, %v203_v4  ;;  %v364_v18 = vrot.slane %v3266_v12, 3  ;;  %v205_v30 = vpack.c.bf16 %v175_v28, %v174_v27  ;;  %v206_v40 = vpack.c.bf16 %v177_v39, %v176_v38  ;;  %v179_v49 = vld [vmem:[%s5068_s0 + $0x48] sm:$0xff]  ;;  %v180_v58 = vld [vmem:[%s5068_s0 + $0x50] sm:$0xff]  ;;  %v181_v59 = vld [vmem:[%s5068_s0 + $0x58] sm:$0xff]  ;;  %s3249_s28 = sshll.u32 %s5081_s13, 4  ;;  %s3250_s28 = int_to_ptr.hbm [resolvable:$true] %s3249_s28 }
  0x2b   :  { %v665_v19 = vrot.slane %v204_v13, 1  ;;  %v232_v20 = vshll.u32 %v204_v13, 16  ;;  %v229_v22 = vrot.slane %v227_v17, 1  ;;  %v236_v31 = vshrl.u32 %v204_v13, 16  ;;  %v182_v4 = vld [vmem:[%s5068_s0 + $0x60] sm:$0xff]  ;;  %v183_v5 = vld [vmem:[%s5068_s0 + $0x68] sm:$0xff] }
  0x2c   :  { %v755_v21 = vsel %vm417_vm0, %v702_v15, 0  ;;  %v419_v23 = vsel %vm417_vm0, %v364_v18, 0  ;;  %v240_v32 = vshll.u32 %v205_v30, 16  ;;  %v667_v33 = vrot.slane %v205_v30, 1  ;;  %v185_v15 = vld [vmem:[%s5068_s0 + $0x78] sm:$0xff] }
  0x2d   :  { %764 = vmatpush.bf16.msra.mxu2 %v755_v21  ;;  %v666_v24 = vsel %vm663_vm2, %v664_v14, %v665_v19  ;;  %v234_v25 = vrot.slane %v232_v20, 1  ;;  %428 = vmatpush.bf16.msra.mxu0 %v419_v23  ;;  %v230_v26 = vor.u32 %v229_v22, %v225_v16  ;;  %v244_v41 = vshrl.u32 %v205_v30, 16  ;;  %v184_v14 = vld [vmem:[%s5068_s0 + $0x70] sm:$0xff] }
  0x2e   :  { %v242_v35 = vrot.slane %v240_v32, 1  ;;  %v668_v36 = vsel %vm663_vm2, %v665_v19, %v667_v33  ;;  %v248_v42 = vshll.u32 %v206_v40, 16  ;;  %v669_v43 = vrot.slane %v206_v40, 1 }
  0x2f   :  { %v235_v29 = vsel %vm223_vm3, %v230_v26, %v234_v25  ;;  %v238_v34 = vor.u32 %v236_v31, %v234_v25  ;;  %v207_v50 = vpack.c.bf16 %v179_v49, %v178_v48  ;;  %v252_v51 = vshrl.u32 %v206_v40, 16  ;;  %v187_v25 = vld [vmem:[%s5068_s0 + $0x88] sm:$0xff]  ;;  %v190_v48 = vld [vmem:[%s5068_s0 + $0xa0] sm:$0xff] }
  0x30   :  { %3305 = vmatmul.msk.bf16.vlgmr.msra.gmra.mxu2 %vm365_vm1, %v666_v24  ;;  %3267 = vmatmul.msk.bf16.vlgmr.msra.gmra.mxu0 %vm365_vm1, %v235_v29  ;;  %v246_v44 = vor.u32 %v244_v41, %v242_v35  ;;  %v250_v45 = vrot.slane %v248_v42, 1  ;;  %v670_v46 = vsel %vm663_vm2, %v667_v33, %v669_v43  ;;  %v208_v60 = vpack.c.bf16 %v181_v59, %v180_v58  ;;  %v186_v24 = vld [vmem:[%s5068_s0 + $0x80] sm:$0xff]  ;;  %v191_v49 = vld [vmem:[%s5068_s0 + $0xa8] sm:$0xff] }
  0x31   :  { %v243_v37 = vsel %vm223_vm3, %v238_v34, %v242_v35  ;;  %v256_v52 = vshll.u32 %v207_v50, 16  ;;  %v671_v53 = vrot.slane %v207_v50, 1  ;;  %v260_v61 = vshrl.u32 %v207_v50, 16  ;;  %v188_v34 = vld [vmem:[%s5068_s0 + $0x90] sm:$0xff]  ;;  %v189_v35 = vld [vmem:[%s5068_s0 + $0x98] sm:$0xff] }
  0x32   :  { %v251_v47 = vsel %vm223_vm3, %v246_v44, %v250_v45  ;;  %v254_v54 = vor.u32 %v252_v51, %v250_v45  ;;  %v264_v62 = vshll.u32 %v208_v60, 16  ;;  %v673_v63 = vrot.slane %v208_v60, 1 }
  0x33   :  { %v258_v55 = vrot.slane %v256_v52, 1  ;;  %v672_v56 = vsel %vm663_vm2, %v669_v43, %v671_v53  ;;  %v209_v6 = vpack.c.bf16 %v183_v5, %v182_v4  ;;  %v268_v7 = vshrl.u32 %v208_v60, 16 }
  0x34   :  { %v266_v1 = vrot.slane %v264_v62, 1  ;;  %v674_v2 = vsel %vm663_vm2, %v671_v53, %v673_v63  ;;  %v210_v16 = vpack.c.bf16 %v185_v15, %v184_v14  ;;  %v211_v26 = vpack.c.bf16 %v187_v25, %v186_v24 }
  0x35   :  { %v259_v57 = vsel %vm223_vm3, %v254_v54, %v258_v55  ;;  %v262_v0 = vor.u32 %v260_v61, %v258_v55  ;;  %v272_v8 = vshll.u32 %v209_v6, 16  ;;  %v675_v9 = vrot.slane %v209_v6, 1 }
  0x36   :  { %v270_v10 = vor.u32 %v268_v7, %v266_v1  ;;  %v276_v17 = vshrl.u32 %v209_v6, 16  ;;  %v280_v18 = vshll.u32 %v210_v16, 16  ;;  %v677_v19 = vrot.slane %v210_v16, 1 }
  0x37   :  { %v267_v3 = vsel %vm223_vm3, %v262_v0, %v266_v1  ;;  %v274_v11 = vrot.slane %v272_v8, 1  ;;  %v676_v12 = vsel %vm663_vm2, %v673_v63, %v675_v9  ;;  %v284_v27 = vshrl.u32 %v210_v16, 16 }
  0x38   :  { %v282_v21 = vrot.slane %v280_v18, 1  ;;  %v678_v22 = vsel %vm663_vm2, %v675_v9, %v677_v19  ;;  %v288_v28 = vshll.u32 %v211_v26, 16  ;;  %v679_v29 = vrot.slane %v211_v26, 1 }
  0x39   :  { %v278_v20 = vor.u32 %v276_v17, %v274_v11  ;;  %v213_v53 = vpack.c.bf16 %v191_v49, %v190_v48  ;;  %vm1324_vm4 = vcmask 1040384   ;;  %vm1296_vm5 = vcmask 7168  }
  0x3a   :  { %3285 = vmatmul.msk.bf16.gmra.mxu1 %vm365_vm1, %v204_v13  ;;  %v275_v13 = vsel %vm223_vm3, %v270_v10, %v274_v11  ;;  %v290_v31 = vrot.slane %v288_v28, 1  ;;  %v680_v32 = vsel %vm663_vm2, %v677_v19, %v679_v29  ;;  %v192_v10 = vld [vmem:[%s5068_s0 + $0xb0] sm:$0xff]  ;;  %v193_v11 = vld [vmem:[%s5068_s0 + $0xb8] sm:$0xff]  ;;  %vm1579_vm6 = vcmask 130048  }
  0x3b   :  { %v283_v23 = vsel %vm223_vm3, %v278_v20, %v282_v21  ;;  %vm2195_vm7 = vcmask 261120   ;;  %vm2472_vm8 = vcmask 531456   ;;  %vm2737_vm9 = vcmask 269312  }
  0x3c   :  { %vm2819_vm10 = vcmask 523264   ;;  %vm3002_vm11 = vcmask 1045504   ;;  %vm2941_vm12 = vsmask.f32 6400  ;;  %vm3069_vm13 = vcmask 1047552  }
  0x3d   :  { %vm3065_vm14 = vcmask 121856   ;;  %vm3240_vm15 = vcmask 254976  }
  0x40   :  { %3306 = vmatmul.msk.bf16.gmra.mxu2 %vm365_vm1, %v668_v36  ;;  %3268 = vmatmul.msk.bf16.gmra.mxu0 %vm365_vm1, %v243_v37  ;;  %v212_v36 = vpack.c.bf16 %v189_v35, %v188_v34  ;;  %v292_v37 = vshrl.u32 %v211_v26, 16 }
  0x42   :  { %v296_v38 = vshll.u32 %v212_v36, 16  ;;  %v294_v41 = vor.u32 %v292_v37, %v290_v31 }
  0x44   :  { %v298_v42 = vrot.slane %v296_v38, 1 }
  0x46   :  { %v299_v45 = vsel %vm223_vm3, %v294_v41, %v298_v42 }
  0x4a   :  { %3286 = vmatmul.msk.bf16.gmra.mxu1 %vm365_vm1, %v205_v30  ;;  %v286_v30 = vor.u32 %v284_v27, %v282_v21  ;;  %v308_v21 = vshrl.u32 %v213_v53, 16 }
  0x4c   :  { %v291_v33 = vsel %vm223_vm3, %v286_v30, %v290_v31 }
  0x50   :  { %3307 = vmatmul.msk.bf16.gmra.mxu2 %vm365_vm1, %v670_v46  ;;  %3269 = vmatmul.msk.bf16.gmra.mxu0 %vm365_vm1, %v251_v47 }
  0x5a   :  { %3287 = vmatmul.msk.bf16.gmra.mxu1 %vm365_vm1, %v206_v40  ;;  %v681_v40 = vrot.slane %v212_v36, 1 }
  0x5c   :  { %v682_v43 = vsel %vm663_vm2, %v679_v29, %v681_v40 }
  0x60   :  { %3308 = vmatmul.msk.bf16.gmra.mxu2 %vm365_vm1, %v672_v56  ;;  %3270 = vmatmul.msk.bf16.gmra.mxu0 %vm365_vm1, %v259_v57  ;;  %v300_v56 = vshrl.u32 %v212_v36, 16  ;;  %v304_v57 = vshll.u32 %v213_v53, 16 }
  0x62   :  { %v302_v62 = vor.u32 %v300_v56, %v298_v42  ;;  %v306_v63 = vrot.slane %v304_v57, 1  ;;  %v194_v42 = vld [vmem:[%s5068_s0 + $0xc0] sm:$0xff] }
  0x64   :  { %v310_v28 = vor.u32 %v308_v21, %v306_v63 }
  0x6a   :  { %3288 = vmatmul.msk.bf16.gmra.mxu1 %vm365_vm1, %v207_v50  ;;  %v169_v50 = vld [vmem:[#allocation14] sm:$0xff] }
  0x6b   :  { %v4299_v54 = vperm.slane %v169_v50, 0 }
  0x70   :  { %3309 = vmatmul.msk.bf16.gmra.mxu2 %vm365_vm1, %v674_v2  ;;  %3271 = vmatmul.msk.bf16.gmra.mxu0 %vm365_vm1, %v267_v3 }
  0x7a   :  { %3289 = vmatmul.msk.bf16.gmra.mxu1 %vm365_vm1, %v208_v60  ;;  %v683_v60 = vrot.slane %v213_v53, 1 }
  0x7c   :  { %v684_v2 = vsel %vm663_vm2, %v681_v40, %v683_v60 }
  0x80   :  { %3310 = vmatmul.msk.bf16.gmra.mxu2 %vm365_vm1, %v676_v12  ;;  %3272 = vmatmul.msk.bf16.gmra.mxu0 %vm365_vm1, %v275_v13 }
  0x8a   :  { %3290 = vmatmul.msk.bf16.gmra.mxu1 %vm365_vm1, %v209_v6  ;;  %v307_v6 = vsel %vm223_vm3, %v302_v62, %v306_v63 }
  0x90   :  { %3311 = vmatmul.msk.bf16.gmra.mxu2 %vm365_vm1, %v678_v22  ;;  %3273 = vmatmul.msk.bf16.gmra.mxu0 %vm365_vm1, %v283_v23 }
  0x9a   :  { %3291 = vmatmul.msk.bf16.gmra.mxu1 %vm365_vm1, %v210_v16  ;;  %v214_v16 = vpack.c.bf16 %v193_v11, %v192_v10  ;;  %v196_v10 = vld [vmem:[%s5068_s0 + $0xd0] sm:$0xff]  ;;  %v197_v11 = vld [vmem:[%s5068_s0 + $0xd8] sm:$0xff] }
  0x9c   :  { %v312_v22 = vshll.u32 %v214_v16, 16 }
  0x9e   :  { %v314_v29 = vrot.slane %v312_v22, 1 }
  0xa0   :  { %3312 = vmatmul.msk.bf16.gmra.mxu2 %vm365_vm1, %v680_v32  ;;  %3274 = vmatmul.msk.bf16.gmra.mxu0 %vm365_vm1, %v291_v33  ;;  %v315_v37 = vsel %vm223_vm3, %v310_v28, %v314_v29 }
  0xa7   :  { %v560_v39 = vpop.f32.mrf.mxu1 }
  0xaa   :  { %3292 = vmatmul.msk.bf16.gmra.mxu1 %vm365_vm1, %v211_v26  ;;  %v685_v26 = vrot.slane %v214_v16, 1 }
  0xac   :  { %v686_v33 = vsel %vm663_vm2, %v683_v60, %v685_v26 }
  0xad   :  { %v430_v44 = vpop.f32.mrf.mxu0 }
  0xae   :  { %v561_v46 = vadd.f32 %v560_v39, %v430_v44 }
  0xaf   :  { %v562_v47 = vpop.f32.mrf.mxu1 }
  0xb0   :  { %3313 = vmatmul.msk.bf16.gmra.mxu2 %vm365_vm1, %v682_v43  ;;  %3275 = vmatmul.msk.bf16.gmra.mxu0 %vm365_vm1, %v299_v45  ;;  %v195_v43 = vld [vmem:[%s5068_s0 + $0xc8] sm:$0xff] }
  0xb3   :  { %v766_v51 = vpop.f32.mrf.mxu2 }
  0xb4   :  { %v850_v52 = vadd.f32 %v766_v51, %v561_v46 }
  0xb5   :  { %v432_v55 = vpop.f32.mrf.mxu0 }
  0xb6   :  { %v563_v58 = vadd.f32 %v562_v47, %v432_v55  ;;  %v884_v61 = vadd.f32 %v4299_v54, %v850_v52  ;;  %v215_v47 = vpack.c.bf16 %v195_v43, %v194_v42  ;;  %v316_v52 = vshrl.u32 %v214_v16, 16 }
  0xb7   :  { %v565_v59 = vpop.f32.mrf.mxu1 }
  0xb8   :  { %v917_v3 = vmax.f32 %v884_v61, 0.0  ;;  %v318_v60 = vor.u32 %v316_v52, %v314_v29  ;;  %v324_v21 = vshrl.u32 %v215_v47, 16 }
  0xba   :  { %3293 = vmatmul.msk.bf16.gmra.mxu1 %vm365_vm1, %v212_v36  ;;  %v984_v12 = vrot.slane %v917_v3, 1 }
  0xbb   :  { %v768_v0 = vpop.f32.mrf.mxu2 }
  0xbc   :  { %v851_v1 = vadd.f32 %v768_v0, %v563_v58  ;;  %v687_v58 = vrot.slane %v215_v47, 1 }
  0xbd   :  { %v435_v5 = vpop.f32.mrf.mxu0 }
  0xbe   :  { %v885_v4 = vadd.f32 %v4299_v54, %v851_v1  ;;  %v566_v7 = vadd.f32 %v565_v59, %v435_v5  ;;  %v688_v1 = vsel %vm663_vm2, %v685_v26, %v687_v58 }
  0xbf   :  { %v567_v9 = vpop.f32.mrf.mxu1 }
  0xc0   :  { %v918_v8 = vmax.f32 %v885_v4, 0.0  ;;  %3314 = vmatmul.msk.bf16.gmra.mxu2 %vm365_vm1, %v684_v2  ;;  %3276 = vmatmul.msk.bf16.gmra.mxu0 %vm365_vm1, %v307_v6 }
  0xc2   :  { %v985_v13 = vrot.slane %v918_v8, 1 }
  0xc3   :  { %v771_v14 = vpop.f32.mrf.mxu2 }
  0xc4   :  { %v852_v15 = vadd.f32 %v771_v14, %v566_v7  ;;  %v986_v17 = vsel %vm663_vm2, %v984_v12, %v985_v13 }
  0xc5   :  { %v4315_v18 = vmax.f32 %v917_v3, %v986_v17  ;;  %v437_v20 = vpop.f32.mrf.mxu0 }
  0xc6   :  { %v886_v19 = vadd.f32 %v4299_v54, %v852_v15  ;;  %v568_v23 = vadd.f32 %v567_v9, %v437_v20  ;;  %v216_v15 = vpack.c.bf16 %v197_v11, %v196_v10 }
  0xc7   :  { %v570_v25 = vpop.f32.mrf.mxu1 }
  0xc8   :  { %v919_v24 = vmax.f32 %v886_v19, 0.0  ;;  %v328_v22 = vshll.u32 %v216_v15, 16  ;;  %v689_v26 = vrot.slane %v216_v15, 1 }
  0xca   :  { %v987_v27 = vrot.slane %v919_v24, 1  ;;  %3294 = vmatmul.msk.bf16.gmra.mxu1 %vm365_vm1, %v213_v53  ;;  %v320_v53 = vshll.u32 %v215_v47, 16  ;;  %v330_v29 = vrot.slane %v328_v22, 1 }
  0xcb   :  { %v773_v30 = vpop.f32.mrf.mxu2 }
  0xcc   :  { %v853_v31 = vadd.f32 %v773_v30, %v568_v23  ;;  %v988_v32 = vsel %vm663_vm2, %v985_v13, %v987_v27  ;;  %v322_v61 = vrot.slane %v320_v53, 1 }
  0xcd   :  { %v4321_v34 = vmax.f32 %v918_v8, %v988_v32  ;;  %v440_v36 = vpop.f32.mrf.mxu0 }
  0xce   :  { %v887_v35 = vadd.f32 %v4299_v54, %v853_v31  ;;  %v571_v38 = vadd.f32 %v570_v25, %v440_v36  ;;  %v323_v5 = vsel %vm223_vm3, %v318_v60, %v322_v61  ;;  %v326_v28 = vor.u32 %v324_v21, %v322_v61 }
  0xcf   :  { %v572_v40 = vpop.f32.mrf.mxu1  ;;  %v1115_v41 = vpack.c.bf16 %v4321_v34, %v4315_v18 }
  0xd0   :  { %v920_v39 = vmax.f32 %v887_v35, 0.0  ;;  %3315 = vmatmul.msk.bf16.gmra.mxu2 %vm365_vm1, %v686_v33  ;;  %3277 = vmatmul.msk.bf16.gmra.mxu0 %vm365_vm1, %v315_v37  ;;  %v690_v33 = vsel %vm663_vm2, %v687_v58, %v689_v26 }
  0xd2   :  { %v989_v44 = vrot.slane %v920_v39, 1 }
  0xd3   :  { %v776_v45 = vpop.f32.mrf.mxu2 }
  0xd4   :  { %v854_v46 = vadd.f32 %v776_v45, %v571_v38  ;;  %v990_v48 = vsel %vm663_vm2, %v987_v27, %v989_v44  ;;  %v331_v38 = vsel %vm223_vm3, %v326_v28, %v330_v29  ;;  %v199_v45 = vld [vmem:[%s5068_s0 + $0xe8] sm:$0xff] }
  0xd5   :  { %v4336_v49 = vmax.f32 %v919_v24, %v990_v48  ;;  %v442_v51 = vpop.f32.mrf.mxu0 }
  0xd6   :  { %v888_v50 = vadd.f32 %v4299_v54, %v854_v46  ;;  %v573_v55 = vadd.f32 %v572_v40, %v442_v51 }
  0xd7   :  { %v575_v57 = vpop.f32.mrf.mxu1 }
  0xd8   :  { %v921_v56 = vmax.f32 %v888_v50, 0.0 }
  0xda   :  { %v991_v59 = vrot.slane %v921_v56, 1  ;;  %3295 = vmatmul.msk.bf16.gmra.mxu1 %vm365_vm1, %v214_v16 }
  0xdb   :  { %v778_v62 = vpop.f32.mrf.mxu2 }
  0xdc   :  { %v855_v63 = vadd.f32 %v778_v62, %v573_v55  ;;  %v992_v0 = vsel %vm663_vm2, %v989_v44, %v991_v59  ;;  %v198_v44 = vld [vmem:[%s5068_s0 + $0xe0] sm:$0xff] }
  0xdd   :  { %v4342_v2 = vmax.f32 %v920_v39, %v992_v0  ;;  %v445_v4 = vpop.f32.mrf.mxu0  ;;  %v217_v50 = vpack.c.bf16 %v199_v45, %v198_v44 }
  0xde   :  { %v889_v3 = vadd.f32 %v4299_v54, %v855_v63  ;;  %v576_v6 = vadd.f32 %v575_v57, %v445_v4 }
  0xdf   :  { %v577_v8 = vpop.f32.mrf.mxu1  ;;  %v1116_v9 = vpack.c.bf16 %v4342_v2, %v4336_v49  ;;  %v336_v57 = vshll.u32 %v217_v50, 16  ;;  %v691_v61 = vrot.slane %v217_v50, 1 }
  0xe0   :  { %v922_v7 = vmax.f32 %v889_v3, 0.0  ;;  %3316 = vmatmul.msk.bf16.gmra.mxu2 %vm365_vm1, %v688_v1  ;;  %3278 = vmatmul.msk.bf16.gmra.mxu0 %vm365_vm1, %v323_v5 }
  0xe1   :  { %v338_v0 = vrot.slane %v336_v57, 1  ;;  %v692_v5 = vsel %vm663_vm2, %v689_v26, %v691_v61 }
  0xe2   :  { %v993_v12 = vrot.slane %v922_v7, 1 }
  0xe3   :  { %v781_v13 = vpop.f32.mrf.mxu2 }
  0xe4   :  { %v856_v14 = vadd.f32 %v781_v13, %v576_v6  ;;  %v994_v16 = vsel %vm663_vm2, %v991_v59, %v993_v12 }
  0xe5   :  { %v4357_v17 = vmax.f32 %v921_v56, %v994_v16  ;;  %v447_v20 = vpop.f32.mrf.mxu0  ;;  %v332_v56 = vshrl.u32 %v216_v15, 16  ;;  %v201_v16 = vld [vmem:[%s5068_s0 + $0xf8] sm:$0xff] }
  0xe6   :  { %v890_v19 = vadd.f32 %v4299_v54, %v856_v14  ;;  %v578_v23 = vadd.f32 %v577_v8, %v447_v20 }
  0xe7   :  { %v580_v25 = vpop.f32.mrf.mxu1  ;;  %v334_v63 = vor.u32 %v332_v56, %v330_v29 }
  0xe8   :  { %v923_v24 = vmax.f32 %v890_v19, 0.0 }
  0xe9   :  { %v339_v10 = vsel %vm223_vm3, %v334_v63, %v338_v0 }
  0xea   :  { %v995_v27 = vrot.slane %v923_v24, 1  ;;  %3296 = vmatmul.msk.bf16.gmra.mxu1 %vm365_vm1, %v215_v47 }
  0xeb   :  { %v783_v30 = vpop.f32.mrf.mxu2 }
  0xec   :  { %v857_v31 = vadd.f32 %v783_v30, %v578_v23  ;;  %v996_v32 = vsel %vm663_vm2, %v993_v12, %v995_v27 }
  0xed   :  { %v4363_v35 = vmax.f32 %v922_v7, %v996_v32  ;;  %v450_v37 = vpop.f32.mrf.mxu0 }
  0xee   :  { %v891_v36 = vadd.f32 %v4299_v54, %v857_v31  ;;  %v581_v39 = vadd.f32 %v580_v25, %v450_v37 }
  0xef   :  { %v582_v42 = vpop.f32.mrf.mxu1  ;;  %v1117_v43 = vpack.c.bf16 %v4363_v35, %v4357_v17  ;;  %v3732_v17 = vld [vmem:[%s5074_s6 + $0x8] sm:$0xf0] }
  0xf0   :  { %v924_v40 = vmax.f32 %v891_v36, 0.0  ;;  %3317 = vmatmul.msk.bf16.gmra.mxu2 %vm365_vm1, %v690_v33  ;;  %3279 = vmatmul.msk.bf16.gmra.mxu0 %vm365_vm1, %v331_v38 }
  0xf2   :  { %v997_v46 = vrot.slane %v924_v40, 1 }
  0xf3   :  { %v786_v47 = vpop.f32.mrf.mxu2 }
  0xf4   :  { %v858_v48 = vadd.f32 %v786_v47, %v581_v39  ;;  %v998_v51 = vsel %vm663_vm2, %v995_v27, %v997_v46  ;;  %v340_v27 = vshrl.u32 %v217_v50, 16  ;;  %v202_v47 = vld [vmem:[%s5068_s0 + $0x100] sm:$0xf] }
  0xf5   :  { %v4378_v52 = vmax.f32 %v923_v24, %v998_v51  ;;  %v452_v55 = vpop.f32.mrf.mxu0 }
  0xf6   :  { %v892_v53 = vadd.f32 %v4299_v54, %v858_v48  ;;  %v583_v58 = vadd.f32 %v582_v42, %v452_v55  ;;  %v342_v33 = vor.u32 %v340_v27, %v338_v0 }
  0xf7   :  { %v585_v60 = vpop.f32.mrf.mxu1 }
  0xf8   :  { %v925_v59 = vmax.f32 %v892_v53, 0.0 }
  0xfa   :  { %v999_v62 = vrot.slane %v925_v59, 1  ;;  %3297 = vmatmul.msk.bf16.gmra.mxu1 %vm365_vm1, %v216_v15  ;;  %v200_v15 = vld [vmem:[%s5068_s0 + $0xf0] sm:$0xff] }
  0xfb   :  { %v788_v1 = vpop.f32.mrf.mxu2  ;;  %v218_v22 = vpack.c.bf16 %v201_v16, %v200_v15 }
  0xfc   :  { %v859_v3 = vadd.f32 %v788_v1, %v583_v58  ;;  %v1000_v4 = vsel %vm663_vm2, %v997_v46, %v999_v62 }
  0xfd   :  { %v4384_v6 = vmax.f32 %v924_v40, %v1000_v4  ;;  %v455_v8 = vpop.f32.mrf.mxu0  ;;  %v344_v28 = vshll.u32 %v218_v22, 16  ;;  %v693_v31 = vrot.slane %v218_v22, 1  ;;  %v348_v53 = vshrl.u32 %v218_v22, 16 }
  0xfe   :  { %v893_v7 = vadd.f32 %v4299_v54, %v859_v3  ;;  %v586_v12 = vadd.f32 %v585_v60, %v455_v8 }
  0xff   :  { %v4389_v13 = vpop.f32.mrf.mxu1  ;;  %v1118_v14 = vpack.c.bf16 %v4384_v6, %v4378_v52  ;;  %v346_v36 = vrot.slane %v344_v28, 1  ;;  %v694_v39 = vsel %vm663_vm2, %v691_v61, %v693_v31  ;;  %v3324_v52 = vld [vmem:[%s5074_s6] sm:$0xf] }
 0x100   :  { %v926_v11 = vmax.f32 %v893_v7, 0.0  ;;  %3318 = vmatmul.msk.bf16.gmra.mxu2 %vm365_vm1, %v692_v5  ;;  %3280 = vmatmul.msk.bf16.gmra.mxu0 %vm365_vm1, %v339_v10 }
 0x101   :  { %v347_v44 = vsel %vm223_vm3, %v342_v33, %v346_v36  ;;  %v350_v58 = vor.u32 %v348_v53, %v346_v36 }
 0x102   :  { %v1001_v19 = vrot.slane %v926_v11, 1 }
 0x103   :  { %v791_v20 = vpop.f32.mrf.mxu2 }
 0x104   :  { %v860_v21 = vadd.f32 %v791_v20, %v586_v12  ;;  %v1002_v23 = vsel %vm663_vm2, %v999_v62, %v1001_v19 }
 0x105   :  { %v4401_v24 = vmax.f32 %v925_v59, %v1002_v23  ;;  %v457_v26 = vpop.f32.mrf.mxu0 }
 0x106   :  { %v4404_v25 = vadd.f32 %v4299_v54, %v860_v21  ;;  %v588_v23 = vadd.f32 %v4389_v13, %v457_v26 }
 0x107   :  { %v590_v30 = vpop.f32.mrf.mxu1 }
 0x108   :  { %v927_v29 = vmax.f32 %v4404_v25, 0.0 }
 0x10a   :  { %v4409_v32 = vrot.slane %v927_v29, 1  ;;  %3298 = vmatmul.msk.bf16.gmra.mxu1 %vm365_vm1, %v217_v50  ;;  %v219_v50 = vpack.c.bf16 %v202_v47, %v202_v47 }
 0x10b   :  { %v793_v37 = vpop.f32.mrf.mxu2 }
 0x10c   :  { %v1004_v38 = vsel %vm663_vm2, %v1001_v19, %v4409_v32  ;;  %v352_v55 = vshll.u32 %v219_v50, 16  ;;  %v695_v57 = vrot.slane %v219_v50, 1  ;;  %v356_v7 = vshrl.u32 %v219_v50, 16 }
 0x10d   :  { %v4415_v40 = vmax.f32 %v926_v11, %v1004_v38  ;;  %v460_v42 = vpop.f32.mrf.mxu0  ;;  %v861_v36 = vadd.f32 %v793_v37, %v588_v23 }
 0x10e   :  { %v354_v59 = vrot.slane %v352_v55, 1  ;;  %v696_v61 = vsel %vm663_vm2, %v693_v31, %v695_v57  ;;  %v591_v11 = vadd.f32 %v590_v30, %v460_v42 }
 0x10f   :  { %v1119_v45 = vpack.c.bf16 %v4415_v40, %v4401_v24  ;;  %v592_v46 = vpop.f32.mrf.mxu1  ;;  %v895_v13 = vadd.f32 %v4299_v54, %v861_v36 }
 0x110   :  { %3319 = vmatmul.msk.bf16.gmra.mxu2 %vm365_vm1, %v694_v39  ;;  %3281 = vmatmul.msk.bf16.gmra.mxu0 %vm365_vm1, %v347_v44  ;;  %v355_v63 = vsel %vm223_vm3, %v350_v58, %v354_v59  ;;  %v358_v19 = vor.u32 %v356_v7, %v354_v59 }
 0x113   :  { %v796_v48 = vpop.f32.mrf.mxu2 }
 0x114   :  { %v862_v27 = vadd.f32 %v796_v48, %v591_v11 }
 0x115   :  { %v462_v51 = vpop.f32.mrf.mxu0 }
 0x116   :  { %v593_v12 = vadd.f32 %v592_v46, %v462_v51  ;;  %v896_v42 = vadd.f32 %v4299_v54, %v862_v27 }
 0x117   :  { %v595_v56 = vpop.f32.mrf.mxu1 }
 0x118   :  { %v929_v51 = vmax.f32 %v896_v42, 0.0 }
 0x11a   :  { %3299 = vmatmul.msk.bf16.gmra.mxu1 %vm365_vm1, %v218_v22 }
 0x11b   :  { %v798_v60 = vpop.f32.mrf.mxu2 }
 0x11c   :  { %v863_v20 = vadd.f32 %v798_v60, %v593_v12 }
 0x11d   :  { %v465_v62 = vpop.f32.mrf.mxu0 }
 0x11e   :  { %v596_v4 = vadd.f32 %v595_v56, %v465_v62  ;;  %v897_v30 = vadd.f32 %v4299_v54, %v863_v20  ;;  %v928_v56 = vmax.f32 %v895_v13, 0.0  ;;  %v1007_v62 = vrot.slane %v929_v51, 1 }
 0x11f   :  { %v597_v0 = vpop.f32.mrf.mxu1 }
 0x120   :  { %3320 = vmatmul.msk.bf16.gmra.mxu2 %vm365_vm1, %v696_v61  ;;  %3282 = vmatmul.msk.bf16.gmra.mxu0 %vm365_vm1, %v355_v63  ;;  %v930_v26 = vmax.f32 %v897_v30, 0.0 }
 0x123   :  { %v801_v1 = vpop.f32.mrf.mxu2 }
 0x124   :  { %v864_v15 = vadd.f32 %v801_v1, %v596_v4 }
 0x125   :  { %v467_v3 = vpop.f32.mrf.mxu0 }
 0x126   :  { %v598_v8 = vadd.f32 %v597_v0, %v467_v3  ;;  %v898_v28 = vadd.f32 %v4299_v54, %v864_v15 }
 0x127   :  { %v600_v5 = vpop.f32.mrf.mxu1 }
 0x128   :  { %v931_v44 = vmax.f32 %v898_v28, 0.0 }
 0x12a   :  { %3300 = vmatmul.msk.bf16.gmra.mxu1 %vm365_vm1, %v219_v50  ;;  %v1011_v53 = vrot.slane %v931_v44, 1 }
 0x12b   :  { %v803_v10 = vpop.f32.mrf.mxu2 }
 0x12c   :  { %v865_v16 = vadd.f32 %v803_v10, %v598_v8 }
 0x12d   :  { %v470_v22 = vpop.f32.mrf.mxu0 }
 0x12e   :  { %v899_v21 = vadd.f32 %v4299_v54, %v865_v16  ;;  %v601_v31 = vadd.f32 %v600_v5, %v470_v22  ;;  %v1005_v5 = vrot.slane %v928_v56, 1 }
 0x12f   :  { %v602_v33 = vpop.f32.mrf.mxu1 }
 0x130   :  { %3321 = vmatmul.msk.bf16.gmra.mxu2 %vm365_vm1, %v695_v57  ;;  %3283 = vmatmul.msk.bf16.gmra.mxu0 %vm365_vm1, %v358_v19  ;;  %v932_v38 = vmax.f32 %v899_v21, 0.0  ;;  %v1009_v57 = vrot.slane %v930_v26, 1  ;;  %v1008_v20 = vsel %vm663_vm2, %v1005_v5, %v1007_v62  ;;  %v1006_v23 = vsel %vm663_vm2, %v4409_v32, %v1005_v5 }
 0x131   :  { %v1092_v30 = vmax.f32 %v927_v29, %v1006_v23 }
 0x132   :  { %v1013_v50 = vrot.slane %v932_v38, 1  ;;  %v1012_v1 = vsel %vm663_vm2, %v1009_v57, %v1011_v53  ;;  %v1010_v10 = vsel %vm663_vm2, %v1007_v62, %v1009_v57  ;;  %v3325_v62 = vor.u32 %v3732_v17, %v3324_v52 }
 0x133   :  { %v806_v39 = vpop.f32.mrf.mxu2  ;;  %v1095_v15 = vmax.f32 %v930_v26, %v1012_v1  ;;  %v1094_v21 = vmax.f32 %v929_v51, %v1010_v10 }
 0x134   :  { %v866_v46 = vadd.f32 %v806_v39, %v601_v31  ;;  %v1014_v60 = vsel %vm663_vm2, %v1011_v53, %v1013_v50  ;;  %v1093_v31 = vmax.f32 %v928_v56, %v1008_v20 }
 0x135   :  { %v472_v48 = vpop.f32.mrf.mxu0  ;;  %v1096_v3 = vmax.f32 %v931_v44, %v1014_v60  ;;  %v1121_v28 = vpack.c.bf16 %v1095_v15, %v1094_v21  ;;  %v3336_v15 = vld [vmem:[%s5074_s6 + $0x18] sm:$0xf] }
 0x136   :  { %v900_v47 = vadd.f32 %v4299_v54, %v866_v46  ;;  %v603_v59 = vadd.f32 %v602_v33, %v472_v48  ;;  %v1120_v44 = vpack.c.bf16 %v1093_v31, %v1092_v30 }
 0x137   :  { %v605_v55 = vpop.f32.mrf.mxu1 }
 0x138   :  { %v933_v37 = vmax.f32 %v900_v47, 0.0 }
 0x13a   :  { %v1015_v58 = vrot.slane %v933_v37, 1 }
 0x13b   :  { %v808_v61 = vpop.f32.mrf.mxu2 }
 0x13c   :  { %v867_v63 = vadd.f32 %v808_v61, %v603_v59  ;;  %v1016_v0 = vsel %vm663_vm2, %v1013_v50, %v1015_v58 }
 0x13d   :  { %v1097_v4 = vmax.f32 %v932_v38, %v1016_v0  ;;  %v475_v8 = vpop.f32.mrf.mxu0 }
 0x13e   :  { %v901_v7 = vadd.f32 %v4299_v54, %v867_v63  ;;  %v606_v11 = vadd.f32 %v605_v55, %v475_v8 }
 0x13f   :  { %v1122_v12 = vpack.c.bf16 %v1097_v4, %v1096_v3  ;;  %v607_v19 = vpop.f32.mrf.mxu1 }
 0x140   :  { %v934_v16 = vmax.f32 %v901_v7, 0.0 }
 0x141   :  { %1330 = vmatpush.bf16.msra.mxu3 %v1122_v12 }
 0x142   :  { %v1017_v22 = vrot.slane %v934_v16, 1 }
 0x143   :  { %v811_v27 = vpop.f32.mrf.mxu2 }
 0x144   :  { %v868_v33 = vadd.f32 %v811_v27, %v606_v11  ;;  %v1018_v36 = vsel %vm663_vm2, %v1015_v58, %v1017_v22 }
 0x145   :  { %1331 = vmatpush.bf16.msra.mxu3 %v1121_v28  ;;  %v4451_v38 = vmax.f32 %v933_v37, %v1018_v36  ;;  %v477_v42 = vpop.f32.mrf.mxu0 }
 0x146   :  { %v902_v39 = vadd.f32 %v4299_v54, %v868_v33  ;;  %v608_v13 = vadd.f32 %v607_v19, %v477_v42 }
 0x147   :  { %v610_v26 = vpop.f32.mrf.mxu1 }
 0x148   :  { %v935_v46 = vmax.f32 %v902_v39, 0.0 }
 0x149   :  { %1332 = vmatpush.bf16.msra.mxu3 %v1120_v44 }
 0x14a   :  { %v1019_v32 = vrot.slane %v935_v46, 1 }
 0x14b   :  { %v813_v47 = vpop.f32.mrf.mxu2 }
 0x14c   :  { %v869_v48 = vadd.f32 %v813_v47, %v608_v13  ;;  %v1020_v50 = vsel %vm663_vm2, %v1017_v22, %v1019_v32 }
 0x14d   :  { %1333 = vmatpush.bf16.msra.mxu3 %v1119_v45  ;;  %v4458_v25 = vmax.f32 %v934_v16, %v1020_v50  ;;  %v480_v51 = vpop.f32.mrf.mxu0  ;;  %v3735_v16 = vld [vmem:[%s5074_s6 + $0x20] sm:$0xf0] }
 0x14e   :  { %v903_v29 = vadd.f32 %v4299_v54, %v869_v48  ;;  %v611_v53 = vadd.f32 %v610_v26, %v480_v51  ;;  %v3337_v23 = vor.u32 %v3735_v16, %v3336_v15  ;;  %v3348_v51 = vld [vmem:[%s5074_s6 + $0x30] sm:$0xf] }
 0x14f   :  { %v1123_v37 = vpack.c.bf16 %v4458_v25, %v4451_v38  ;;  %v612_v55 = vpop.f32.mrf.mxu1  ;;  %v3326_v38 = vld [vmem:[%s5074_s6 + $0xc] sm:$0xf0] }
 0x150   :  { %v936_v56 = vmax.f32 %v903_v29, 0.0 }
 0x151   :  { %1334 = vmatpush.bf16.msra.mxu3 %v1118_v14 }
 0x152   :  { %v1021_v24 = vrot.slane %v936_v56, 1 }
 0x153   :  { %v816_v57 = vpop.f32.mrf.mxu2 }
 0x154   :  { %v870_v58 = vadd.f32 %v816_v57, %v611_v53  ;;  %v3738_v53 = vld [vmem:[%s5074_s6 + $0x38] sm:$0xf0] }
 0x155   :  { %1335 = vmatpush.bf16.msra.mxu3 %v1117_v43  ;;  %v482_v45 = vpop.f32.mrf.mxu0  ;;  %v1022_v43 = vsel %vm663_vm2, %v1019_v32, %v1021_v24 }
 0x156   :  { %v904_v40 = vadd.f32 %v4299_v54, %v870_v58  ;;  %v613_v60 = vadd.f32 %v612_v55, %v482_v45  ;;  %v4484_v49 = vmax.f32 %v935_v46, %v1022_v43 }
 0x157   :  { %v615_v61 = vpop.f32.mrf.mxu1 }
 0x158   :  { %v937_v59 = vmax.f32 %v904_v40, 0.0 }
 0x159   :  { %1336 = vmatpush.bf16.msra.mxu3 %v1116_v9 }
 0x15a   :  { %v1023_v35 = vrot.slane %v937_v59, 1 }
 0x15b   :  { %v818_v6 = vpop.f32.mrf.mxu2 }
 0x15c   :  { %v871_v14 = vadd.f32 %v818_v6, %v613_v60  ;;  %v1024_v63 = vsel %vm663_vm2, %v1021_v24, %v1023_v35  ;;  %v3349_v24 = vor.u32 %v3738_v53, %v3348_v51 }
 0x15d   :  { %1337 = vmatpush.bf16.msra.mxu3 %v1115_v41  ;;  %v4486_v2 = vmax.f32 %v936_v56, %v1024_v63  ;;  %v485_v0 = vpop.f32.mrf.mxu0 }
 0x15e   :  { %v905_v9 = vadd.f32 %v4299_v54, %v871_v14  ;;  %v616_v1 = vadd.f32 %v615_v61, %v485_v0 }
 0x15f   :  { %v1124_v3 = vpack.c.bf16 %v4486_v2, %v4484_v49  ;;  %v617_v4 = vpop.f32.mrf.mxu1  ;;  %v3731_v49 = vld [vmem:[%s5074_s6 + $0x4] sm:$0xf]  ;;  %v3356_v2 = vld [vmem:[%s5074_s6 + $0x38] sm:$0xf] }
 0x160   :  { %1338 = vmatmul.bf16.vlgmr.msra.gmra.mxu3 %v3325_v62  ;;  %v938_v5 = vmax.f32 %v905_v9, 0.0 }
 0x162   :  { %v1025_v10 = vrot.slane %v938_v5, 1 }
 0x163   :  { %v821_v7 = vpop.f32.mrf.mxu2 }
 0x164   :  { %v872_v8 = vadd.f32 %v821_v7, %v616_v1  ;;  %v1026_v20 = vsel %vm663_vm2, %v1023_v35, %v1025_v10 }
 0x165   :  { %v487_v34 = vpop.f32.mrf.mxu0  ;;  %v4500_v28 = vmax.f32 %v937_v59, %v1026_v20 }
 0x166   :  { %v906_v18 = vadd.f32 %v4299_v54, %v872_v8  ;;  %v618_v11 = vadd.f32 %v617_v4, %v487_v34  ;;  %v3360_v4 = vld [vmem:[%s5074_s6 + $0x48] sm:$0xf] }
 0x167   :  { %v620_v12 = vpop.f32.mrf.mxu1 }
 0x168   :  { %v939_v41 = vmax.f32 %v906_v18, 0.0 }
 0x16a   :  { %v1027_v19 = vrot.slane %v939_v41, 1 }
 0x16b   :  { %v823_v21 = vpop.f32.mrf.mxu2 }
 0x16c   :  { %v873_v22 = vadd.f32 %v823_v21, %v618_v11  ;;  %v1028_v27 = vsel %vm663_vm2, %v1025_v10, %v1027_v19 }
 0x16d   :  { %v4502_v31 = vmax.f32 %v938_v5, %v1028_v27  ;;  %v490_v36 = vpop.f32.mrf.mxu0  ;;  %v3741_v5 = vld [vmem:[%s5074_s6 + $0x50] sm:$0xf0] }
 0x16e   :  { %v907_v33 = vadd.f32 %v4299_v54, %v873_v22  ;;  %v621_v30 = vadd.f32 %v620_v12, %v490_v36  ;;  %v3361_v18 = vor.u32 %v3741_v5, %v3360_v4  ;;  %v3372_v22 = vld [vmem:[%s5074_s6 + $0x60] sm:$0xf] }
 0x16f   :  { %v1125_v39 = vpack.c.bf16 %v4502_v31, %v4500_v28  ;;  %v622_v42 = vpop.f32.mrf.mxu1  ;;  %v3344_v28 = vld [vmem:[%s5074_s6 + $0x20] sm:$0xf]  ;;  %v3736_v31 = vld [vmem:[%s5074_s6 + $0x28] sm:$0xf0] }
 0x170   :  { %1343 = vmatmul.bf16.gmra.mxu3 %v3337_v23  ;;  %v940_v44 = vmax.f32 %v907_v33, 0.0  ;;  %v3744_v23 = vld [vmem:[%s5074_s6 + $0x68] sm:$0xf0] }
 0x171   :  { %v3373_v33 = vor.u32 %v3744_v23, %v3372_v22 }
 0x172   :  { %v1029_v26 = vrot.slane %v940_v44, 1 }
 0x173   :  { %v826_v46 = vpop.f32.mrf.mxu2 }
 0x174   :  { %v874_v13 = vadd.f32 %v826_v46, %v621_v30  ;;  %v1030_v56 = vsel %vm663_vm2, %v1027_v19, %v1029_v26 }
 0x175   :  { %v492_v47 = vpop.f32.mrf.mxu0  ;;  %v4516_v45 = vmax.f32 %v939_v41, %v1030_v56 }
 0x176   :  { %v908_v32 = vadd.f32 %v4299_v54, %v874_v13  ;;  %v623_v50 = vadd.f32 %v622_v42, %v492_v47  ;;  %v3747_v47 = vld [vmem:[%s5074_s6 + $0x80] sm:$0xf0] }
 0x177   :  { %v625_v29 = vpop.f32.mrf.mxu1 }
 0x178   :  { %v941_v48 = vmax.f32 %v908_v32, 0.0  ;;  %v3384_v32 = vld [vmem:[%s5074_s6 + $0x78] sm:$0xf] }
 0x17a   :  { %v1031_v55 = vrot.slane %v941_v48, 1 }
 0x17b   :  { %v828_v57 = vpop.f32.mrf.mxu2 }
 0x17c   :  { %v875_v58 = vadd.f32 %v828_v57, %v623_v50  ;;  %v1032_v40 = vsel %vm663_vm2, %v1029_v26, %v1031_v55 }
 0x17d   :  { %v4518_v59 = vmax.f32 %v940_v44, %v1032_v40  ;;  %v495_v61 = vpop.f32.mrf.mxu0 }
 0x17e   :  { %v909_v60 = vadd.f32 %v4299_v54, %v875_v58  ;;  %v626_v17 = vadd.f32 %v625_v29, %v495_v61 }
 0x17f   :  { %v1126_v52 = vpack.c.bf16 %v4518_v59, %v4516_v45  ;;  %v627_v35 = vpop.f32.mrf.mxu1 }
 0x180   :  { %1348 = vmatmul.bf16.gmra.mxu3 %v3349_v24  ;;  %v942_v43 = vmax.f32 %v909_v60, 0.0 }
 0x182   :  { %v1033_v62 = vrot.slane %v942_v43, 1 }
 0x183   :  { %v831_v6 = vpop.f32.mrf.mxu2 }
 0x184   :  { %v876_v14 = vadd.f32 %v831_v6, %v626_v17  ;;  %v1034_v8 = vsel %vm663_vm2, %v1031_v55, %v1033_v62  ;;  %v3385_v55 = vor.u32 %v3747_v47, %v3384_v32 }
 0x185   :  { %v497_v9 = vpop.f32.mrf.mxu0  ;;  %v4540_v41 = vmax.f32 %v941_v48, %v1034_v8 }
 0x186   :  { %v4524_v63 = vadd.f32 %v4299_v54, %v876_v14  ;;  %v628_v56 = vadd.f32 %v627_v35, %v497_v9 }
 0x187   :  { %v630_v1 = vpop.f32.mrf.mxu1 }
 0x188   :  { %v943_v0 = vmax.f32 %v4524_v63, 0.0  ;;  %v3332_v63 = vld [vmem:[%s5074_s6 + $0x8] sm:$0xf] }
 0x18a   :  { %v4535_v7 = vrot.slane %v943_v0, 1 }
 0x18b   :  { %v833_v10 = vpop.f32.mrf.mxu2 }
 0x18c   :  { %v1036_v34 = vsel %vm663_vm2, %v1033_v62, %v4535_v7 }
 0x18d   :  { %v4542_v11 = vmax.f32 %v942_v43, %v1036_v34  ;;  %v500_v12 = vpop.f32.mrf.mxu0  ;;  %v877_v43 = vadd.f32 %v833_v10, %v628_v56  ;;  %v3396_v10 = vld [vmem:[%s5074_s6 + $0x90] sm:$0xf] }
 0x18e   :  { %v631_v50 = vadd.f32 %v630_v1, %v500_v12 }
 0x18f   :  { %v1127_v15 = vpack.c.bf16 %v4542_v11, %v4540_v41  ;;  %v632_v16 = vpop.f32.mrf.mxu1  ;;  %v911_v35 = vadd.f32 %v4299_v54, %v877_v43  ;;  %v4607_v41 = vld [vmem:[%s5074_s6 + $0xc0] sm:$0x33] }
 0x190   :  { %1353 = vmatmul.bf16.gmra.mxu3 %v3361_v18  ;;  %v1248_v11 = vunpack.c.l.b16 %v4607_v41 }
 0x193   :  { %v836_v19 = vpop.f32.mrf.mxu2 }
 0x194   :  { %v878_v40 = vadd.f32 %v836_v19, %v631_v50 }
 0x195   :  { %v502_v20 = vpop.f32.mrf.mxu0 }
 0x196   :  { %v633_v48 = vadd.f32 %v632_v16, %v502_v20  ;;  %v912_v62 = vadd.f32 %v4299_v54, %v878_v40  ;;  %v944_v20 = vmax.f32 %v911_v35, 0.0 }
 0x197   :  { %v635_v21 = vpop.f32.mrf.mxu1 }
 0x198   :  { %v945_v12 = vmax.f32 %v912_v62, 0.0  ;;  %v1037_v47 = vrot.slane %v944_v20, 1 }
 0x19b   :  { %v838_v27 = vpop.f32.mrf.mxu2 }
 0x19c   :  { %v879_v57 = vadd.f32 %v838_v27, %v633_v48 }
 0x19d   :  { %v505_v36 = vpop.f32.mrf.mxu0 }
 0x19e   :  { %v636_v46 = vadd.f32 %v635_v21, %v505_v36  ;;  %v913_v6 = vadd.f32 %v4299_v54, %v879_v57  ;;  %v3750_v21 = vld [vmem:[%s5074_s6 + $0x98] sm:$0xf0]  ;;  %v1038_v57 = vsel %vm663_vm2, %v4535_v7, %v1037_v47 }
 0x19f   :  { %v637_v30 = vpop.f32.mrf.mxu1  ;;  %v3397_v36 = vor.u32 %v3750_v21, %v3396_v10  ;;  %v1108_v40 = vmax.f32 %v943_v0, %v1038_v57  ;;  %v3733_v0 = vld [vmem:[%s5074_s6 + $0x10] sm:$0xf0]  ;;  %v3740_v21 = vld [vmem:[%s5074_s6 + $0x4c] sm:$0xf]  ;;  %v3416_v57 = vld [vmem:[%s5074_s6 + $0xb0] sm:$0xf] }
 0x1a0   :  { %1358 = vmatmul.bf16.gmra.mxu3 %v3373_v33  ;;  %v946_v9 = vmax.f32 %v913_v6, 0.0  ;;  %v1039_v33 = vrot.slane %v945_v12, 1  ;;  %v3333_v7 = vor.u32 %v3733_v0, %v3332_v63  ;;  %v3734_v6 = vld [vmem:[%s5074_s6 + $0x1c] sm:$0xf] }
 0x1a2   :  { %v1041_v22 = vrot.slane %v946_v9, 1 }
 0x1a3   :  { %v841_v42 = vpop.f32.mrf.mxu2 }
 0x1a4   :  { %v880_v51 = vadd.f32 %v841_v42, %v636_v46  ;;  %v1042_v50 = vsel %vm663_vm2, %v1039_v33, %v1041_v22 }
 0x1a5   :  { %v507_v44 = vpop.f32.mrf.mxu0  ;;  %v1110_v56 = vmax.f32 %v945_v12, %v1042_v50 }
 0x1a6   :  { %v638_v13 = vadd.f32 %v637_v30, %v507_v44  ;;  %v914_v60 = vadd.f32 %v4299_v54, %v880_v51 }
 0x1a7   :  { %v640_v26 = vpop.f32.mrf.mxu1 }
 0x1a8   :  { %v947_v4 = vmax.f32 %v914_v60, 0.0 }
 0x1aa   :  { %v1043_v16 = vrot.slane %v947_v4, 1 }
 0x1ab   :  { %v843_v29 = vpop.f32.mrf.mxu2 }
 0x1ac   :  { %v881_v53 = vadd.f32 %v843_v29, %v638_v13  ;;  %v1044_v44 = vsel %vm663_vm2, %v1041_v22, %v1043_v16  ;;  %v3362_v22 = vld [vmem:[%s5074_s6 + $0x54] sm:$0xf0] }
 0x1ad   :  { %v510_v24 = vpop.f32.mrf.mxu0  ;;  %v1111_v51 = vmax.f32 %v946_v9, %v1044_v44  ;;  %v3374_v44 = vld [vmem:[%s5074_s6 + $0x6c] sm:$0xf0] }
 0x1ae   :  { %v915_v58 = vadd.f32 %v4299_v54, %v881_v53  ;;  %v641_v61 = vadd.f32 %v640_v26, %v510_v24  ;;  %v4070_v26 = vmov 0  }
 0x1af   :  { %v642_v17 = vpop.f32.mrf.mxu1  ;;  %v4573_v32 = vsel %vm1324_vm4, 65535, %v4070_v26  ;;  %v3404_v26 = vld [vmem:[%s5074_s6 + $0x98] sm:$0xf] }
 0x1b0   :  { %1363 = vmatmul.bf16.gmra.mxu3 %v3385_v55  ;;  %v948_v14 = vmax.f32 %v915_v58, 0.0  ;;  %v1040_v55 = vsel %vm663_vm2, %v1037_v47, %v1039_v33  ;;  %v1129_v58 = vpack.c.bf16 %v1111_v51, %v1110_v56  ;;  %v3753_v17 = vld [vmem:[%s5074_s6 + $0xb0] sm:$0xf0]  ;;  %v3392_v33 = vld [vmem:[%s5074_s6 + $0x80] sm:$0xf] }
 0x1b1   :  { %v1109_v24 = vmax.f32 %v944_v20, %v1040_v55  ;;  %v3751_v47 = vld [vmem:[%s5074_s6 + $0xa0] sm:$0xf0]  ;;  %v3386_v51 = vld [vmem:[%s5074_s6 + $0x84] sm:$0xf0]  ;;  %v3755_v55 = vld [vmem:[#allocation5] sm:$0xff] }
 0x1b2   :  { %v1045_v8 = vrot.slane %v948_v14, 1  ;;  %1691 = vmatpush.bf16.msrb.mxu2 %v3755_v55 }
 0x1b3   :  { %v846_v1 = vpop.f32.mrf.mxu2  ;;  %v1128_v60 = vpack.c.bf16 %v1109_v24, %v1108_v40 }
 0x1b4   :  { %v882_v5 = vadd.f32 %v846_v1, %v641_v61  ;;  %v1046_v27 = vsel %vm663_vm2, %v1043_v16, %v1045_v8  ;;  %v3408_v61 = vld [vmem:[%s5074_s6 + $0xa8] sm:$0xf] }
 0x1b5   :  { %v512_v34 = vpop.f32.mrf.mxu0  ;;  %v1112_v46 = vmax.f32 %v947_v4, %v1046_v27  ;;  %v3409_v43 = vor.u32 %v3753_v17, %v3408_v61  ;;  %v3368_v4 = vld [vmem:[%s5074_s6 + $0x50] sm:$0xf]  ;;  %v3380_v16 = vld [vmem:[%s5074_s6 + $0x68] sm:$0xf]  ;;  %v3365_v27 = vor.u32 %v3740_v21, %v3362_v22  ;;  %v3749_v61 = vld [vmem:[%s5074_s6 + $0x94] sm:$0xf] }
 0x1b6   :  { %v916_v18 = vadd.f32 %v4299_v54, %v882_v5  ;;  %v3742_v5 = vld [vmem:[%s5074_s6 + $0x58] sm:$0xf0]  ;;  %v3398_v17 = vld [vmem:[%s5074_s6 + $0x9c] sm:$0xf0] }
 0x1b7   :  { %v3369_v35 = vor.u32 %v3742_v5, %v3368_v4  ;;  %v3401_v63 = vor.u32 %v3749_v61, %v3398_v17  ;;  %v3757_v5 = vld [vmem:[#allocation5 + $0x10] sm:$0xff] }
 0x1b8   :  { %v949_v19 = vmax.f32 %v916_v18, 0.0  ;;  %v3350_v18 = vld [vmem:[%s5074_s6 + $0x3c] sm:$0xf0] }
 0x1ba   :  { %v1047_v23 = vrot.slane %v949_v19, 1 }
 0x1bb   :  { %v848_v54 = vpop.f32.mrf.mxu2 }
 0x1bc   :  { %v1048_v30 = vsel %vm663_vm2, %v1045_v8, %v1047_v23  ;;  %v1114_v42 = vmax.f32 %v949_v19, %v1047_v23  ;;  %v3737_v8 = vld [vmem:[%s5074_s6 + $0x34] sm:$0xf]  ;;  %v3748_v54 = vld [vmem:[%s5074_s6 + $0x88] sm:$0xf0] }
 0x1bd   :  { %v1113_v13 = vmax.f32 %v948_v14, %v1048_v30  ;;  %v3338_v14 = vld [vmem:[%s5074_s6 + $0x24] sm:$0xf0]  ;;  %v3353_v12 = vor.u32 %v3737_v8, %v3350_v18  ;;  %v3745_v19 = vld [vmem:[%s5074_s6 + $0x70] sm:$0xf0] }
 0x1be   :  { %v1131_v48 = vpack.c.bf16 %v1114_v42, %v1114_v42  ;;  %v3341_v1 = vor.u32 %v3734_v6, %v3338_v14  ;;  %v3381_v20 = vor.u32 %v3745_v19, %v3380_v16  ;;  %v3743_v42 = vld [vmem:[%s5074_s6 + $0x64] sm:$0xf]  ;;  %v1249_v6 = vunpack.c.h.b16 %v4607_v41 }
 0x1bf   :  { %v1130_v29 = vpack.c.bf16 %v1113_v13, %v1112_v46  ;;  %v3377_v13 = vor.u32 %v3743_v42, %v3374_v44 }
 0x1c0   :  { %1368 = vmatmul.bf16.gmra.mxu3 %v3397_v36  ;;  %v1328_v53 = vand.u32 %v4573_v32, %v1131_v48  ;;  %v3393_v36 = vor.u32 %v3748_v54, %v3392_v33  ;;  %v3405_v48 = vor.u32 %v3751_v47, %v3404_v26 }
 0x1c1   :  { %1383 = vmatpush.bf16.msrb.mxu3 %v1130_v29  ;;  %v3746_v29 = vld [vmem:[%s5074_s6 + $0x7c] sm:$0xf] }
 0x1c2   :  { %1443 = vmatpush.bf16.msrb.mxu0 %v1328_v53  ;;  %v3389_v56 = vor.u32 %v3746_v29, %v3386_v51 }
 0x1c5   :  { %1384 = vmatpush.bf16.msrb.mxu3 %v1129_v58  ;;  %3418 = vmatmul.msk.bf16.vlgmr.msrb.gmra.mxu0 %vm1296_vm5, %v3333_v7  ;;  %v3754_v58 = vld [vmem:[%s5074_s6 + $0xb8] sm:$0xf0] }
 0x1c6   :  { %v3417_v24 = vor.u32 %v3754_v58, %v3416_v57 }
 0x1c9   :  { %1385 = vmatpush.bf16.msrb.mxu3 %v1128_v60  ;;  %v3756_v60 = vld [vmem:[#allocation5 + $0x8] sm:$0xff] }
 0x1ca   :  { %1614 = vmatpush.bf16.msrb.mxu1 %v3756_v60 }
 0x1cd   :  { %1386 = vmatpush.bf16.msrb.mxu3 %v1127_v15  ;;  %v1275_v15 = vpack.c.b16 %v1248_v11, %v1248_v11  ;;  %v1165_v11 = vld [vmem:[%s5074_s6 + $0xc8] sm:$0x3] }
 0x1d0   :  { %1373 = vmatmul.bf16.gmra.mxu3 %v3409_v43 }
 0x1d1   :  { %1387 = vmatpush.bf16.msrb.mxu3 %v1126_v52 }
 0x1d5   :  { %1388 = vmatpush.bf16.msrb.mxu3 %v1125_v39  ;;  %v3345_v39 = vor.u32 %v3736_v31, %v3344_v28 }
 0x1d7   :  { %3419 = vmatmul.msk.bf16.gmra.mxu0 %vm1296_vm5, %v3345_v39  ;;  %v3752_v39 = vld [vmem:[%s5074_s6 + $0xac] sm:$0xf] }
 0x1d9   :  { %1389 = vmatpush.bf16.msrb.mxu3 %v1124_v3  ;;  %v3739_v3 = vld [vmem:[%s5074_s6 + $0x40] sm:$0xf0] }
 0x1da   :  { %v3357_v59 = vor.u32 %v3739_v3, %v3356_v2 }
 0x1dd   :  { %1390 = vmatpush.bf16.msrb.mxu3 %v1123_v37  ;;  %v3329_v37 = vor.u32 %v3731_v49, %v3326_v38  ;;  %v3410_v49 = vld [vmem:[%s5074_s6 + $0xb4] sm:$0xf0] }
 0x1e0   :  { %1378 = vmatmul.bf16.gmra.mxu3 %v1275_v15  ;;  %v1250_v15 = vunpack.c.l.b16 %v1165_v11 }
 0x1e1   :  { %1805 = vmatpush.bf16.msra.mxu3 %v3757_v5 }
 0x1e2   :  { %v1277_v31 = vpack.c.b16 %v1250_v15, %v1250_v15 }
 0x1e3   :  { %v4623_v45 = vpop.f32.mrf.mxu3 }
 0x1e7   :  { %3420 = vmatmul.msk.bf16.gmra.mxu0 %vm1296_vm5, %v3357_v59 }
 0x1eb   :  { %v4631_v25 = vpop.f32.mrf.mxu3 }
 0x1f0   :  { %1391 = vmatmul.bf16.vlgmr.msrb.gmra.mxu3 %v3329_v37  ;;  %v3413_v37 = vor.u32 %v3752_v39, %v3410_v49 }
 0x1f3   :  { %v4640_v52 = vpop.f32.mrf.mxu3 }
 0x1f7   :  { %3421 = vmatmul.msk.bf16.gmra.mxu0 %vm1296_vm5, %v3369_v35 }
 0x1fb   :  { %v4648_v62 = vpop.f32.mrf.mxu3 }
 0x200   :  { %1396 = vmatmul.bf16.gmra.mxu3 %v3341_v1  ;;  %v1276_v1 = vpack.c.b16 %v1249_v6, %v1249_v6 }
 0x203   :  { %v4657_v9 = vpop.f32.mrf.mxu3 }
 0x207   :  { %3422 = vmatmul.msk.bf16.gmra.mxu0 %vm1296_vm5, %v3381_v20 }
 0x20b   :  { %v4665_v34 = vpop.f32.mrf.mxu3 }
 0x210   :  { %1401 = vmatmul.bf16.gmra.mxu3 %v3353_v12 }
 0x213   :  { %v4674_v10 = vpop.f32.mrf.mxu3 }
 0x217   :  { %3423 = vmatmul.msk.bf16.gmra.mxu0 %vm1296_vm5, %v3393_v36 }
 0x21b   :  { %v4682_v23 = vpop.f32.mrf.mxu3 }
 0x220   :  { %1406 = vmatmul.bf16.gmra.mxu3 %v3365_v27 }
 0x223   :  { %v4691_v30 = vpop.f32.mrf.mxu3 }
 0x227   :  { %3424 = vmatmul.msk.bf16.gmra.mxu0 %vm1296_vm5, %v3405_v48 }
 0x22b   :  { %v4699_v46 = vpop.f32.mrf.mxu3 }
 0x230   :  { %1411 = vmatmul.bf16.gmra.mxu3 %v3377_v13 }
 0x233   :  { %v4708_v50 = vpop.f32.mrf.mxu3 }
 0x237   :  { %3425 = vmatmul.msk.bf16.gmra.mxu0 %vm1296_vm5, %v3417_v24 }
 0x23b   :  { %v4716_v53 = vpop.f32.mrf.mxu3 }
 0x240   :  { %1416 = vmatmul.bf16.gmra.mxu3 %v3389_v56 }
 0x242   :  { %v1445_v0 = vpop.f32.mrf.mxu0 }
 0x243   :  { %v4725_v40 = vpop.f32.mrf.mxu3 }
 0x247   :  { %3426 = vmatmul.msk.bf16.gmra.mxu0 %vm1296_vm5, %v1277_v31 }
 0x24a   :  { %v1447_v28 = vpop.f32.mrf.mxu0 }
 0x24b   :  { %v4733_v43 = vpop.f32.mrf.mxu3 }
 0x250   :  { %1421 = vmatmul.bf16.gmra.mxu3 %v3401_v63 }
 0x253   :  { %v4735_v7 = vpop.f32.mrf.mxu3 }
 0x254   :  { %v1450_v2 = vpop.f32.mrf.mxu0 }
 0x25b   :  { %v4747_v38 = vpop.f32.mrf.mxu3 }
 0x25c   :  { %v1452_v59 = vpop.f32.mrf.mxu0 }
 0x260   :  { %1426 = vmatmul.bf16.gmra.mxu3 %v3413_v37 }
 0x263   :  { %v4749_v3 = vpop.f32.mrf.mxu3 }
 0x264   :  { %v1455_v4 = vpop.f32.mrf.mxu0 }
 0x26b   :  { %v1381_v14 = vpop.f32.mrf.mxu3 }
 0x26c   :  { %v1457_v8 = vpop.f32.mrf.mxu0 }
 0x270   :  { %1431 = vmatmul.bf16.gmra.mxu3 %v1276_v1 }
 0x273   :  { %v1392_v35 = vpop.f32.mrf.mxu3 }
 0x274   :  { %v1393_v18 = vadd.f32 %v1392_v35, %v4623_v45  ;;  %v1460_v21 = vpop.f32.mrf.mxu0 }
 0x276   :  { %v1446_v19 = vadd.f32 %v1445_v0, %v1393_v18 }
 0x27b   :  { %v1394_v12 = vpop.f32.mrf.mxu3 }
 0x27c   :  { %v1395_v16 = vadd.f32 %v1394_v12, %v4631_v25  ;;  %v1462_v27 = vpop.f32.mrf.mxu0 }
 0x27e   :  { %v1448_v20 = vadd.f32 %v1447_v28, %v1395_v16 }
 0x280   :  { %v1489_v22 = vpack.c.bf16 %v1448_v20, %v1446_v19 }
 0x282   :  { %3444 = vmatmul.msk.bf16.vlgmr.msrb.gmra.mxu2 %vm1579_vm6, %v1489_v22  ;;  %v1505_v36 = vshll.u32 %v1489_v22, 16  ;;  %v1503_v47 = vshrl.u32 %v1489_v22, 16  ;;  %v1748_v48 = vrot.slane %v1489_v22, 1 }
 0x283   :  { %v1397_v41 = vpop.f32.mrf.mxu3 }
 0x284   :  { %v1398_v33 = vadd.f32 %v1397_v41, %v4640_v52  ;;  %v1465_v13 = vpop.f32.mrf.mxu0  ;;  %v1507_v25 = vrot.slane %v1505_v36, 1 }
 0x286   :  { %v1451_v44 = vadd.f32 %v1450_v2, %v1398_v33  ;;  %v1508_v57 = vor.u32 %v1507_v25, %v1503_v47 }
 0x28b   :  { %v1399_v54 = vpop.f32.mrf.mxu3 }
 0x28c   :  { %v1400_v42 = vadd.f32 %v1399_v54, %v4648_v62  ;;  %v1467_v58 = vpop.f32.mrf.mxu0 }
 0x28e   :  { %v1453_v45 = vadd.f32 %v1452_v59, %v1400_v42 }
 0x290   :  { %v1490_v26 = vpack.c.bf16 %v1453_v45, %v1451_v44 }
 0x292   :  { %v1749_v29 = vrot.slane %v1490_v26, 1  ;;  %3445 = vmatmul.msk.bf16.gmra.mxu2 %vm1579_vm6, %v1490_v26  ;;  %v1510_v51 = vshll.u32 %v1490_v26, 16  ;;  %v1514_v28 = vshrl.u32 %v1490_v26, 16 }
 0x293   :  { %v1402_v55 = vpop.f32.mrf.mxu3 }
 0x294   :  { %v1750_v56 = vsel %vm663_vm2, %v1748_v48, %v1749_v29  ;;  %v1512_v52 = vrot.slane %v1510_v51, 1  ;;  %v1403_v24 = vadd.f32 %v1402_v55, %v4657_v9  ;;  %v1470_v0 = vpop.f32.mrf.mxu0 }
 0x295   :  { %3457 = vmatmul.msk.bf16.vlgmr.msra.gmra.mxu3 %vm1579_vm6, %v1750_v56 }
 0x296   :  { %v1513_v62 = vsel %vm223_vm3, %v1508_v57, %v1512_v52  ;;  %v1456_v17 = vadd.f32 %v1455_v4, %v1403_v24  ;;  %v1516_v37 = vor.u32 %v1514_v28, %v1512_v52 }
 0x297   :  { %3431 = vmatmul.msk.bf16.vlgmr.msrb.gmra.mxu1 %vm1579_vm6, %v1513_v62 }
 0x29b   :  { %v1404_v60 = vpop.f32.mrf.mxu3 }
 0x29c   :  { %v1405_v61 = vadd.f32 %v1404_v60, %v4665_v34  ;;  %v1472_v59 = vpop.f32.mrf.mxu0 }
 0x29e   :  { %v1458_v63 = vadd.f32 %v1457_v8, %v1405_v61 }
 0x2a0   :  { %v1491_v11 = vpack.c.bf16 %v1458_v63, %v1456_v17 }
 0x2a2   :  { %3446 = vmatmul.msk.bf16.gmra.mxu2 %vm1579_vm6, %v1491_v11  ;;  %v1751_v15 = vrot.slane %v1491_v11, 1  ;;  %v1518_v31 = vshll.u32 %v1491_v11, 16  ;;  %v1522_v18 = vshrl.u32 %v1491_v11, 16 }
 0x2a3   :  { %v1407_v39 = vpop.f32.mrf.mxu3 }
 0x2a4   :  { %v1752_v49 = vsel %vm663_vm2, %v1749_v29, %v1751_v15  ;;  %v1520_v2 = vrot.slane %v1518_v31, 1  ;;  %v1408_v34 = vadd.f32 %v1407_v39, %v4674_v10  ;;  %v1475_v35 = vpop.f32.mrf.mxu0 }
 0x2a5   :  { %3458 = vmatmul.msk.bf16.gmra.mxu3 %vm1579_vm6, %v1752_v49 }
 0x2a6   :  { %v1521_v9 = vsel %vm223_vm3, %v1516_v37, %v1520_v2  ;;  %v1461_v1 = vadd.f32 %v1460_v21, %v1408_v34  ;;  %v1524_v20 = vor.u32 %v1522_v18, %v1520_v2 }
 0x2a7   :  { %3432 = vmatmul.msk.bf16.gmra.mxu1 %vm1579_vm6, %v1521_v9 }
 0x2ab   :  { %v1409_v6 = vpop.f32.mrf.mxu3 }
 0x2ac   :  { %v1410_v14 = vadd.f32 %v1409_v6, %v4682_v23  ;;  %v1477_v21 = vpop.f32.mrf.mxu0 }
 0x2ae   :  { %v1463_v4 = vadd.f32 %v1462_v27, %v1410_v14 }
 0x2b0   :  { %v1492_v5 = vpack.c.bf16 %v1463_v4, %v1461_v1 }
 0x2b2   :  { %3447 = vmatmul.msk.bf16.gmra.mxu2 %vm1579_vm6, %v1492_v5  ;;  %v1753_v8 = vrot.slane %v1492_v5, 1  ;;  %v1526_v12 = vshll.u32 %v1492_v5, 16  ;;  %v1530_v44 = vshrl.u32 %v1492_v5, 16 }
 0x2b3   :  { %v1412_v16 = vpop.f32.mrf.mxu3 }
 0x2b4   :  { %v1754_v19 = vsel %vm663_vm2, %v1751_v15, %v1753_v8  ;;  %v1528_v22 = vrot.slane %v1526_v12, 1  ;;  %v1413_v23 = vadd.f32 %v1412_v16, %v4691_v30  ;;  %v1480_v29 = vpop.f32.mrf.mxu0 }
 0x2b5   :  { %3459 = vmatmul.msk.bf16.gmra.mxu3 %vm1579_vm6, %v1754_v19 }
 0x2b6   :  { %v1529_v10 = vsel %vm223_vm3, %v1524_v20, %v1528_v22  ;;  %v1466_v33 = vadd.f32 %v1465_v13, %v1413_v23  ;;  %v1532_v47 = vor.u32 %v1530_v44, %v1528_v22 }
 0x2b7   :  { %3433 = vmatmul.msk.bf16.gmra.mxu1 %vm1579_vm6, %v1529_v10 }
 0x2bb   :  { %v1414_v41 = vpop.f32.mrf.mxu3 }
 0x2bc   :  { %v1415_v27 = vadd.f32 %v1414_v41, %v4699_v46  ;;  %v1482_v57 = vpop.f32.mrf.mxu0 }
 0x2be   :  { %v1468_v54 = vadd.f32 %v1467_v58, %v1415_v27 }
 0x2c0   :  { %v1493_v36 = vpack.c.bf16 %v1468_v54, %v1466_v33 }
 0x2c2   :  { %3448 = vmatmul.msk.bf16.gmra.mxu2 %vm1579_vm6, %v1493_v36  ;;  %v1755_v42 = vrot.slane %v1493_v36, 1  ;;  %v1534_v45 = vshll.u32 %v1493_v36, 16  ;;  %v1538_v58 = vshrl.u32 %v1493_v36, 16 }
 0x2c3   :  { %v1417_v26 = vpop.f32.mrf.mxu3 }
 0x2c4   :  { %v1756_v25 = vsel %vm663_vm2, %v1753_v8, %v1755_v42  ;;  %v1536_v48 = vrot.slane %v1534_v45, 1  ;;  %v1418_v46 = vadd.f32 %v1417_v26, %v4708_v50  ;;  %v1485_v11 = vpop.f32.mrf.mxu0 }
 0x2c5   :  { %3460 = vmatmul.msk.bf16.gmra.mxu3 %vm1579_vm6, %v1756_v25 }
 0x2c6   :  { %v1537_v30 = vsel %vm223_vm3, %v1532_v47, %v1536_v48  ;;  %v1471_v55 = vadd.f32 %v1470_v0, %v1418_v46  ;;  %v1540_v17 = vor.u32 %v1538_v58, %v1536_v48 }
 0x2c7   :  { %3434 = vmatmul.msk.bf16.gmra.mxu1 %vm1579_vm6, %v1537_v30 }
 0x2cb   :  { %v1419_v13 = vpop.f32.mrf.mxu3 }
 0x2cc   :  { %v1420_v51 = vadd.f32 %v1419_v13, %v4716_v53  ;;  %v1487_v39 = vpop.f32.mrf.mxu0 }
 0x2ce   :  { %v1473_v56 = vadd.f32 %v1472_v59, %v1420_v51 }
 0x2d0   :  { %v1494_v52 = vpack.c.bf16 %v1473_v56, %v1471_v55 }
 0x2d2   :  { %3449 = vmatmul.msk.bf16.gmra.mxu2 %vm1579_vm6, %v1494_v52  ;;  %v1757_v62 = vrot.slane %v1494_v52, 1  ;;  %v1542_v24 = vshll.u32 %v1494_v52, 16  ;;  %v1546_v2 = vshrl.u32 %v1494_v52, 16  ;;  %v4812_v52 = vld [vmem:[#allocation14] sm:$0xff] }
 0x2d3   :  { %v1422_v60 = vpop.f32.mrf.mxu3 }
 0x2d4   :  { %v1758_v61 = vsel %vm663_vm2, %v1755_v42, %v1757_v62  ;;  %v1544_v63 = vrot.slane %v1542_v24, 1  ;;  %v1423_v53 = vadd.f32 %v1422_v60, %v4725_v40 }
 0x2d5   :  { %3461 = vmatmul.msk.bf16.gmra.mxu3 %vm1579_vm6, %v1758_v61 }
 0x2d6   :  { %v1545_v50 = vsel %vm223_vm3, %v1540_v17, %v1544_v63  ;;  %v1476_v28 = vadd.f32 %v1475_v35, %v1423_v53  ;;  %v1548_v6 = vor.u32 %v1546_v2, %v1544_v63 }
 0x2d7   :  { %3435 = vmatmul.msk.bf16.gmra.mxu1 %vm1579_vm6, %v1545_v50 }
 0x2db   :  { %v1424_v0 = vpop.f32.mrf.mxu3 }
 0x2dc   :  { %v1425_v15 = vadd.f32 %v1424_v0, %v4733_v43 }
 0x2de   :  { %v1478_v31 = vadd.f32 %v1477_v21, %v1425_v15 }
 0x2e0   :  { %v1495_v49 = vpack.c.bf16 %v1478_v31, %v1476_v28 }
 0x2e2   :  { %3450 = vmatmul.msk.bf16.gmra.mxu2 %vm1579_vm6, %v1495_v49  ;;  %v1759_v37 = vrot.slane %v1495_v49, 1  ;;  %v1550_v9 = vshll.u32 %v1495_v49, 16  ;;  %v1554_v12 = vshrl.u32 %v1495_v49, 16 }
 0x2e3   :  { %v1427_v59 = vpop.f32.mrf.mxu3 }
 0x2e4   :  { %v1760_v34 = vsel %vm663_vm2, %v1757_v62, %v1759_v37  ;;  %v1552_v14 = vrot.slane %v1550_v9, 1  ;;  %v1428_v43 = vadd.f32 %v1427_v59, %v4735_v7  ;;  %v4815_v62 = vperm.slane %v4812_v52, 1 }
 0x2e5   :  { %3462 = vmatmul.msk.bf16.gmra.mxu3 %vm1579_vm6, %v1760_v34 }
 0x2e6   :  { %v1553_v40 = vsel %vm223_vm3, %v1548_v6, %v1552_v14  ;;  %v1481_v5 = vadd.f32 %v1480_v29, %v1428_v43  ;;  %v1556_v10 = vor.u32 %v1554_v12, %v1552_v14 }
 0x2e7   :  { %3436 = vmatmul.msk.bf16.gmra.mxu1 %vm1579_vm6, %v1553_v40 }
 0x2eb   :  { %v1429_v1 = vpop.f32.mrf.mxu3 }
 0x2ec   :  { %v1430_v4 = vadd.f32 %v1429_v1, %v4747_v38 }
 0x2ee   :  { %v1483_v35 = vadd.f32 %v1482_v57, %v1430_v4 }
 0x2f0   :  { %v1496_v8 = vpack.c.bf16 %v1483_v35, %v1481_v5 }
 0x2f2   :  { %3451 = vmatmul.msk.bf16.gmra.mxu2 %vm1579_vm6, %v1496_v8  ;;  %v1761_v18 = vrot.slane %v1496_v8, 1  ;;  %v1558_v16 = vshll.u32 %v1496_v8, 16  ;;  %v1562_v54 = vshrl.u32 %v1496_v8, 16 }
 0x2f3   :  { %v1432_v19 = vpop.f32.mrf.mxu3 }
 0x2f4   :  { %v1433_v20 = vadd.f32 %v1432_v19, %v4749_v3  ;;  %v1762_v22 = vsel %vm663_vm2, %v1759_v37, %v1761_v18  ;;  %v1560_v23 = vrot.slane %v1558_v16, 1 }
 0x2f5   :  { %3463 = vmatmul.msk.bf16.gmra.mxu3 %vm1579_vm6, %v1762_v22 }
 0x2f6   :  { %v1486_v7 = vadd.f32 %v1485_v11, %v1433_v20  ;;  %v1561_v38 = vsel %vm223_vm3, %v1556_v10, %v1560_v23  ;;  %v1564_v42 = vor.u32 %v1562_v54, %v1560_v23 }
 0x2f7   :  { %3437 = vmatmul.msk.bf16.gmra.mxu1 %vm1579_vm6, %v1561_v38 }
 0x2f8   :  { %v1497_v21 = vpack.c.bf16 %v1486_v7, %v1486_v7 }
 0x2fa   :  { %v1566_v27 = vshll.u32 %v1497_v21, 16  ;;  %v1763_v33 = vrot.slane %v1497_v21, 1  ;;  %v1570_v25 = vshrl.u32 %v1497_v21, 16 }
 0x2fb   :  { %v1434_v41 = vpop.f32.mrf.mxu3 }
 0x2fc   :  { %v1568_v36 = vrot.slane %v1566_v27, 1  ;;  %v1764_v3 = vsel %vm663_vm2, %v1761_v18, %v1763_v33 }
 0x2fe   :  { %v1569_v45 = vsel %vm223_vm3, %v1564_v42, %v1568_v36  ;;  %v1572_v30 = vor.u32 %v1570_v25, %v1568_v36 }
 0x302   :  { %3452 = vmatmul.msk.bf16.gmra.mxu2 %vm1579_vm6, %v1497_v21 }
 0x305   :  { %v1693_v44 = vpop.f32.mrf.mxu2  ;;  %3464 = vmatmul.msk.bf16.gmra.mxu3 %vm1579_vm6, %v1764_v3 }
 0x307   :  { %3438 = vmatmul.msk.bf16.gmra.mxu1 %vm1579_vm6, %v1569_v45 }
 0x30d   :  { %v1695_v26 = vpop.f32.mrf.mxu2 }
 0x314   :  { %v1616_v47 = vpop.f32.mrf.mxu1 }
 0x315   :  { %v1694_v48 = vadd.f32 %v1693_v44, %v1616_v47  ;;  %v1698_v29 = vpop.f32.mrf.mxu2  ;;  %3465 = vmatmul.msk.bf16.gmra.mxu3 %vm1579_vm6, %v1763_v33 }
 0x317   :  { %3439 = vmatmul.msk.bf16.gmra.mxu1 %vm1579_vm6, %v1572_v30 }
 0x318   :  { %v1807_v46 = vpop.f32.mrf.mxu3 }
 0x319   :  { %v1851_v13 = vadd.f32 %v1807_v46, %v1694_v48 }
 0x31b   :  { %v1869_v61 = vadd.f32 %v4815_v62, %v1851_v13 }
 0x31c   :  { %v1618_v51 = vpop.f32.mrf.mxu1 }
 0x31d   :  { %v1700_v55 = vpop.f32.mrf.mxu2  ;;  %v1696_v56 = vadd.f32 %v1695_v26, %v1618_v51  ;;  %v1886_v53 = vmax.f32 %v1869_v61, 0.0 }
 0x31f   :  { %v1920_v39 = vrot.slane %v1886_v53, 1 }
 0x320   :  { %v1809_v57 = vpop.f32.mrf.mxu3 }
 0x321   :  { %v1852_v58 = vadd.f32 %v1809_v57, %v1696_v56 }
 0x323   :  { %v1870_v24 = vadd.f32 %v4815_v62, %v1852_v58 }
 0x324   :  { %v1621_v60 = vpop.f32.mrf.mxu1 }
 0x325   :  { %v1699_v17 = vadd.f32 %v1698_v29, %v1621_v60  ;;  %v1703_v63 = vpop.f32.mrf.mxu2  ;;  %v1887_v50 = vmax.f32 %v1870_v24, 0.0 }
 0x327   :  { %v1921_v15 = vrot.slane %v1887_v50, 1 }
 0x328   :  { %v1812_v11 = vpop.f32.mrf.mxu3 }
 0x329   :  { %v1853_v0 = vadd.f32 %v1812_v11, %v1699_v17  ;;  %v1922_v59 = vsel %vm663_vm2, %v1920_v39, %v1921_v15 }
 0x32a   :  { %v4822_v40 = vmax.f32 %v1886_v53, %v1922_v59 }
 0x32b   :  { %v1871_v28 = vadd.f32 %v4815_v62, %v1853_v0 }
 0x32c   :  { %v1623_v31 = vpop.f32.mrf.mxu1 }
 0x32d   :  { %v1888_v49 = vmax.f32 %v1871_v28, 0.0  ;;  %v1705_v37 = vpop.f32.mrf.mxu2  ;;  %v1701_v9 = vadd.f32 %v1700_v55, %v1623_v31 }
 0x32f   :  { %v1923_v2 = vrot.slane %v1888_v49, 1 }
 0x330   :  { %v1814_v34 = vpop.f32.mrf.mxu3 }
 0x331   :  { %v1854_v6 = vadd.f32 %v1814_v34, %v1701_v9  ;;  %v1924_v14 = vsel %vm663_vm2, %v1921_v15, %v1923_v2 }
 0x332   :  { %v4824_v43 = vmax.f32 %v1887_v50, %v1924_v14 }
 0x333   :  { %v1872_v1 = vadd.f32 %v4815_v62, %v1854_v6 }
 0x334   :  { %v1626_v4 = vpop.f32.mrf.mxu1  ;;  %v1987_v5 = vpack.c.bf16 %v4824_v43, %v4822_v40 }
 0x335   :  { %v1704_v35 = vadd.f32 %v1703_v63, %v1626_v4  ;;  %v1708_v8 = vpop.f32.mrf.mxu2  ;;  %v1889_v18 = vmax.f32 %v1872_v1, 0.0 }
 0x337   :  { %v1925_v19 = vrot.slane %v1889_v18, 1 }
 0x338   :  { %v1817_v12 = vpop.f32.mrf.mxu3 }
 0x339   :  { %v1855_v16 = vadd.f32 %v1817_v12, %v1704_v35  ;;  %v1926_v21 = vsel %vm663_vm2, %v1923_v2, %v1925_v19 }
 0x33a   :  { %v4832_v54 = vmax.f32 %v1888_v49, %v1926_v21 }
 0x33b   :  { %v1873_v20 = vadd.f32 %v4815_v62, %v1855_v16 }
 0x33c   :  { %v1628_v22 = vpop.f32.mrf.mxu1 }
 0x33d   :  { %v1890_v10 = vmax.f32 %v1873_v20, 0.0  ;;  %v1710_v23 = vpop.f32.mrf.mxu2  ;;  %v1706_v38 = vadd.f32 %v1705_v37, %v1628_v22 }
 0x33f   :  { %v1927_v7 = vrot.slane %v1890_v10, 1 }
 0x340   :  { %v1819_v41 = vpop.f32.mrf.mxu3 }
 0x341   :  { %v1856_v27 = vadd.f32 %v1819_v41, %v1706_v38  ;;  %v1928_v33 = vsel %vm663_vm2, %v1925_v19, %v1927_v7 }
 0x342   :  { %v4834_v36 = vmax.f32 %v1889_v18, %v1928_v33 }
 0x343   :  { %v1874_v3 = vadd.f32 %v4815_v62, %v1856_v27 }
 0x344   :  { %v1631_v42 = vpop.f32.mrf.mxu1  ;;  %v1988_v44 = vpack.c.bf16 %v4834_v36, %v4832_v54  ;;  %v3484_v36 = vld [vmem:[#allocation10 + $0x20] sm:$0xf] }
 0x345   :  { %v1709_v45 = vadd.f32 %v1708_v8, %v1631_v42  ;;  %v1713_v26 = vpop.f32.mrf.mxu2  ;;  %v1891_v25 = vmax.f32 %v1874_v3, 0.0 }
 0x347   :  { %v1929_v29 = vrot.slane %v1891_v25, 1 }
 0x348   :  { %v1822_v47 = vpop.f32.mrf.mxu3 }
 0x349   :  { %v1857_v48 = vadd.f32 %v1822_v47, %v1709_v45  ;;  %v1930_v57 = vsel %vm663_vm2, %v1927_v7, %v1929_v29 }
 0x34a   :  { %v4842_v61 = vmax.f32 %v1890_v10, %v1930_v57 }
 0x34b   :  { %v1875_v30 = vadd.f32 %v4815_v62, %v1857_v48 }
 0x34c   :  { %v1633_v46 = vpop.f32.mrf.mxu1 }
 0x34d   :  { %v1892_v13 = vmax.f32 %v1875_v30, 0.0  ;;  %v1715_v51 = vpop.f32.mrf.mxu2  ;;  %v1711_v56 = vadd.f32 %v1710_v23, %v1633_v46 }
 0x34f   :  { %v1931_v55 = vrot.slane %v1892_v13, 1 }
 0x350   :  { %v1824_v58 = vpop.f32.mrf.mxu3 }
 0x351   :  { %v1858_v24 = vadd.f32 %v1824_v58, %v1711_v56  ;;  %v1932_v60 = vsel %vm663_vm2, %v1929_v29, %v1931_v55 }
 0x352   :  { %v4844_v17 = vmax.f32 %v1891_v25, %v1932_v60 }
 0x353   :  { %v1876_v63 = vadd.f32 %v4815_v62, %v1858_v24 }
 0x354   :  { %v1636_v50 = vpop.f32.mrf.mxu1  ;;  %v1989_v11 = vpack.c.bf16 %v4844_v17, %v4842_v61  ;;  %v3476_v61 = vld [vmem:[#allocation10 + $0x10] sm:$0xf]  ;;  %v3761_v17 = vld [vmem:[#allocation10 + $0x14] sm:$0xf0] }
 0x355   :  { %v1714_v53 = vadd.f32 %v1713_v26, %v1636_v50  ;;  %v1718_v0 = vpop.f32.mrf.mxu2  ;;  %v1893_v15 = vmax.f32 %v1876_v63, 0.0 }
 0x357   :  { %v1933_v39 = vrot.slane %v1893_v15, 1 }
 0x358   :  { %v1827_v28 = vpop.f32.mrf.mxu3 }
 0x359   :  { %v1859_v31 = vadd.f32 %v1827_v28, %v1714_v53  ;;  %v1934_v6 = vsel %vm663_vm2, %v1931_v55, %v1933_v39 }
 0x35a   :  { %v4852_v35 = vmax.f32 %v1892_v13, %v1934_v6 }
 0x35b   :  { %v1877_v49 = vadd.f32 %v4815_v62, %v1859_v31 }
 0x35c   :  { %v1638_v37 = vpop.f32.mrf.mxu1 }
 0x35d   :  { %v1894_v2 = vmax.f32 %v1877_v49, 0.0  ;;  %v1720_v9 = vpop.f32.mrf.mxu2  ;;  %v1716_v34 = vadd.f32 %v1715_v51, %v1638_v37 }
 0x35f   :  { %v1935_v59 = vrot.slane %v1894_v2, 1 }
 0x360   :  { %v1829_v14 = vpop.f32.mrf.mxu3 }
 0x361   :  { %v1860_v1 = vadd.f32 %v1829_v14, %v1716_v34  ;;  %v1936_v4 = vsel %vm663_vm2, %v1933_v39, %v1935_v59 }
 0x362   :  { %v4854_v8 = vmax.f32 %v1893_v15, %v1936_v4 }
 0x363   :  { %v1878_v18 = vadd.f32 %v4815_v62, %v1860_v1 }
 0x364   :  { %v1641_v12 = vpop.f32.mrf.mxu1  ;;  %v1990_v16 = vpack.c.bf16 %v4854_v8, %v4852_v35  ;;  %v3762_v35 = vld [vmem:[#allocation10 + $0x24] sm:$0xf]  ;;  %v3486_v8 = vld [vmem:[#allocation10 + $0x28] sm:$0xf0] }
 0x365   :  { %v1723_v19 = vpop.f32.mrf.mxu2  ;;  %v1895_v20 = vmax.f32 %v1878_v18, 0.0  ;;  %v1719_v22 = vadd.f32 %v1718_v0, %v1641_v12 }
 0x367   :  { %v1937_v7 = vrot.slane %v1895_v20, 1 }
 0x368   :  { %v1832_v10 = vpop.f32.mrf.mxu3 }
 0x369   :  { %v1861_v23 = vadd.f32 %v1832_v10, %v1719_v22  ;;  %v1938_v3 = vsel %vm663_vm2, %v1935_v59, %v1937_v7 }
 0x36a   :  { %v4870_v26 = vmax.f32 %v1894_v2, %v1938_v3 }
 0x36b   :  { %v4860_v38 = vadd.f32 %v4815_v62, %v1861_v23 }
 0x36c   :  { %v1643_v21 = vpop.f32.mrf.mxu1 }
 0x36d   :  { %v1896_v41 = vmax.f32 %v4860_v38, 0.0  ;;  %v1725_v27 = vpop.f32.mrf.mxu2  ;;  %v1721_v37 = vadd.f32 %v1720_v9, %v1643_v21  ;;  %v3468_v38 = vld [vmem:[#allocation10] sm:$0xf] }
 0x36f   :  { %v4865_v33 = vrot.slane %v1896_v41, 1 }
 0x370   :  { %v1834_v42 = vpop.f32.mrf.mxu3 }
 0x371   :  { %v1940_v45 = vsel %vm663_vm2, %v1937_v7, %v4865_v33  ;;  %v1862_v34 = vadd.f32 %v1834_v42, %v1721_v37 }
 0x372   :  { %v4872_v25 = vmax.f32 %v1895_v20, %v1940_v45 }
 0x374   :  { %v1646_v47 = vpop.f32.mrf.mxu1  ;;  %v1991_v48 = vpack.c.bf16 %v4872_v25, %v4870_v26  ;;  %v3764_v25 = vld [vmem:[#allocation10 + $0x34] sm:$0xf] }
 0x375   :  { %v1728_v29 = vpop.f32.mrf.mxu2  ;;  %v1724_v28 = vadd.f32 %v1723_v19, %v1646_v47  ;;  %v1880_v19 = vadd.f32 %v4815_v62, %v1862_v34  ;;  %v3478_v34 = vld [vmem:[#allocation10 + $0x18] sm:$0xf0] }
 0x377   :  { %v1897_v3 = vmax.f32 %v1880_v19, 0.0  ;;  %v3767_v19 = vld [vmem:[#allocation7 + $0x8] sm:$0xff] }
 0x378   :  { %v1837_v30 = vpop.f32.mrf.mxu3  ;;  %2272 = vmatpush.bf16.msrb.mxu3 %v3767_v19 }
 0x379   :  { %v1863_v2 = vadd.f32 %v1837_v30, %v1724_v28 }
 0x37b   :  { %v1881_v18 = vadd.f32 %v4815_v62, %v1863_v2 }
 0x37c   :  { %v1648_v46 = vpop.f32.mrf.mxu1 }
 0x37d   :  { %v1730_v13 = vpop.f32.mrf.mxu2  ;;  %v1726_v53 = vadd.f32 %v1725_v27, %v1648_v46  ;;  %v1898_v7 = vmax.f32 %v1881_v18, 0.0 }
 0x37f   :  { %v1943_v30 = vrot.slane %v1898_v7, 1 }
 0x380   :  { %v1839_v51 = vpop.f32.mrf.mxu3 }
 0x381   :  { %v1864_v31 = vadd.f32 %v1839_v51, %v1726_v53 }
 0x383   :  { %v1882_v6 = vadd.f32 %v4815_v62, %v1864_v31 }
 0x384   :  { %v1651_v55 = vpop.f32.mrf.mxu1 }
 0x385   :  { %v1733_v56 = vpop.f32.mrf.mxu2  ;;  %v1729_v60 = vadd.f32 %v1728_v29, %v1651_v55  ;;  %v1899_v22 = vmax.f32 %v1882_v6, 0.0  ;;  %v2004_v6 = vld [vmem:[#allocation10 + $0x40] sm:$0x33] }
 0x386   :  { %v2031_v43 = vunpack.c.h.b16 %v2004_v6  ;;  %v2030_v18 = vunpack.c.l.b16 %v2004_v6 }
 0x387   :  { %v1945_v42 = vrot.slane %v1899_v22, 1 }
 0x388   :  { %v1842_v57 = vpop.f32.mrf.mxu3 }
 0x389   :  { %v1865_v0 = vadd.f32 %v1842_v57, %v1729_v60  ;;  %v1941_v57 = vrot.slane %v1897_v3, 1  ;;  %v3470_v60 = vld [vmem:[#allocation10 + $0x8] sm:$0xf0] }
 0x38b   :  { %v1883_v59 = vadd.f32 %v4815_v62, %v1865_v0  ;;  %v1944_v0 = vsel %vm663_vm2, %v1941_v57, %v1943_v30  ;;  %v1942_v31 = vsel %vm663_vm2, %v4865_v33, %v1941_v57 }
 0x38c   :  { %v1653_v58 = vpop.f32.mrf.mxu1  ;;  %v1980_v37 = vmax.f32 %v1896_v41, %v1942_v31  ;;  %v3759_v41 = vld [vmem:[#allocation10 + $0x4] sm:$0xf0] }
 0x38d   :  { %v1735_v24 = vpop.f32.mrf.mxu2  ;;  %v1731_v63 = vadd.f32 %v1730_v13, %v1653_v58  ;;  %v1900_v12 = vmax.f32 %v1883_v59, 0.0  ;;  %v1946_v58 = vsel %vm663_vm2, %v1943_v30, %v1945_v42  ;;  %v3760_v59 = vld [vmem:[#allocation10 + $0x14] sm:$0xf]  ;;  %v3469_v26 = vor.u32 %v3759_v41, %v3468_v38 }
 0x38e   :  { %v3758_v24 = vld [vmem:[#allocation10 + $0x4] sm:$0xf]  ;;  %v3481_v33 = vor.u32 %v3760_v59, %v3478_v34 }
 0x38f   :  { %v1947_v21 = vrot.slane %v1900_v12, 1  ;;  %v3473_v28 = vor.u32 %v3758_v24, %v3470_v60 }
 0x390   :  { %v1844_v50 = vpop.f32.mrf.mxu3 }
 0x391   :  { %v1866_v15 = vadd.f32 %v1844_v50, %v1731_v63  ;;  %v1948_v51 = vsel %vm663_vm2, %v1945_v42, %v1947_v21 }
 0x392   :  { %v1983_v50 = vmax.f32 %v1899_v22, %v1948_v51  ;;  %v3766_v22 = vld [vmem:[#allocation7] sm:$0xff] }
 0x393   :  { %v1884_v39 = vadd.f32 %v4815_v62, %v1866_v15  ;;  %v1982_v15 = vmax.f32 %v1898_v7, %v1946_v58  ;;  %2273 = vmatpush.bf16.msrb.mxu3 %v3766_v22  ;;  %v3769_v7 = vld [vmem:[#allocation7 + $0x18] sm:$0xff] }
 0x394   :  { %v1656_v49 = vpop.f32.mrf.mxu1  ;;  %2217 = vmatpush.bf16.msra.mxu2 %v3769_v7 }
 0x395   :  { %v1901_v14 = vmax.f32 %v1884_v39, 0.0  ;;  %v1734_v1 = vadd.f32 %v1733_v56, %v1656_v49  ;;  %v1993_v39 = vpack.c.bf16 %v1983_v50, %v1982_v15  ;;  %v1981_v49 = vmax.f32 %v1897_v3, %v1944_v0  ;;  %v3768_v3 = vld [vmem:[#allocation7 + $0x10] sm:$0xff] }
 0x397   :  { %v1949_v10 = vrot.slane %v1901_v14, 1  ;;  %v1992_v2 = vpack.c.bf16 %v1981_v49, %v1980_v37 }
 0x398   :  { %v1847_v4 = vpop.f32.mrf.mxu3  ;;  %2218 = vmatpush.bf16.msra.mxu2 %v3768_v3 }
 0x399   :  { %v1867_v20 = vadd.f32 %v1847_v4, %v1734_v1  ;;  %v1950_v45 = vsel %vm663_vm2, %v1947_v21, %v1949_v10  ;;  %v3765_v1 = vld [vmem:[#allocation10 + $0x34] sm:$0xf0]  ;;  %v3770_v21 = vld [vmem:[#allocation7 + $0x20] sm:$0xff] }
 0x39a   :  { %v1984_v55 = vmax.f32 %v1900_v12, %v1950_v45  ;;  %v2040_v12 = vpack.c.b16 %v2030_v18, %v2030_v18 }
 0x39b   :  { %v1885_v23 = vadd.f32 %v4815_v62, %v1867_v20 }
 0x39c   :  { %v1658_v9 = vpop.f32.mrf.mxu1 }
 0x39d   :  { %v1902_v27 = vmax.f32 %v1885_v23, 0.0  ;;  %v3771_v9 = vld [vmem:[#allocation7 + $0x28] sm:$0xff] }
 0x39f   :  { %v1951_v47 = vrot.slane %v1902_v27, 1 }
 0x3a0   :  { %v1849_v29 = vpop.f32.mrf.mxu3 }
 0x3a1   :  { %v1952_v46 = vsel %vm663_vm2, %v1949_v10, %v1951_v47  ;;  %v1986_v13 = vmax.f32 %v1902_v27, %v1951_v47 }
 0x3a2   :  { %v1985_v56 = vmax.f32 %v1901_v14, %v1952_v46  ;;  %v3492_v14 = vld [vmem:[#allocation10 + $0x30] sm:$0xf] }
 0x3a3   :  { %v1995_v62 = vpack.c.bf16 %v1986_v13, %v1986_v13  ;;  %v3493_v4 = vor.u32 %v3765_v1, %v3492_v14 }
 0x3a4   :  { %v1994_v63 = vpack.c.bf16 %v1985_v56, %v1984_v55 }
 0x3a5   :  { %v2063_v53 = vand.u32 %v1995_v62, %v4573_v32 }
 0x3a6   :  { %2065 = vmatpush.bf16.msra.mxu0 %v1994_v63 }
 0x3a7   :  { %2105 = vmatpush.bf16.msra.mxu1 %v2063_v53 }
 0x3aa   :  { %2066 = vmatpush.bf16.msra.mxu0 %v1993_v39  ;;  %3498 = vmatmul.msk.bf16.vlgmr.msra.gmra.mxu1 %vm1296_vm5, %v3473_v28 }
 0x3ae   :  { %2067 = vmatpush.bf16.msra.mxu0 %v1992_v2 }
 0x3b2   :  { %2068 = vmatpush.bf16.msra.mxu0 %v1991_v48  ;;  %v3494_v48 = vld [vmem:[#allocation10 + $0x38] sm:$0xf0] }
 0x3b3   :  { %v3497_v54 = vor.u32 %v3764_v25, %v3494_v48 }
 0x3b6   :  { %2069 = vmatpush.bf16.msra.mxu0 %v1990_v16  ;;  %v3489_v16 = vor.u32 %v3762_v35, %v3486_v8 }
 0x3ba   :  { %2070 = vmatpush.bf16.msra.mxu0 %v1989_v11  ;;  %3499 = vmatmul.msk.bf16.gmra.mxu1 %vm1296_vm5, %v3481_v33  ;;  %v3477_v11 = vor.u32 %v3761_v17, %v3476_v61 }
 0x3be   :  { %2071 = vmatpush.bf16.msra.mxu0 %v1988_v44  ;;  %v3763_v44 = vld [vmem:[#allocation10 + $0x24] sm:$0xf0] }
 0x3bf   :  { %v3485_v40 = vor.u32 %v3763_v44, %v3484_v36 }
 0x3c2   :  { %2072 = vmatpush.bf16.msra.mxu0 %v1987_v5  ;;  %v2041_v5 = vpack.c.b16 %v2031_v43, %v2031_v43 }
 0x3c5   :  { %2073 = vmatmul.bf16.vlgmr.msra.gmra.mxu0 %v3469_v26 }
 0x3c6   :  { %2350 = vmatpush.bf16.msrb.mxu0 %v3771_v9 }
 0x3ca   :  { %3500 = vmatmul.msk.bf16.gmra.mxu1 %vm1296_vm5, %v3489_v16  ;;  %2351 = vmatpush.bf16.msrb.mxu0 %v3770_v21 }
 0x3d5   :  { %2078 = vmatmul.bf16.gmra.mxu0 %v3477_v11 }
 0x3da   :  { %3501 = vmatmul.msk.bf16.gmra.mxu1 %vm1296_vm5, %v3497_v54 }
 0x3e5   :  { %2083 = vmatmul.bf16.gmra.mxu0 %v3485_v40 }
 0x3ea   :  { %3502 = vmatmul.msk.bf16.gmra.mxu1 %vm1296_vm5, %v2041_v5 }
 0x3f5   :  { %2088 = vmatmul.bf16.gmra.mxu0 %v3493_v4 }
 0x405   :  { %2093 = vmatmul.bf16.gmra.mxu0 %v2040_v12 }
 0x427   :  { %v2107_v20 = vpop.f32.mrf.mxu1 }
 0x42f   :  { %v2109_v10 = vpop.f32.mrf.mxu1 }
 0x437   :  { %v2112_v23 = vpop.f32.mrf.mxu1 }
 0x43f   :  { %v2114_v27 = vpop.f32.mrf.mxu1 }
 0x442   :  { %v2074_v42 = vpop.f32.mrf.mxu0 }
 0x443   :  { %v2108_v29 = vadd.f32 %v2107_v20, %v2074_v42 }
 0x447   :  { %v2117_v45 = vpop.f32.mrf.mxu1 }
 0x44a   :  { %v2076_v47 = vpop.f32.mrf.mxu0 }
 0x44b   :  { %v2110_v30 = vadd.f32 %v2109_v10, %v2076_v47 }
 0x44d   :  { %v2131_v46 = vpack.c.bf16 %v2110_v30, %v2108_v29 }
 0x44f   :  { %3524 = vmatmul.msk.bf16.vlgmr.msrb.gmra.mxu3 %vm2195_vm7, %v2131_v46  ;;  %v2119_v13 = vpop.f32.mrf.mxu1  ;;  %v2147_v56 = vshll.u32 %v2131_v46, 16  ;;  %v2145_v63 = vshrl.u32 %v2131_v46, 16  ;;  %v2308_v50 = vrot.slane %v2131_v46, 1 }
 0x451   :  { %v2149_v24 = vrot.slane %v2147_v56, 1 }
 0x452   :  { %v2079_v51 = vpop.f32.mrf.mxu0 }
 0x453   :  { %v2113_v62 = vadd.f32 %v2112_v23, %v2079_v51  ;;  %v2150_v31 = vor.u32 %v2149_v24, %v2145_v63 }
 0x457   :  { %v2122_v55 = vpop.f32.mrf.mxu1 }
 0x45a   :  { %v2081_v57 = vpop.f32.mrf.mxu0 }
 0x45b   :  { %v2115_v58 = vadd.f32 %v2114_v27, %v2081_v57  ;;  %v4936_v57 = vperm.slane %v4812_v52, 2 }
 0x45d   :  { %v2132_v60 = vpack.c.bf16 %v2115_v58, %v2113_v62 }
 0x45f   :  { %v2152_v53 = vshll.u32 %v2132_v60, 16  ;;  %v2309_v0 = vrot.slane %v2132_v60, 1  ;;  %3525 = vmatmul.msk.bf16.gmra.mxu3 %vm2195_vm7, %v2132_v60  ;;  %v2124_v15 = vpop.f32.mrf.mxu1  ;;  %v2156_v41 = vshrl.u32 %v2132_v60, 16 }
 0x461   :  { %v2154_v28 = vrot.slane %v2152_v53, 1  ;;  %v2310_v39 = vsel %vm663_vm2, %v2308_v50, %v2309_v0 }
 0x462   :  { %v2084_v49 = vpop.f32.mrf.mxu0  ;;  %3537 = vmatmul.msk.bf16.vlgmr.msrb.gmra.mxu0 %vm2195_vm7, %v2310_v39 }
 0x463   :  { %v2155_v37 = vsel %vm223_vm3, %v2150_v31, %v2154_v28  ;;  %v2118_v34 = vadd.f32 %v2117_v45, %v2084_v49  ;;  %v2158_v16 = vor.u32 %v2156_v41, %v2154_v28 }
 0x464   :  { %3511 = vmatmul.msk.bf16.vlgmr.msra.gmra.mxu2 %vm2195_vm7, %v2155_v37 }
 0x467   :  { %v2127_v2 = vpop.f32.mrf.mxu1 }
 0x46a   :  { %v2086_v59 = vpop.f32.mrf.mxu0 }
 0x46b   :  { %v2120_v33 = vadd.f32 %v2119_v13, %v2086_v59 }
 0x46d   :  { %v2133_v38 = vpack.c.bf16 %v2120_v33, %v2118_v34 }
 0x46f   :  { %v2160_v26 = vshll.u32 %v2133_v38, 16  ;;  %v2311_v35 = vrot.slane %v2133_v38, 1  ;;  %3526 = vmatmul.msk.bf16.gmra.mxu3 %vm2195_vm7, %v2133_v38  ;;  %v2129_v8 = vpop.f32.mrf.mxu1  ;;  %v2164_v6 = vshrl.u32 %v2133_v38, 16 }
 0x471   :  { %v2162_v61 = vrot.slane %v2160_v26, 1  ;;  %v2312_v17 = vsel %vm663_vm2, %v2309_v0, %v2311_v35 }
 0x472   :  { %v2089_v11 = vpop.f32.mrf.mxu0  ;;  %3538 = vmatmul.msk.bf16.gmra.mxu0 %vm2195_vm7, %v2312_v17 }
 0x473   :  { %v2163_v25 = vsel %vm223_vm3, %v2158_v16, %v2162_v61  ;;  %v2123_v54 = vadd.f32 %v2122_v55, %v2089_v11  ;;  %v2166_v5 = vor.u32 %v2164_v6, %v2162_v61 }
 0x474   :  { %3512 = vmatmul.msk.bf16.gmra.mxu2 %vm2195_vm7, %v2163_v25 }
 0x47a   :  { %v2091_v48 = vpop.f32.mrf.mxu0 }
 0x47b   :  { %v2125_v36 = vadd.f32 %v2124_v15, %v2091_v48 }
 0x47d   :  { %v2134_v44 = vpack.c.bf16 %v2125_v36, %v2123_v54 }
 0x47f   :  { %v2168_v40 = vshll.u32 %v2134_v44, 16  ;;  %v2313_v43 = vrot.slane %v2134_v44, 1  ;;  %3527 = vmatmul.msk.bf16.gmra.mxu3 %vm2195_vm7, %v2134_v44  ;;  %v2172_v23 = vshrl.u32 %v2134_v44, 16 }
 0x481   :  { %v2170_v14 = vrot.slane %v2168_v40, 1  ;;  %v2314_v1 = vsel %vm663_vm2, %v2311_v35, %v2313_v43 }
 0x482   :  { %v2094_v4 = vpop.f32.mrf.mxu0  ;;  %3539 = vmatmul.msk.bf16.gmra.mxu0 %vm2195_vm7, %v2314_v1 }
 0x483   :  { %v2171_v18 = vsel %vm223_vm3, %v2166_v5, %v2170_v14  ;;  %v2128_v12 = vadd.f32 %v2127_v2, %v2094_v4  ;;  %v2174_v7 = vor.u32 %v2172_v23, %v2170_v14 }
 0x484   :  { %3513 = vmatmul.msk.bf16.gmra.mxu2 %vm2195_vm7, %v2171_v18 }
 0x485   :  { %v2135_v20 = vpack.c.bf16 %v2128_v12, %v2128_v12 }
 0x487   :  { %v2176_v22 = vshll.u32 %v2135_v20, 16  ;;  %v2315_v10 = vrot.slane %v2135_v20, 1  ;;  %v2180_v3 = vshrl.u32 %v2135_v20, 16 }
 0x489   :  { %v2178_v9 = vrot.slane %v2176_v22, 1  ;;  %v2316_v21 = vsel %vm663_vm2, %v2313_v43, %v2315_v10 }
 0x48a   :  { %v2096_v19 = vpop.f32.mrf.mxu0 }
 0x48b   :  { %v2179_v27 = vsel %vm223_vm3, %v2174_v7, %v2178_v9  ;;  %v2182_v42 = vor.u32 %v2180_v3, %v2178_v9 }
 0x48f   :  { %3528 = vmatmul.msk.bf16.gmra.mxu3 %vm2195_vm7, %v2135_v20 }
 0x492   :  { %3540 = vmatmul.msk.bf16.gmra.mxu0 %vm2195_vm7, %v2316_v21 }
 0x494   :  { %3514 = vmatmul.msk.bf16.gmra.mxu2 %vm2195_vm7, %v2179_v27 }
 0x4a2   :  { %3541 = vmatmul.msk.bf16.gmra.mxu0 %vm2195_vm7, %v2315_v10 }
 0x4a4   :  { %3515 = vmatmul.msk.bf16.gmra.mxu2 %vm2195_vm7, %v2182_v42 }
 0x4d2   :  { %v2275_v45 = vpop.f32.mrf.mxu3 }
 0x4da   :  { %v2277_v47 = vpop.f32.mrf.mxu3 }
 0x4df   :  { %v2353_v29 = vpop.f32.mrf.mxu0 }
 0x4e2   :  { %v2280_v30 = vpop.f32.mrf.mxu3 }
 0x4e7   :  { %v2220_v46 = vpop.f32.mrf.mxu2  ;;  %v2355_v13 = vpop.f32.mrf.mxu0 }
 0x4e8   :  { %v2276_v51 = vadd.f32 %v2275_v45, %v2220_v46 }
 0x4ea   :  { %v2377_v55 = vadd.f32 %v2353_v29, %v2276_v51  ;;  %v2282_v56 = vpop.f32.mrf.mxu3 }
 0x4ec   :  { %v2387_v24 = vadd.f32 %v4936_v57, %v2377_v55 }
 0x4ee   :  { %v2396_v53 = vmax.f32 %v2387_v24, 0.0 }
 0x4ef   :  { %v2222_v62 = vpop.f32.mrf.mxu2  ;;  %v2358_v58 = vpop.f32.mrf.mxu0 }
 0x4f0   :  { %v2278_v60 = vadd.f32 %v2277_v47, %v2222_v62  ;;  %v2414_v39 = vrot.slane %v2396_v53, 1 }
 0x4f2   :  { %v2378_v63 = vadd.f32 %v2355_v13, %v2278_v60  ;;  %v2285_v50 = vpop.f32.mrf.mxu3 }
 0x4f4   :  { %v2388_v0 = vadd.f32 %v4936_v57, %v2378_v63 }
 0x4f6   :  { %v2397_v15 = vmax.f32 %v2388_v0, 0.0 }
 0x4f7   :  { %v2225_v28 = vpop.f32.mrf.mxu2  ;;  %v2360_v31 = vpop.f32.mrf.mxu0 }
 0x4f8   :  { %v2415_v49 = vrot.slane %v2397_v15, 1  ;;  %v2281_v37 = vadd.f32 %v2280_v30, %v2225_v28 }
 0x4fa   :  { %v2379_v2 = vadd.f32 %v2358_v58, %v2281_v37  ;;  %v2287_v59 = vpop.f32.mrf.mxu3  ;;  %v2416_v34 = vsel %vm663_vm2, %v2414_v39, %v2415_v49 }
 0x4fb   :  { %v4941_v33 = vmax.f32 %v2396_v53, %v2416_v34 }
 0x4fc   :  { %v2389_v38 = vadd.f32 %v4936_v57, %v2379_v2 }
 0x4fe   :  { %v2398_v41 = vmax.f32 %v2389_v38, 0.0 }
 0x4ff   :  { %v2227_v26 = vpop.f32.mrf.mxu2  ;;  %v2363_v35 = vpop.f32.mrf.mxu0 }
 0x500   :  { %v2417_v8 = vrot.slane %v2398_v41, 1  ;;  %v2283_v16 = vadd.f32 %v2282_v56, %v2227_v26 }
 0x502   :  { %v2380_v61 = vadd.f32 %v2360_v31, %v2283_v16  ;;  %v2290_v17 = vpop.f32.mrf.mxu3  ;;  %v2418_v11 = vsel %vm663_vm2, %v2415_v49, %v2417_v8 }
 0x503   :  { %v4945_v25 = vmax.f32 %v2397_v15, %v2418_v11 }
 0x504   :  { %v2390_v48 = vadd.f32 %v4936_v57, %v2380_v61 }
 0x505   :  { %v2449_v54 = vpack.c.bf16 %v4945_v25, %v4941_v33 }
 0x506   :  { %v2399_v36 = vmax.f32 %v2390_v48, 0.0 }
 0x507   :  { %v2230_v44 = vpop.f32.mrf.mxu2  ;;  %v2365_v6 = vpop.f32.mrf.mxu0 }
 0x508   :  { %v2419_v40 = vrot.slane %v2399_v36, 1  ;;  %v2286_v43 = vadd.f32 %v2285_v50, %v2230_v44  ;;  %v3773_v44 = vld [vmem:[#allocation11 + $0x8] sm:$0xff] }
 0x50a   :  { %v2381_v5 = vadd.f32 %v2363_v35, %v2286_v43  ;;  %v2292_v14 = vpop.f32.mrf.mxu3  ;;  %v2420_v1 = vsel %vm663_vm2, %v2417_v8, %v2419_v40 }
 0x50b   :  { %v2442_v4 = vmax.f32 %v2398_v41, %v2420_v1  ;;  %v3779_v1 = vld [vmem:[#allocation8 + $0x28] sm:$0xff] }
 0x50c   :  { %v2391_v18 = vadd.f32 %v4936_v57, %v2381_v5  ;;  %v3775_v5 = vld [vmem:[#allocation8 + $0x8] sm:$0xff] }
 0x50d   :  { %2610 = vmatpush.bf16.msra.mxu3 %v3775_v5 }
 0x50e   :  { %v2400_v12 = vmax.f32 %v2391_v18, 0.0  ;;  %v3778_v18 = vld [vmem:[#allocation8 + $0x20] sm:$0xff] }
 0x50f   :  { %v2232_v20 = vpop.f32.mrf.mxu2  ;;  %v2368_v19 = vpop.f32.mrf.mxu0 }
 0x510   :  { %v2421_v22 = vrot.slane %v2400_v12, 1  ;;  %v2288_v30 = vadd.f32 %v2287_v59, %v2232_v20 }
 0x512   :  { %v2295_v10 = vpop.f32.mrf.mxu3  ;;  %v2422_v23 = vsel %vm663_vm2, %v2419_v40, %v2421_v22  ;;  %v2382_v62 = vadd.f32 %v2365_v6, %v2288_v30  ;;  %v2458_v6 = vld [vmem:[#allocation11 + $0x10] sm:$0x3] }
 0x513   :  { %v2443_v9 = vmax.f32 %v2399_v36, %v2422_v23  ;;  %v3772_v36 = vld [vmem:[#allocation11] sm:$0xff]  ;;  %v2468_v40 = vunpack.c.l.b16 %v2458_v6 }
 0x514   :  { %v2392_v50 = vadd.f32 %v4936_v57, %v2382_v62 }
 0x515   :  { %v2450_v7 = vpack.c.bf16 %v2443_v9, %v2442_v4  ;;  %v2471_v43 = vpack.c.b16 %v2468_v40, %v2468_v40  ;;  %v3777_v4 = vld [vmem:[#allocation8 + $0x18] sm:$0xff] }
 0x516   :  { %v2401_v39 = vmax.f32 %v2392_v50, 0.0  ;;  %2569 = vmatpush.bf16.msrb.mxu2 %v3777_v4 }
 0x517   :  { %v2235_v21 = vpop.f32.mrf.mxu2  ;;  %v2370_v27 = vpop.f32.mrf.mxu0 }
 0x518   :  { %v2291_v29 = vadd.f32 %v2290_v17, %v2235_v21  ;;  %v2423_v38 = vrot.slane %v2401_v39, 1 }
 0x51a   :  { %v2297_v3 = vpop.f32.mrf.mxu3  ;;  %v2383_v13 = vadd.f32 %v2368_v19, %v2291_v29  ;;  %v2424_v16 = vsel %vm663_vm2, %v2421_v22, %v2423_v38 }
 0x51b   :  { %v2444_v11 = vmax.f32 %v2400_v12, %v2424_v16  ;;  %v3776_v12 = vld [vmem:[#allocation8 + $0x10] sm:$0xff] }
 0x51c   :  { %v2393_v60 = vadd.f32 %v4936_v57, %v2383_v13  ;;  %2570 = vmatpush.bf16.msrb.mxu2 %v3776_v12 }
 0x51e   :  { %v2402_v15 = vmax.f32 %v2393_v60, 0.0 }
 0x51f   :  { %v2237_v42 = vpop.f32.mrf.mxu2  ;;  %v2373_v45 = vpop.f32.mrf.mxu0 }
 0x520   :  { %v2293_v47 = vadd.f32 %v2292_v14, %v2237_v42  ;;  %v2425_v2 = vrot.slane %v2402_v15, 1  ;;  %v3774_v14 = vld [vmem:[#allocation8] sm:$0xff] }
 0x521   :  { %2611 = vmatpush.bf16.msra.mxu3 %v3774_v14 }
 0x522   :  { %v2384_v46 = vadd.f32 %v2370_v27, %v2293_v47 }
 0x524   :  { %v2394_v58 = vadd.f32 %v4936_v57, %v2384_v46 }
 0x526   :  { %v2403_v53 = vmax.f32 %v2394_v58, 0.0 }
 0x527   :  { %v2240_v51 = vpop.f32.mrf.mxu2  ;;  %v2375_v55 = vpop.f32.mrf.mxu0 }
 0x528   :  { %v2296_v56 = vadd.f32 %v2295_v10, %v2240_v51  ;;  %v2427_v49 = vrot.slane %v2403_v53, 1 }
 0x52a   :  { %v2385_v24 = vadd.f32 %v2373_v45, %v2296_v56  ;;  %v2428_v41 = vsel %vm663_vm2, %v2425_v2, %v2427_v49 }
 0x52b   :  { %v2446_v8 = vmax.f32 %v2402_v15, %v2428_v41 }
 0x52c   :  { %v2395_v63 = vadd.f32 %v4936_v57, %v2385_v24  ;;  %v2426_v57 = vsel %vm663_vm2, %v2423_v38, %v2425_v2 }
 0x52d   :  { %v2445_v17 = vmax.f32 %v2401_v39, %v2426_v57 }
 0x52e   :  { %v2404_v0 = vmax.f32 %v2395_v63, 0.0 }
 0x52f   :  { %v2242_v28 = vpop.f32.mrf.mxu2  ;;  %v2451_v48 = vpack.c.bf16 %v2445_v17, %v2444_v11  ;;  %v2688_v17 = vperm.slane %v4812_v52, 3 }
 0x530   :  { %v2429_v31 = vrot.slane %v2404_v0, 1 }
 0x532   :  { %v2448_v37 = vmax.f32 %v2404_v0, %v2429_v31  ;;  %v2430_v59 = vsel %vm663_vm2, %v2427_v49, %v2429_v31 }
 0x533   :  { %v2447_v35 = vmax.f32 %v2403_v53, %v2430_v59 }
 0x534   :  { %v2453_v34 = vpack.c.bf16 %v2448_v37, %v2448_v37 }
 0x535   :  { %v2452_v61 = vpack.c.bf16 %v2447_v35, %v2446_v8 }
 0x536   :  { %v2483_v26 = vand.u32 %v2453_v34, %v4573_v32 }
 0x538   :  { %2488 = vmatpush.bf16.msrb.mxu1 %v2483_v26 }
 0x53c   :  { %2489 = vmatpush.bf16.msrb.mxu1 %v2452_v61 }
 0x540   :  { %2490 = vmatpush.bf16.msrb.mxu1 %v2451_v48 }
 0x544   :  { %2491 = vmatpush.bf16.msrb.mxu1 %v2450_v7 }
 0x548   :  { %2492 = vmatpush.bf16.msrb.mxu1 %v2449_v54 }
 0x54b   :  { %3550 = vmatmul.msk.bf16.vlgmr.msrb.gmra.mxu1 %vm2472_vm8, %v3772_v36 }
 0x54c   :  { %2666 = vmatpush.bf16.msra.mxu1 %v3779_v1 }
 0x550   :  { %2667 = vmatpush.bf16.msra.mxu1 %v3778_v18 }
 0x55b   :  { %3551 = vmatmul.msk.bf16.gmra.mxu1 %vm2472_vm8, %v3773_v44 }
 0x56b   :  { %3552 = vmatmul.msk.bf16.gmra.mxu1 %vm2472_vm8, %v2471_v43 }
 0x5c8   :  { %v2494_v33 = vpop.f32.mrf.mxu1 }
 0x5d0   :  { %v2496_v25 = vpop.f32.mrf.mxu1 }
 0x5d1   :  { %v2508_v54 = vpack.c.bf16 %v2496_v25, %v2494_v33 }
 0x5d3   :  { %3572 = vmatmul.msk.bf16.vlgmr.msra.gmra.mxu3 %vm2195_vm7, %v2508_v54  ;;  %v2522_v19 = vshll.u32 %v2508_v54, 16  ;;  %v2520_v9 = vshrl.u32 %v2508_v54, 16  ;;  %v2634_v7 = vrot.slane %v2508_v54, 1 }
 0x5d5   :  { %v2524_v10 = vrot.slane %v2522_v19, 1 }
 0x5d7   :  { %v2525_v3 = vor.u32 %v2524_v10, %v2520_v9 }
 0x5d8   :  { %v2499_v20 = vpop.f32.mrf.mxu1 }
 0x5e0   :  { %v2501_v22 = vpop.f32.mrf.mxu1 }
 0x5e1   :  { %v2509_v23 = vpack.c.bf16 %v2501_v22, %v2499_v20 }
 0x5e3   :  { %v2527_v21 = vshll.u32 %v2509_v23, 16  ;;  %v2635_v27 = vrot.slane %v2509_v23, 1  ;;  %3573 = vmatmul.msk.bf16.gmra.mxu3 %vm2195_vm7, %v2509_v23  ;;  %v2531_v55 = vshrl.u32 %v2509_v23, 16 }
 0x5e5   :  { %v2529_v42 = vrot.slane %v2527_v21, 1  ;;  %v2636_v45 = vsel %vm663_vm2, %v2634_v7, %v2635_v27 }
 0x5e6   :  { %3583 = vmatmul.msk.bf16.vlgmr.msra.gmra.mxu1 %vm2195_vm7, %v2636_v45 }
 0x5e7   :  { %v2530_v47 = vsel %vm223_vm3, %v2525_v3, %v2529_v42  ;;  %v2533_v62 = vor.u32 %v2531_v55, %v2529_v42 }
 0x5e8   :  { %3561 = vmatmul.msk.bf16.vlgmr.msrb.gmra.mxu2 %vm2195_vm7, %v2530_v47  ;;  %v2504_v29 = vpop.f32.mrf.mxu1 }
 0x5e9   :  { %v2510_v30 = vpack.c.bf16 %v2504_v29, %v2504_v29 }
 0x5eb   :  { %v2535_v46 = vshll.u32 %v2510_v30, 16  ;;  %v2637_v51 = vrot.slane %v2510_v30, 1  ;;  %v2539_v60 = vshrl.u32 %v2510_v30, 16 }
 0x5ed   :  { %v2537_v56 = vrot.slane %v2535_v46, 1  ;;  %v2638_v58 = vsel %vm663_vm2, %v2635_v27, %v2637_v51 }
 0x5ef   :  { %v2538_v24 = vsel %vm223_vm3, %v2533_v62, %v2537_v56  ;;  %v2541_v63 = vor.u32 %v2539_v60, %v2537_v56  ;;  %v3780_v56 = vld [vmem:[%s5077_s9] sm:$0xff]  ;;  %v3783_v60 = vld [vmem:[%s5073_s5 + $0x10] sm:$0xff] }
 0x5f0   :  { %v2506_v13 = vpop.f32.mrf.mxu1 }
 0x5f3   :  { %3574 = vmatmul.msk.bf16.gmra.mxu3 %vm2195_vm7, %v2510_v30 }
 0x5f6   :  { %3584 = vmatmul.msk.bf16.gmra.mxu1 %vm2195_vm7, %v2638_v58 }
 0x5f8   :  { %3562 = vmatmul.msk.bf16.gmra.mxu2 %vm2195_vm7, %v2538_v24  ;;  %v3784_v24 = vld [vmem:[%s5073_s5 + $0x18] sm:$0xff] }
 0x606   :  { %3585 = vmatmul.msk.bf16.gmra.mxu1 %vm2195_vm7, %v2637_v51 }
 0x608   :  { %3563 = vmatmul.msk.bf16.gmra.mxu2 %vm2195_vm7, %v2541_v63  ;;  %v3788_v63 = vld [vmem:[%s5073_s5 + $0x38] sm:$0xff] }
 0x609   :  { %2827 = vmatpush.bf16.msra.mxu0 %v3788_v63  ;;  %v3810_v63 = vld [vmem:[#allocation13 + $0x48] sm:$0xff] }
 0x656   :  { %v2613_v50 = vpop.f32.mrf.mxu3 }
 0x65e   :  { %v2615_v53 = vpop.f32.mrf.mxu3 }
 0x663   :  { %v2669_v0 = vpop.f32.mrf.mxu1 }
 0x666   :  { %v2618_v15 = vpop.f32.mrf.mxu3 }
 0x66b   :  { %v2572_v28 = vpop.f32.mrf.mxu2  ;;  %v2671_v31 = vpop.f32.mrf.mxu1 }
 0x66c   :  { %v2614_v61 = vadd.f32 %v2613_v50, %v2572_v28  ;;  %v3782_v50 = vld [vmem:[%s5073_s5 + $0x8] sm:$0xff]  ;;  %v3791_v28 = vld [vmem:[%s5073_s5 + $0x50] sm:$0xff] }
 0x66e   :  { %v2620_v39 = vpop.f32.mrf.mxu3  ;;  %v2683_v5 = vadd.f32 %v2669_v0, %v2614_v61  ;;  %v3800_v0 = vld [vmem:[%s5073_s5 + $0x98] sm:$0xff] }
 0x66f   :  { %3037 = vmatpush.bf16.msrb.mxu1 %v3800_v0 }
 0x670   :  { %v2689_v33 = vadd.f32 %v2688_v17, %v2683_v5 }
 0x672   :  { %v2694_v10 = vmax.f32 %v2689_v33, 0.0 }
 0x673   :  { %v2574_v49 = vpop.f32.mrf.mxu2  ;;  %v2674_v37 = vpop.f32.mrf.mxu1 }
 0x674   :  { %v2616_v8 = vadd.f32 %v2615_v53, %v2574_v49  ;;  %v2704_v45 = vrot.slane %v2694_v10, 1  ;;  %v3792_v53 = vld [vmem:[%s5073_s5 + $0x58] sm:$0xff]  ;;  %v3790_v49 = vld [vmem:[%s5073_s5 + $0x48] sm:$0xff] }
 0x675   :  { %2921 = vmatpush.bf16.msrb.mxu3 %v3792_v53  ;;  %v3829_v53 = vld [vmem:[#allocation14] sm:$0xff] }
 0x676   :  { %v2623_v2 = vpop.f32.mrf.mxu3  ;;  %v2684_v6 = vadd.f32 %v2671_v31, %v2616_v8  ;;  %v3799_v31 = vld [vmem:[%s5073_s5 + $0x90] sm:$0xff]  ;;  %v3793_v8 = vld [vmem:[%s5073_s5 + $0x60] sm:$0xff]  ;;  %v3049_v0 = vperm.slane %v3829_v53, 4 }
 0x677   :  { %3038 = vmatpush.bf16.msrb.mxu1 %v3799_v31 }
 0x678   :  { %v2690_v4 = vadd.f32 %v2688_v17, %v2684_v6 }
 0x679   :  { %2922 = vmatpush.bf16.msrb.mxu3 %v3791_v28 }
 0x67a   :  { %v2695_v19 = vmax.f32 %v2690_v4, 0.0 }
 0x67b   :  { %v2577_v59 = vpop.f32.mrf.mxu2  ;;  %v2676_v34 = vpop.f32.mrf.mxu1 }
 0x67c   :  { %v2619_v57 = vadd.f32 %v2618_v15, %v2577_v59  ;;  %v2705_v21 = vrot.slane %v2695_v19, 1  ;;  %v3781_v15 = vld [vmem:[%s5073_s5] sm:$0xff] }
 0x67d   :  { %2923 = vmatpush.bf16.msrb.mxu3 %v3790_v49  ;;  %v3789_v59 = vld [vmem:[%s5073_s5 + $0x40] sm:$0xff] }
 0x67e   :  { %v2625_v38 = vpop.f32.mrf.mxu3  ;;  %v2685_v11 = vadd.f32 %v2674_v37, %v2619_v57  ;;  %v2706_v30 = vsel %vm663_vm2, %v2704_v45, %v2705_v21  ;;  %v3798_v37 = vld [vmem:[%s5073_s5 + $0x88] sm:$0xff]  ;;  %v3804_v45 = vld [vmem:[#allocation13 + $0x18] sm:$0xff] }
 0x67f   :  { %v2718_v51 = vmax.f32 %v2694_v10, %v2706_v30  ;;  %3039 = vmatpush.bf16.msrb.mxu1 %v3798_v37  ;;  %v3785_v38 = vld [vmem:[%s5073_s5 + $0x20] sm:$0xff] }
 0x680   :  { %v2691_v14 = vadd.f32 %v2688_v17, %v2685_v11 }
 0x681   :  { %2924 = vmatpush.bf16.msrb.mxu3 %v3789_v59 }
 0x682   :  { %v2696_v25 = vmax.f32 %v2691_v14, 0.0 }
 0x683   :  { %v2579_v41 = vpop.f32.mrf.mxu2  ;;  %v2679_v26 = vpop.f32.mrf.mxu1 }
 0x684   :  { %v2621_v35 = vadd.f32 %v2620_v39, %v2579_v41  ;;  %v2707_v23 = vrot.slane %v2696_v25, 1  ;;  %v3787_v39 = vld [vmem:[%s5073_s5 + $0x30] sm:$0xff]  ;;  %v3796_v41 = vld [vmem:[%s5073_s5 + $0x78] sm:$0xff] }
 0x685   :  { %2828 = vmatpush.bf16.msra.mxu0 %v3787_v39 }
 0x686   :  { %v2686_v16 = vadd.f32 %v2676_v34, %v2621_v35  ;;  %v2708_v47 = vsel %vm663_vm2, %v2705_v21, %v2707_v23  ;;  %v3797_v34 = vld [vmem:[%s5073_s5 + $0x80] sm:$0xff]  ;;  %v3794_v35 = vld [vmem:[%s5073_s5 + $0x68] sm:$0xff] }
 0x687   :  { %v2719_v13 = vmax.f32 %v2695_v19, %v2708_v47  ;;  %3040 = vmatpush.bf16.msrb.mxu1 %v3797_v34  ;;  %v3808_v47 = vld [vmem:[#allocation13 + $0x38] sm:$0xff] }
 0x688   :  { %v2692_v40 = vadd.f32 %v2688_v17, %v2686_v16  ;;  %3138 = vmatpush.bf16.msra.mxu3 %v3808_v47 }
 0x689   :  { %v2723_v55 = vpack.c.bf16 %v2719_v13, %v2718_v51  ;;  %v3807_v13 = vld [vmem:[#allocation13 + $0x30] sm:$0xff] }
 0x68a   :  { %v2697_v18 = vmax.f32 %v2692_v40, 0.0 }
 0x68b   :  { %v2582_v48 = vpop.f32.mrf.mxu2  ;;  %v2681_v36 = vpop.f32.mrf.mxu1 }
 0x68c   :  { %v2624_v44 = vadd.f32 %v2623_v2, %v2582_v48  ;;  %v2709_v22 = vrot.slane %v2697_v18, 1  ;;  %v3786_v2 = vld [vmem:[%s5073_s5 + $0x28] sm:$0xff]  ;;  %3139 = vmatpush.bf16.msra.mxu3 %v3807_v13 }
 0x68d   :  { %2829 = vmatpush.bf16.msra.mxu0 %v3786_v2 }
 0x68e   :  { %v2687_v43 = vadd.f32 %v2679_v26, %v2624_v44  ;;  %v2710_v27 = vsel %vm663_vm2, %v2707_v23, %v2709_v22  ;;  %v3795_v26 = vld [vmem:[%s5073_s5 + $0x70] sm:$0xff] }
 0x68f   :  { %v2720_v29 = vmax.f32 %v2696_v25, %v2710_v27 }
 0x690   :  { %v2693_v1 = vadd.f32 %v2688_v17, %v2687_v43 }
 0x691   :  { %2830 = vmatpush.bf16.msra.mxu0 %v3785_v38 }
 0x692   :  { %v2698_v12 = vmax.f32 %v2693_v1, 0.0 }
 0x693   :  { %v2584_v54 = vpop.f32.mrf.mxu2 }
 0x694   :  { %v2711_v20 = vrot.slane %v2698_v12, 1 }
 0x695   :  { %2982 = vmatpush.bf16.msrb.mxu0 %v3796_v41 }
 0x696   :  { %v2722_v52 = vmax.f32 %v2698_v12, %v2711_v20  ;;  %v2712_v9 = vsel %vm663_vm2, %v2709_v22, %v2711_v20 }
 0x697   :  { %v2721_v42 = vmax.f32 %v2697_v18, %v2712_v9 }
 0x698   :  { %v2725_v7 = vpack.c.bf16 %v2722_v52, %v2722_v52 }
 0x699   :  { %v2724_v46 = vpack.c.bf16 %v2721_v42, %v2720_v29  ;;  %2983 = vmatpush.bf16.msrb.mxu0 %v3795_v26  ;;  %v3812_v29 = vld [vmem:[#allocation13 + $0x58] sm:$0xff] }
 0x69a   :  { %v2745_v3 = vand.u32 %v2725_v7, %v4573_v32  ;;  %v2728_v32 = vld [vmem:[%s5077_s9 + $0x8] sm:$0x3]  ;;  %3227 = vmatpush.bf16.msra.mxu1 %v3812_v29 }
 0x69b   :  { %v2734_v62 = vunpack.c.l.b16 %v2728_v32 }
 0x69c   :  { %2752 = vmatpush.bf16.msra.mxu2 %v2745_v3 }
 0x69d   :  { %v2736_v58 = vpack.c.b16 %v2734_v62, %v2734_v62  ;;  %2984 = vmatpush.bf16.msrb.mxu0 %v3794_v35  ;;  %v3802_v62 = vld [vmem:[#allocation13 + $0x8] sm:$0xff]  ;;  %v4071_v35 = vmov 65535  }
 0x6a0   :  { %2753 = vmatpush.bf16.msra.mxu2 %v2724_v46  ;;  %v3803_v46 = vld [vmem:[#allocation13 + $0x10] sm:$0xff] }
 0x6a1   :  { %2985 = vmatpush.bf16.msrb.mxu0 %v3793_v8 }
 0x6a4   :  { %2754 = vmatpush.bf16.msra.mxu2 %v2723_v55 }
 0x6a7   :  { %3590 = vmatmul.msk.bf16.vlgmr.msra.gmra.mxu2 %vm2737_vm9, %v3780_v56  ;;  %v3811_v56 = vld [vmem:[#allocation13 + $0x50] sm:$0xff] }
 0x6a8   :  { %2867 = vmatpush.bf16.msrb.mxu2 %v3784_v24  ;;  %3228 = vmatpush.bf16.msra.mxu1 %v3811_v56 }
 0x6ac   :  { %2868 = vmatpush.bf16.msrb.mxu2 %v3783_v60  ;;  %3229 = vmatpush.bf16.msra.mxu1 %v3810_v63 }
 0x6b0   :  { %2869 = vmatpush.bf16.msrb.mxu2 %v3782_v50 }
 0x6b4   :  { %2870 = vmatpush.bf16.msrb.mxu2 %v3781_v15 }
 0x6b7   :  { %3591 = vmatmul.msk.bf16.gmra.mxu2 %vm2737_vm9, %v2736_v58  ;;  %v3806_v58 = vld [vmem:[#allocation13 + $0x28] sm:$0xff] }
 0x6b8   :  { %3140 = vmatpush.bf16.msra.mxu3 %v3806_v58 }
 0x72a   :  { %v2756_v57 = vpop.f32.mrf.mxu2 }
 0x732   :  { %v2758_v16 = vpop.f32.mrf.mxu2 }
 0x733   :  { %v2765_v61 = vpack.c.bf16 %v2758_v16, %v2756_v57  ;;  %v3070_v57 = vsel %vm663_vm2, 4294967295, %v4071_v35 }
 0x735   :  { %3625 = vmatmul.msk.bf16.vlgmr.msrb.gmra.mxu2 %vm2819_vm10, %v2765_v61  ;;  %v2786_v17 = vshll.u32 %v2765_v61, 16  ;;  %v2784_v44 = vshrl.u32 %v2765_v61, 16  ;;  %v2887_v5 = vrot.slane %v2765_v61, 1  ;;  %v3003_v14 = vrot.slane %v2765_v61, 2 }
 0x737   :  { %v2788_v36 = vrot.slane %v2786_v17, 1  ;;  %v2942_v22 = vrot.slane %v2784_v44, 1  ;;  %v2943_v52 = vrot.slane %v2786_v17, 2  ;;  %v3071_v17 = vsel %vm3069_vm13, %v3070_v57, 0 }
 0x739   :  { %v2789_v4 = vor.u32 %v2788_v36, %v2784_v44  ;;  %v2944_v23 = vor.u32 %v2943_v52, %v2942_v22  ;;  %v3064_v36 = vld [vmem:[%s5078_s10] sm:$0x7]  ;;  %s4072_s10 = smov [#allocation16]  }
 0x73a   :  { %v2761_v11 = vpop.f32.mrf.mxu2  ;;  %v3801_v44 = vld [vmem:[#allocation13] sm:$0xff]  ;;  %s3247_s12 = sshll.u32 %s4072_s10, 4  ;;  %s3248_s12 = int_to_ptr.vmem [resolvable:$true] %s3247_s12 }
 0x73b   :  { %v2774_v48 = vpack.c.bf16 %v2761_v11, %v2761_v11 }
 0x73d   :  { %v2791_v6 = vshll.u32 %v2774_v48, 16  ;;  %v2888_v40 = vrot.slane %v2774_v48, 1  ;;  %v3004_v43 = vrot.slane %v2774_v48, 2  ;;  %v2945_v54 = vshrl.u32 %v2774_v48, 16 }
 0x73f   :  { %v2793_v1 = vrot.slane %v2791_v6, 1  ;;  %v2889_v18 = vsel %vm663_vm2, %v2887_v5, %v2888_v40  ;;  %v3005_v12 = vsel %vm3002_vm11, %v3003_v14, %v3004_v43  ;;  %v2947_v20 = vrot.slane %v2945_v54, 1  ;;  %v3809_v40 = vld [vmem:[#allocation13 + $0x40] sm:$0xff] }
 0x740   :  { %3642 = vmatmul.msk.bf16.vlgmr.msrb.gmra.mxu3 %vm2819_vm10, %v2889_v18  ;;  %3676 = vmatmul.msk.bf16.vlgmr.msrb.gmra.mxu1 %vm2819_vm10, %v3005_v12  ;;  %v2948_v19 = vrot.slane %v2791_v6, 2  ;;  %v3805_v6 = vld [vmem:[#allocation13 + $0x20] sm:$0xff] }
 0x741   :  { %v2794_v33 = vsel %vm223_vm3, %v2789_v4, %v2793_v1  ;;  %3141 = vmatpush.bf16.msra.mxu3 %v3805_v6  ;;  %3230 = vmatpush.bf16.msra.mxu1 %v3809_v40 }
 0x742   :  { %3608 = vmatmul.msk.bf16.vlgmr.msra.gmra.mxu0 %vm2819_vm10, %v2794_v33  ;;  %v2763_v25 = vpop.f32.mrf.mxu2  ;;  %v2949_v10 = vor.u32 %v2948_v19, %v2947_v20  ;;  %v3237_v20 = vperm.slane %v3829_v53, 5 }
 0x743   :  { %3178 = vmatpush.bf16.msra.mxu0 %v3804_v45 }
 0x744   :  { %v2950_v9 = vsel %vm2941_vm12, %v2944_v23, %v2949_v10 }
 0x747   :  { %3179 = vmatpush.bf16.msra.mxu0 %v3803_v46 }
 0x74b   :  { %3180 = vmatpush.bf16.msra.mxu0 %v3802_v62 }
 0x74f   :  { %3181 = vmatpush.bf16.msra.mxu0 %v3801_v44 }
 0x752   :  { %3659 = vmatmul.msk.bf16.vlgmr.msrb.gmra.mxu0 %vm2819_vm10, %v2950_v9 }
 0x7b8   :  { %v2872_v27 = vpop.f32.mrf.mxu2 }
 0x7bd   :  { %v3042_v55 = vpop.f32.mrf.mxu1 }
 0x7bf   :  { %v2832_v7 = vpop.f32.mrf.mxu0 }
 0x7c0   :  { %v2873_v42 = vadd.f32 %v2872_v27, %v2832_v7  ;;  %v2874_v24 = vpop.f32.mrf.mxu2 }
 0x7c3   :  { %v2926_v3 = vpop.f32.mrf.mxu3 }
 0x7c4   :  { %v2931_v30 = vadd.f32 %v2926_v3, %v2873_v42 }
 0x7c5   :  { %v3044_v37 = vpop.f32.mrf.mxu1 }
 0x7c7   :  { %v2834_v21 = vpop.f32.mrf.mxu0 }
 0x7c8   :  { %v2875_v15 = vadd.f32 %v2874_v24, %v2834_v21 }
 0x7cb   :  { %v2928_v60 = vpop.f32.mrf.mxu3 }
 0x7cc   :  { %v2932_v28 = vadd.f32 %v2928_v60, %v2875_v15 }
 0x7cf   :  { %v2987_v51 = vpop.f32.mrf.mxu0 }
 0x7d0   :  { %v2992_v32 = vadd.f32 %v2987_v51, %v2931_v30 }
 0x7d2   :  { %v3047_v50 = vadd.f32 %v3042_v55, %v2992_v32 }
 0x7d4   :  { %v3050_v39 = vadd.f32 %v3049_v0, %v3047_v50 }
 0x7d6   :  { %v3052_v59 = vmax.f32 %v3050_v39, 0.0 }
 0x7d7   :  { %v2989_v31 = vpop.f32.mrf.mxu0 }
 0x7d8   :  { %v2993_v49 = vadd.f32 %v2989_v31, %v2932_v28  ;;  %v3056_v41 = vrot.slane %v3052_v59, 1 }
 0x7da   :  { %v3048_v2 = vadd.f32 %v3044_v37, %v2993_v49 }
 0x7dc   :  { %v3051_v34 = vadd.f32 %v3049_v0, %v3048_v2 }
 0x7de   :  { %v3053_v38 = vmax.f32 %v3051_v34, 0.0 }
 0x7e0   :  { %v3057_v26 = vrot.slane %v3053_v38, 1 }
 0x7e2   :  { %v3058_v8 = vsel %vm663_vm2, %v3056_v41, %v3057_v26  ;;  %v3062_v16 = vmax.f32 %v3053_v38, %v3057_v26 }
 0x7e3   :  { %v3061_v61 = vmax.f32 %v3052_v59, %v3058_v8 }
 0x7e5   :  { %v3063_v11 = vpack.c.bf16 %v3062_v16, %v3061_v61 }
 0x7e7   :  { %v3073_v48 = vand.u32 %v3071_v17, %v3063_v11 }
 0x7e9   :  { %3082 = vmatpush.bf16.msra.mxu2 %v3073_v48 }
 0x7ec   :  { %3677 = vmatmul.msk.bf16.vlgmr.msra.gmra.mxu2 %vm3065_vm14, %v3064_v36 }
 0x86f   :  { %v3084_v43 = vpop.f32.mrf.mxu2 }
 0x870   :  { %v3088_v5 = vpack.c.bf16 %v3084_v43, %v3084_v43 }
 0x872   :  { %v3106_v14 = vrot.slane %v3088_v5, 1  ;;  %v3195_v1 = vrot.slane %v3088_v5, 2  ;;  %3711 = vmatmul.msk.bf16.vlgmr.msra.gmra.mxu0 %vm2819_vm10, %v3088_v5 }
 0x874   :  { %3694 = vmatmul.msk.bf16.vlgmr.msra.gmra.mxu3 %vm2819_vm10, %v3106_v14  ;;  %3728 = vmatmul.msk.bf16.vlgmr.msra.gmra.mxu1 %vm2819_vm10, %v3195_v1 }
 0x877   :  { %v3086_v4 = vpop.f32.mrf.mxu2 }
 0x8ef   :  { %v3183_v18 = vpop.f32.mrf.mxu0 }
 0x8f1   :  { %v3232_v12 = vpop.f32.mrf.mxu1 }
 0x8f7   :  { %v3143_v33 = vpop.f32.mrf.mxu3  ;;  %v3185_v25 = vpop.f32.mrf.mxu0 }
 0x8f8   :  { %v3184_v54 = vadd.f32 %v3183_v18, %v3143_v33 }
 0x8f9   :  { %v3234_v19 = vpop.f32.mrf.mxu1 }
 0x8fa   :  { %v3236_v22 = vadd.f32 %v3232_v12, %v3184_v54 }
 0x8fc   :  { %v3238_v52 = vadd.f32 %v3237_v20, %v3236_v22 }
 0x8fe   :  { %v3239_v10 = vmax.f32 %v3238_v52, 0.0 }
 0x8ff   :  { %v3145_v23 = vpop.f32.mrf.mxu3 }
 0x900   :  { %3241 = vst.msk [vmem:[#allocation16] sm:$0x3] %vm3240_vm15, %v3239_v10 }
 0x901   :  { %3252 = dma.vmem_to_hbm [thread:$0]  %s3248_s12, 32, %s3250_s28, [#allocation4]  }
 0x902   :  { %4056 = dma.done.wait [#allocation4], 32  }
 0x903   :  { %4057 = vsyncadd [#allocation4], 4294967264 }
 0x904   :  { %3257 = vsyncpa [#allocation3], 1 }
 0x905   :  { %3258 = vsyncpa [#allocation6], 1 }
 0x906   :  { %3259 = vsyncpa [#allocation9], 1 }
 0x907   :  { %3260 = vsyncpa [#allocation12], 1 }
 0x908   :  { %3261 = vsyncpa [#allocation15], 1 }
 0x909   :  { %3262 = vsyncpa [#allocation4], 1 }

</bundles_post_ra>
